<compile_context>
chip_gen: v7x
topology: tpu7x:2x2x1
jax: 0.10.0
libtpu: 0.0.40
codegen_flags: <defaults>
</compile_context>

<pallas_src>
import functools

import jax
import jax.numpy as jnp
import numpy as np
from jax.experimental import pallas as pl
from jax.experimental.pallas import tpu as pltpu

_EPS = 1e-5                      # nn.BatchNorm2d default eps
_VMEM_LIMIT = 48 * 1024 * 1024   # safe on v5e/v6e (128 MiB) and v7x (64 MiB)
_LANE = 128


def _round_up(v, m):
    return ((v + m - 1) // m) * m


def _pick_row_tile(m, cap=2048):
    for tm in (cap, 1024, 512, 256, 128, 64, 32, 16, 8):
        if tm <= m and m % tm == 0:
            return tm
    return m


# ----------------------------------------------------------- BN statistics --

def _stats_kernel(x_ref, o_ref):
    # x_ref: (tm, Cp) f32 tile ; o_ref: (2, Cp) f32, resident across the grid.
    @pl.when(pl.program_id(0) == 0)
    def _():
        o_ref[...] = jnp.zeros_like(o_ref)

    x = x_ref[...]
    s1 = jnp.sum(x, axis=0, keepdims=True)
    s2 = jnp.sum(x * x, axis=0, keepdims=True)
    o_ref[...] += jnp.concatenate([s1, s2], axis=0)


def bn_stats_pallas(x2d):
    """Per-channel [sum; sum-of-squares] of an (M, Cp) f32 array (tiled over M)."""
    m, cp = x2d.shape
    tm = _pick_row_tile(m)
    return pl.pallas_call(
        _stats_kernel,
        out_shape=jax.ShapeDtypeStruct((2, cp), jnp.float32),
        grid=(m // tm,),
        in_specs=[pl.BlockSpec((tm, cp), lambda i: (i, 0))],
        out_specs=pl.BlockSpec((2, cp), lambda i: (0, 0)),
        compiler_params=pltpu.CompilerParams(
            dimension_semantics=("arbitrary",),
            vmem_limit_bytes=_VMEM_LIMIT),
    )(x2d)


def _bn_coeffs(stats, count, gamma, beta, cp):
    mean = stats[0] / count
    var = stats[1] / count - mean * mean            # biased var (training mode)
    g = jnp.pad(gamma.astype(jnp.float32), (0, cp - gamma.shape[0]))
    b = jnp.pad(beta.astype(jnp.float32), (0, cp - beta.shape[0]))
    scale = g * jax.lax.rsqrt(var + _EPS)
    shift = b - mean * scale
    return scale, shift


# ------------------------------------------------------ implicit-GEMM conv --

def _prep_conv_input(t, k, stride, pad):
    """Pre-activated NHWC -> padded, phase-stacked bf16 conv input.

    Returns (xph, Ho, Wo, s_eff, Hq) with xph of shape
    (N, s_eff*s_eff*Hq, Wq, C).  Tap (kh, kw) reads rows
    [((kh%s)*s + kw%s)*Hq + kh//s : ... + Ho] and cols [kw//s : kw//s + Wo].
    """
    N, H, W, C = t.shape
    Ho = (H + 2 * pad - k) // stride + 1
    Wo = (W + 2 * pad - k) // stride + 1
    if k == 1:
        # 1x1 conv: no padding; the stride is a pure spatial subsample which
        # commutes with the per-pixel bn-affine + relu already applied to t.
        xs = t[:, ::stride, ::stride, :][:, :Ho, :Wo, :]
        return xs.astype(jnp.bfloat16), Ho, Wo, 1, Ho
    s = stride
    Hq = Ho + (k - 1) // s
    Wq = Wo + (k - 1) // s
    Hp, Wp = s * Hq, s * Wq
    tp = jnp.pad(t, ((0, 0), (pad, Hp - H - pad), (pad, Wp - W - pad), (0, 0)))
    if s == 1:
        return tp.astype(jnp.bfloat16), Ho, Wo, 1, Hq
    phases = [tp[:, p::s, q::s, :] for p in range(s) for q in range(s)]
    xph = jnp.concatenate(phases, axis=1).astype(jnp.bfloat16)
    return xph, Ho, Wo, s, Hq


def _prep_weight(w_oihw, cin_p, cout_p):
    """(Cout, Cin, kh, kw) PyTorch layout -> (kh*kw, Cin_p, Cout_p) bf16."""
    cout, cin, kh, kw = w_oihw.shape
    w = jnp.transpose(w_oihw, (2, 3, 1, 0)).reshape(kh * kw, cin, cout)
    w = jnp.pad(w, ((0, 0), (0, cin_p - cin), (0, cout_p - cout)))
    return w.astype(jnp.bfloat16)


def _make_conv_kernel(k, s, Hq, Ho, Wo, has_residual):
    m = Ho * Wo

    def kernel(*refs):
        if has_residual:
            x_ref, w_ref, r_ref, o_ref, acc_ref = refs
            acc_ref[...] = r_ref[0]              # residual fused into the acc init
        else:
            x_ref, w_ref, o_ref, acc_ref = refs
            acc_ref[...] = jnp.zeros_like(acc_ref)
        for kh in range(k):
            for kw in range(k):
                row0 = ((kh % s) * s + (kw % s)) * Hq + kh // s
                col0 = kw // s
                win = x_ref[0, row0:row0 + Ho, col0:col0 + Wo, :]   # (Ho, Wo, Cin_p) bf16
                a = win.reshape(m, win.shape[-1])
                acc_ref[...] += jnp.dot(a, w_ref[kh * k + kw],
                                        preferred_element_type=jnp.float32)
        o_ref[0] = acc_ref[...]

    return kernel


def _conv_pallas(xph, w3, residual, k, s, Ho, Wo, Hq):
    """Conv as implicit GEMM: grid over images, 9-tap in-kernel accumulation."""
    n = xph.shape[0]
    cout_p = w3.shape[-1]
    m = Ho * Wo
    has_res = residual is not None
    kernel = _make_conv_kernel(k, s, Hq, Ho, Wo, has_res)
    in_specs = [
        pl.BlockSpec((1,) + xph.shape[1:], lambda i: (i, 0, 0, 0)),
        pl.BlockSpec(w3.shape, lambda i: (0, 0, 0)),   # weight resident across grid
    ]
    args = [xph, w3]
    if has_res:
        in_specs.append(pl.BlockSpec((1, m, cout_p), lambda i: (i, 0, 0)))
        args.append(residual)
    return pl.pallas_call(
        kernel,
        out_shape=jax.ShapeDtypeStruct((n, m, cout_p), jnp.float32),
        grid=(n,),
        in_specs=in_specs,
        out_specs=pl.BlockSpec((1, m, cout_p), lambda i: (i, 0, 0)),
        scratch_shapes=[pltpu.VMEM((m, cout_p), jnp.float32)],
        compiler_params=pltpu.CompilerParams(
            dimension_semantics=("parallel",),
            vmem_limit_bytes=_VMEM_LIMIT),
    )(*args)


# ------------------------------------------------------------ block forward --

@functools.partial(jax.jit, static_argnames=("stride",))
def w_basic_block_forward(x_nchw, params, *, stride):
    # NCHW -> NHWC once at the block boundary.
    # TODO(synk): keep NHWC end-to-end across a full network to avoid
    #             per-block transposes.
    x = jnp.transpose(x_nchw, (0, 2, 3, 1)).astype(jnp.float32)
    N, H, W, Cin = x.shape
    Cout = params['conv1_w'].shape[0]
    equal_in_out = (Cin == Cout)
    if equal_in_out and stride != 1:
        raise ValueError("identity shortcut requires stride == 1")
    cin_p = _round_up(Cin, _LANE)
    cout_p = _round_up(Cout, _LANE)

    xp = jnp.pad(x, ((0, 0), (0, 0), (0, 0), (0, cin_p - Cin)))   # (N,H,W,cin_p)

    # bn1 (training mode, batch stats) -> per-channel affine; relu in glue.
    st1 = bn_stats_pallas(xp.reshape(N * H * W, cin_p))
    scale1, shift1 = _bn_coeffs(st1, N * H * W,
                                params['bn1_w'], params['bn1_b'], cin_p)
    t = jnp.maximum(xp * scale1 + shift1, 0.0)

    # conv1: 3x3, stride, pad 1 (implicit GEMM, no HBM im2col)
    xph1, Ho, Wo, s1, Hq1 = _prep_conv_input(t, 3, stride, 1)
    w1 = _prep_weight(params['conv1_w'], cin_p, cout_p)
    out1 = _conv_pallas(xph1, w1, None, 3, s1, Ho, Wo, Hq1)   # (N, Ho*Wo, cout_p)

    # bn2 + relu
    st2 = bn_stats_pallas(out1.reshape(N * Ho * Wo, cout_p))
    scale2, shift2 = _bn_coeffs(st2, N * Ho * Wo,
                                params['bn2_w'], params['bn2_b'], cout_p)
    t2 = jnp.maximum(out1 * scale2 + shift2, 0.0).reshape(N, Ho, Wo, cout_p)

    # shortcut branch
    if equal_in_out:
        residual = xp.reshape(N, H * W, cin_p)       # identity (cin_p == cout_p)
    else:
        xsc, Hs, Ws, ss, Hqs = _prep_conv_input(t, 1, stride, 0)
        wsc = _prep_weight(params['convsc_w'], cin_p, cout_p)
        residual = _conv_pallas(xsc, wsc, None, 1, ss, Hs, Ws, Hqs)

    # conv2: 3x3, stride 1, pad 1, residual fused into the accumulator
    xph2, Ho2, Wo2, s2, Hq2 = _prep_conv_input(t2, 3, 1, 1)
    w2 = _prep_weight(params['conv2_w'], cout_p, cout_p)
    out = _conv_pallas(xph2, w2, residual, 3, s2, Ho2, Wo2, Hq2)

    out = out.reshape(N, Ho2, Wo2, cout_p)[:, :, :, :Cout]
    return jnp.transpose(out, (0, 3, 1, 2))          # back to NCHW


# --------------------------------------------------------------- reference --

def _ref_forward(x, params, stride, equal_in_out):
    def bn_relu(v, g, b):
        mean = jnp.mean(v, axis=(0, 2, 3), keepdims=True)
        var = jnp.mean((v - mean) ** 2, axis=(0, 2, 3), keepdims=True)
        y = (v - mean) * jax.lax.rsqrt(var + _EPS) * g.reshape(1, -1, 1, 1) \
            + b.reshape(1, -1, 1, 1)
        return jnp.maximum(y, 0.0)

    def conv(v, w, s, p):
        return jax.lax.conv_general_dilated(
            v, w, (s, s), [(p, p), (p, p)],
            dimension_numbers=('NCHW', 'OIHW', 'NCHW'),
            precision=jax.lax.Precision.HIGHEST)

    t = bn_relu(x, params['bn1_w'], params['bn1_b'])
    out = conv(t, params['conv1_w'], stride, 1)
    out = bn_relu(out, params['bn2_w'], params['bn2_b'])
    out = conv(out, params['conv2_w'], 1, 1)
    sc = x if equal_in_out else conv(t, params['convsc_w'], stride, 0)
    return sc + out


# --------------------------------------------------------------------- main --

if __name__ == "__main__":
    def make_params(key, cin, cout, has_sc):
        ks = jax.random.split(key, 7)
        p = {
            'bn1_w':   1.0 + 0.1 * jax.random.normal(ks[0], (cin,), jnp.float32),
            'bn1_b':   0.1 * jax.random.normal(ks[1], (cin,), jnp.float32),
            'conv1_w': 0.1 * jax.random.normal(ks[2], (cout, cin, 3, 3), jnp.float32),
            'bn2_w':   1.0 + 0.1 * jax.random.normal(ks[3], (cout,), jnp.float32),
            'bn2_b':   0.1 * jax.random.normal(ks[4], (cout,), jnp.float32),
            'conv2_w': 0.1 * jax.random.normal(ks[5], (cout, cout, 3, 3), jnp.float32),
        }
        if has_sc:
            p['convsc_w'] = 0.1 * jax.random.normal(ks[6], (cout, cin, 1, 1),
                                                    jnp.float32)
        return p

    key = jax.random.PRNGKey(0)
    k1, k2, k3, k4 = jax.random.split(key, 4)

    # Config B: Cin=4 -> Cout=8, stride=2, 1x1 conv shortcut (not equalInOut).
    xB = jax.random.normal(k1, (2, 4, 16, 16), jnp.float32)
    pB = make_params(k2, 4, 8, True)
    outB = jax.block_until_ready(w_basic_block_forward(xB, pB, stride=2))
    refB = _ref_forward(xB, pB, 2, False)
    np.testing.assert_allclose(np.asarray(outB), np.asarray(refB),
                               rtol=3e-2, atol=3e-2)

    # Config A: Cin=Cout=8, stride=1, identity shortcut (equalInOut).
    xA = jax.random.normal(k3, (2, 8, 16, 16), jnp.float32)
    pA = make_params(k4, 8, 8, False)
    outA = jax.block_until_ready(w_basic_block_forward(xA, pA, stride=1))
    refA = _ref_forward(xA, pA, 1, True)
    np.testing.assert_allclose(np.asarray(outA), np.asarray(refA),
                               rtol=3e-2, atol=3e-2)

    print("KERNEL_OK")
</pallas_src>

<mosaic_0001>
module attributes {stable_mosaic.version = 11 : i64} {
  func.func @_stats_kernel(%arg0: i32, %arg1: memref<512x128xf32, #tpu.memory_space<vmem>>, %arg2: memref<2x128xf32, #tpu.memory_space<vmem>>) attributes {dimension_semantics = [#tpu.dimension_semantics<arbitrary>], iteration_bounds = array<i64: 1>, scalar_prefetch = 0 : i64, scratch_operands = 0 : i64, tpu.core_type = #tpu.core_type<tc>, window_params = [{transform_indices = @transform_0, window_bounds = array<i64: 512, 128>}, {pipeline_mode = #tpu.pipeline_mode<synchronous>, transform_indices = @transform_1, window_bounds = array<i64: 2, 128>}]} {
    %c0_i32 = arith.constant 0 : i32
    %0 = arith.cmpi eq, %arg0, %c0_i32 : i32
    %1 = arith.extui %0 : i1 to i32
    %c0_i32_0 = arith.constant 0 : i32
    %2 = arith.cmpi ne, %1, %c0_i32_0 : i32
    scf.if %2 {
      %cst_7 = arith.constant 0.000000e+00 : f32
      %13 = vector.broadcast %cst_7 : f32 to vector<2x128xf32>
      %c0_8 = arith.constant 0 : index
      %c0_9 = arith.constant 0 : index
      %14 = vector.load %arg2[%c0_8, %c0_9] : memref<2x128xf32, #tpu.memory_space<vmem>>, vector<2x128xf32>
      tpu.vector_store %arg2[%c0_8, %c0_9], %13 {strides = array<i32>} : memref<2x128xf32, #tpu.memory_space<vmem>>, vector<2x128xf32>,
    } else {
    }
    %c0 = arith.constant 0 : index
    %c0_1 = arith.constant 0 : index
    %3 = vector.load %arg1[%c0, %c0_1] : memref<512x128xf32, #tpu.memory_space<vmem>>, vector<512x128xf32>
    %cst = arith.constant dense<0.000000e+00> : vector<128xf32>
    %4 = vector.multi_reduction <add>, %3, %cst [0] : vector<512x128xf32> to vector<128xf32>
    %5 = vector.shape_cast %4 : vector<128xf32> to vector<1x128xf32>
    %6 = arith.mulf %3, %3 : vector<512x128xf32>
    %cst_2 = arith.constant dense<0.000000e+00> : vector<128xf32>
    %7 = vector.multi_reduction <add>, %6, %cst_2 [0] : vector<512x128xf32> to vector<128xf32>
    %8 = vector.shape_cast %7 : vector<128xf32> to vector<1x128xf32>
    %c0_3 = arith.constant 0 : index
    %c0_4 = arith.constant 0 : index
    %9 = vector.load %arg2[%c0_3, %c0_4] : memref<2x128xf32, #tpu.memory_space<vmem>>, vector<2x128xf32>
    %10 = tpu.concatenate %5, %8 in 0 : vector<1x128xf32>, vector<1x128xf32> -> vector<2x128xf32>
    %11 = arith.addf %9, %10 : vector<2x128xf32>
    %c0_5 = arith.constant 0 : index
    %c0_6 = arith.constant 0 : index
    %12 = vector.load %arg2[%c0_5, %c0_6] : memref<2x128xf32, #tpu.memory_space<vmem>>, vector<2x128xf32>
    tpu.vector_store %arg2[%c0_5, %c0_6], %11 {strides = array<i32>} : memref<2x128xf32, #tpu.memory_space<vmem>>, vector<2x128xf32>,
    return
  }
  func.func @transform_0(%arg0: i32) -> (i32, i32) {
    %c0_i32 = arith.constant 0 : i32
    %c0_i32_0 = arith.constant 0 : i32
    return %arg0, %c0_i32 : i32, i32
  }
  func.func @transform_1(%arg0: i32) -> (i32, i32) {
    %c0_i32 = arith.constant 0 : i32
    %c0_i32_0 = arith.constant 0 : i32
    %c0_i32_1 = arith.constant 0 : i32
    return %c0_i32, %c0_i32_0 : i32, i32
  }
}

module attributes {stable_mosaic.version = 11 : i64} {
  func.func @kernel(%arg0: i32, %arg1: memref<1x36x9x128xbf16, #tpu.memory_space<vmem>>, %arg2: memref<9x128x128xbf16, #tpu.memory_space<vmem>>, %arg3: memref<1x64x128xf32, #tpu.memory_space<vmem>>, %arg4: memref<64x128xf32, #tpu.memory_space<vmem>>) attributes {dimension_semantics = [#tpu.dimension_semantics<parallel>], iteration_bounds = array<i64: 2>, scalar_prefetch = 0 : i64, scratch_operands = 1 : i64, tpu.core_type = #tpu.core_type<tc>, window_params = [{transform_indices = @transform_0, window_bounds = array<i64: 1, 36, 9, 128>}, {pipeline_mode = #tpu.pipeline_mode<synchronous>, transform_indices = @transform_1, window_bounds = array<i64: 9, 128, 128>}, {transform_indices = @transform_2, window_bounds = array<i64: 1, 64, 128>}]} {
    %cst = arith.constant 0.000000e+00 : f32
    %0 = vector.broadcast %cst : f32 to vector<64x128xf32>
    %c0 = arith.constant 0 : index
    %c0_0 = arith.constant 0 : index
    %1 = vector.load %arg4[%c0, %c0_0] : memref<64x128xf32, #tpu.memory_space<vmem>>, vector<64x128xf32>
    tpu.vector_store %arg4[%c0, %c0_0], %0 {strides = array<i32>} : memref<64x128xf32, #tpu.memory_space<vmem>>, vector<64x128xf32>,
    %c0_1 = arith.constant 0 : index
    %c0_2 = arith.constant 0 : index
    %c0_3 = arith.constant 0 : index
    %c0_4 = arith.constant 0 : index
    %2 = vector.load %arg1[%c0_1, %c0_2, %c0_3, %c0_4] : memref<1x36x9x128xbf16, #tpu.memory_space<vmem>>, vector<1x8x8x128xbf16>
    %3 = vector.shape_cast %2 : vector<1x8x8x128xbf16> to vector<8x8x128xbf16>
    %4 = vector.shape_cast %3 : vector<8x8x128xbf16> to vector<64x128xbf16>
    %c0_5 = arith.constant 0 : index
    %c0_6 = arith.constant 0 : index
    %5 = vector.load %arg4[%c0_5, %c0_6] : memref<64x128xf32, #tpu.memory_space<vmem>>, vector<64x128xf32>
    %c0_7 = arith.constant 0 : index
    %c0_8 = arith.constant 0 : index
    %c0_9 = arith.constant 0 : index
    %6 = vector.load %arg2[%c0_7, %c0_8, %c0_9] : memref<9x128x128xbf16, #tpu.memory_space<vmem>>, vector<1x128x128xbf16>
    %7 = vector.shape_cast %6 : vector<1x128x128xbf16> to vector<128x128xbf16>
    %cst_10 = arith.constant dense<0.000000e+00> : vector<64x128xf32>
    %8 = tpu.matmul %4, %7, %cst_10 {dimension_numbers = #tpu.dot_dimension_numbers<[1], [0], [0], [1], [0, 0, 1, 1], [], []>} : vector<64x128xbf16>, vector<128x128xbf16>, vector<64x128xf32> -> vector<64x128xf32>
    %9 = arith.addf %5, %8 : vector<64x128xf32>
    %c0_11 = arith.constant 0 : index
    %c0_12 = arith.constant 0 : index
    %10 = vector.load %arg4[%c0_11, %c0_12] : memref<64x128xf32, #tpu.memory_space<vmem>>, vector<64x128xf32>
    tpu.vector_store %arg4[%c0_11, %c0_12], %9 {strides = array<i32>} : memref<64x128xf32, #tpu.memory_space<vmem>>, vector<64x128xf32>,
    %c0_13 = arith.constant 0 : index
    %c9 = arith.constant 9 : index
    %c0_14 = arith.constant 0 : index
    %c0_15 = arith.constant 0 : index
    %11 = vector.load %arg1[%c0_13, %c9, %c0_14, %c0_15] : memref<1x36x9x128xbf16, #tpu.memory_space<vmem>>, vector<1x8x8x128xbf16>
    %12 = vector.shape_cast %11 : vector<1x8x8x128xbf16> to vector<8x8x128xbf16>
    %13 = vector.shape_cast %12 : vector<8x8x128xbf16> to vector<64x128xbf16>
    %c0_16 = arith.constant 0 : index
    %c0_17 = arith.constant 0 : index
    %14 = vector.load %arg4[%c0_16, %c0_17] : memref<64x128xf32, #tpu.memory_space<vmem>>, vector<64x128xf32>
    %c1 = arith.constant 1 : index
    %c0_18 = arith.constant 0 : index
    %c0_19 = arith.constant 0 : index
    %15 = vector.load %arg2[%c1, %c0_18, %c0_19] : memref<9x128x128xbf16, #tpu.memory_space<vmem>>, vector<1x128x128xbf16>
    %16 = vector.shape_cast %15 : vector<1x128x128xbf16> to vector<128x128xbf16>
    %cst_20 = arith.constant dense<0.000000e+00> : vector<64x128xf32>
    %17 = tpu.matmul %13, %16, %cst_20 {dimension_numbers = #tpu.dot_dimension_numbers<[1], [0], [0], [1], [0, 0, 1, 1], [], []>} : vector<64x128xbf16>, vector<128x128xbf16>, vector<64x128xf32> -> vector<64x128xf32>
    %18 = arith.addf %14, %17 : vector<64x128xf32>
    %c0_21 = arith.constant 0 : index
    %c0_22 = arith.constant 0 : index
    %19 = vector.load %arg4[%c0_21, %c0_22] : memref<64x128xf32, #tpu.memory_space<vmem>>, vector<64x128xf32>
    tpu.vector_store %arg4[%c0_21, %c0_22], %18 {strides = array<i32>} : memref<64x128xf32, #tpu.memory_space<vmem>>, vector<64x128xf32>,
    %c0_23 = arith.constant 0 : index
    %c0_24 = arith.constant 0 : index
    %c1_25 = arith.constant 1 : index
    %c0_26 = arith.constant 0 : index
    %20 = vector.load %arg1[%c0_23, %c0_24, %c1_25, %c0_26] : memref<1x36x9x128xbf16, #tpu.memory_space<vmem>>, vector<1x8x8x128xbf16>
    %21 = vector.shape_cast %20 : vector<1x8x8x128xbf16> to vector<8x8x128xbf16>
    %22 = vector.shape_cast %21 : vector<8x8x128xbf16> to vector<64x128xbf16>
    %c0_27 = arith.constant 0 : index
    %c0_28 = arith.constant 0 : index
    %23 = vector.load %arg4[%c0_27, %c0_28] : memref<64x128xf32, #tpu.memory_space<vmem>>, vector<64x128xf32>
    %c2 = arith.constant 2 : index
    %c0_29 = arith.constant 0 : index
    %c0_30 = arith.constant 0 : index
    %24 = vector.load %arg2[%c2, %c0_29, %c0_30] : memref<9x128x128xbf16, #tpu.memory_space<vmem>>, vector<1x128x128xbf16>
    %25 = vector.shape_cast %24 : vector<1x128x128xbf16> to vector<128x128xbf16>
    %cst_31 = arith.constant dense<0.000000e+00> : vector<64x128xf32>
    %26 = tpu.matmul %22, %25, %cst_31 {dimension_numbers = #tpu.dot_dimension_numbers<[1], [0], [0], [1], [0, 0, 1, 1], [], []>} : vector<64x128xbf16>, vector<128x128xbf16>, vector<64x128xf32> -> vector<64x128xf32>
    %27 = arith.addf %23, %26 : vector<64x128xf32>
    %c0_32 = arith.constant 0 : index
    %c0_33 = arith.constant 0 : index
    %28 = vector.load %arg4[%c0_32, %c0_33] : memref<64x128xf32, #tpu.memory_space<vmem>>, vector<64x128xf32>
    tpu.vector_store %arg4[%c0_32, %c0_33], %27 {strides = array<i32>} : memref<64x128xf32, #tpu.memory_space<vmem>>, vector<64x128xf32>,
    %c0_34 = arith.constant 0 : index
    %c18 = arith.constant 18 : index
    %c0_35 = arith.constant 0 : index
    %c0_36 = arith.constant 0 : index
    %29 = vector.load %arg1[%c0_34, %c18, %c0_35, %c0_36] : memref<1x36x9x128xbf16, #tpu.memory_space<vmem>>, vector<1x8x8x128xbf16>
    %30 = vector.shape_cast %29 : vector<1x8x8x128xbf16> to vector<8x8x128xbf16>
    %31 = vector.shape_cast %30 : vector<8x8x128xbf16> to vector<64x128xbf16>
    %c0_37 = arith.constant 0 : index
    %c0_38 = arith.constant 0 : index
    %32 = vector.load %arg4[%c0_37, %c0_38] : memref<64x128xf32, #tpu.memory_space<vmem>>, vector<64x128xf32>
    %c3 = arith.constant 3 : index
    %c0_39 = arith.constant 0 : index
    %c0_40 = arith.constant 0 : index
    %33 = vector.load %arg2[%c3, %c0_39, %c0_40] : memref<9x128x128xbf16, #tpu.memory_space<vmem>>, vector<1x128x128xbf16>
    %34 = vector.shape_cast %33 : vector<1x128x128xbf16> to vector<128x128xbf16>
    %cst_41 = arith.constant dense<0.000000e+00> : vector<64x128xf32>
    %35 = tpu.matmul %31, %34, %cst_41 {dimension_numbers = #tpu.dot_dimension_numbers<[1], [0], [0], [1], [0, 0, 1, 1], [], []>} : vector<64x128xbf16>, vector<128x128xbf16>, vector<64x128xf32> -> vector<64x128xf32>
    %36 = arith.addf %32, %35 : vector<64x128xf32>
    %c0_42 = arith.constant 0 : index
    %c0_43 = arith.constant 0 : index
    %37 = vector.load %arg4[%c0_42, %c0_43] : memref<64x128xf32, #tpu.memory_space<vmem>>, vector<64x128xf32>
    tpu.vector_store %arg4[%c0_42, %c0_43], %36 {strides = array<i32>} : memref<64x128xf32, #tpu.memory_space<vmem>>, vector<64x128xf32>,
    %c0_44 = arith.constant 0 : index
    %c27 = arith.constant 27 : index
    %c0_45 = arith.constant 0 : index
    %c0_46 = arith.constant 0 : index
    %38 = vector.load %arg1[%c0_44, %c27, %c0_45, %c0_46] : memref<1x36x9x128xbf16, #tpu.memory_space<vmem>>, vector<1x8x8x128xbf16>
    %39 = vector.shape_cast %38 : vector<1x8x8x128xbf16> to vector<8x8x128xbf16>
    %40 = vector.shape_cast %39 : vector<8x8x128xbf16> to vector<64x128xbf16>
    %c0_47 = arith.constant 0 : index
    %c0_48 = arith.constant 0 : index
    %41 = vector.load %arg4[%c0_47, %c0_48] : memref<64x128xf32, #tpu.memory_space<vmem>>, vector<64x128xf32>
    %c4 = arith.constant 4 : index
    %c0_49 = arith.constant 0 : index
    %c0_50 = arith.constant 0 : index
    %42 = vector.load %arg2[%c4, %c0_49, %c0_50] : memref<9x128x128xbf16, #tpu.memory_space<vmem>>, vector<1x128x128xbf16>
    %43 = vector.shape_cast %42 : vector<1x128x128xbf16> to vector<128x128xbf16>
    %cst_51 = arith.constant dense<0.000000e+00> : vector<64x128xf32>
    %44 = tpu.matmul %40, %43, %cst_51 {dimension_numbers = #tpu.dot_dimension_numbers<[1], [0], [0], [1], [0, 0, 1, 1], [], []>} : vector<64x128xbf16>, vector<128x128xbf16>, vector<64x128xf32> -> vector<64x128xf32>
    %45 = arith.addf %41, %44 : vector<64x128xf32>
    %c0_52 = arith.constant 0 : index
    %c0_53 = arith.constant 0 : index
    %46 = vector.load %arg4[%c0_52, %c0_53] : memref<64x128xf32, #tpu.memory_space<vmem>>, vector<64x128xf32>
    tpu.vector_store %arg4[%c0_52, %c0_53], %45 {strides = array<i32>} : memref<64x128xf32, #tpu.memory_space<vmem>>, vector<64x128xf32>,
    %c0_54 = arith.constant 0 : index
    %c18_55 = arith.constant 18 : index
    %c1_56 = arith.constant 1 : index
    %c0_57 = arith.constant 0 : index
    %47 = vector.load %arg1[%c0_54, %c18_55, %c1_56, %c0_57] : memref<1x36x9x128xbf16, #tpu.memory_space<vmem>>, vector<1x8x8x128xbf16>
    %48 = vector.shape_cast %47 : vector<1x8x8x128xbf16> to vector<8x8x128xbf16>
    %49 = vector.shape_cast %48 : vector<8x8x128xbf16> to vector<64x128xbf16>
    %c0_58 = arith.constant 0 : index
    %c0_59 = arith.constant 0 : index
    %50 = vector.load %arg4[%c0_58, %c0_59] : memref<64x128xf32, #tpu.memory_space<vmem>>, vector<64x128xf32>
    %c5 = arith.constant 5 : index
    %c0_60 = arith.constant 0 : index
    %c0_61 = arith.constant 0 : index
    %51 = vector.load %arg2[%c5, %c0_60, %c0_61] : memref<9x128x128xbf16, #tpu.memory_space<vmem>>, vector<1x128x128xbf16>
    %52 = vector.shape_cast %51 : vector<1x128x128xbf16> to vector<128x128xbf16>
    %cst_62 = arith.constant dense<0.000000e+00> : vector<64x128xf32>
    %53 = tpu.matmul %49, %52, %cst_62 {dimension_numbers = #tpu.dot_dimension_numbers<[1], [0], [0], [1], [0, 0, 1, 1], [], []>} : vector<64x128xbf16>, vector<128x128xbf16>, vector<64x128xf32> -> vector<64x128xf32>
    %54 = arith.addf %50, %53 : vector<64x128xf32>
    %c0_63 = arith.constant 0 : index
    %c0_64 = arith.constant 0 : index
    %55 = vector.load %arg4[%c0_63, %c0_64] : memref<64x128xf32, #tpu.memory_space<vmem>>, vector<64x128xf32>
    tpu.vector_store %arg4[%c0_63, %c0_64], %54 {strides = array<i32>} : memref<64x128xf32, #tpu.memory_space<vmem>>, vector<64x128xf32>,
    %c0_65 = arith.constant 0 : index
    %c1_66 = arith.constant 1 : index
    %c0_67 = arith.constant 0 : index
    %c0_68 = arith.constant 0 : index
    %56 = vector.load %arg1[%c0_65, %c1_66, %c0_67, %c0_68] : memref<1x36x9x128xbf16, #tpu.memory_space<vmem>>, vector<1x8x8x128xbf16>
    %57 = vector.shape_cast %56 : vector<1x8x8x128xbf16> to vector<8x8x128xbf16>
    %58 = vector.shape_cast %57 : vector<8x8x128xbf16> to vector<64x128xbf16>
    %c0_69 = arith.constant 0 : index
    %c0_70 = arith.constant 0 : index
    %59 = vector.load %arg4[%c0_69, %c0_70] : memref<64x128xf32, #tpu.memory_space<vmem>>, vector<64x128xf32>
    %c6 = arith.constant 6 : index
    %c0_71 = arith.constant 0 : index
    %c0_72 = arith.constant 0 : index
    %60 = vector.load %arg2[%c6, %c0_71, %c0_72] : memref<9x128x128xbf16, #tpu.memory_space<vmem>>, vector<1x128x128xbf16>
    %61 = vector.shape_cast %60 : vector<1x128x128xbf16> to vector<128x128xbf16>
    %cst_73 = arith.constant dense<0.000000e+00> : vector<64x128xf32>
    %62 = tpu.matmul %58, %61, %cst_73 {dimension_numbers = #tpu.dot_dimension_numbers<[1], [0], [0], [1], [0, 0, 1, 1], [], []>} : vector<64x128xbf16>, vector<128x128xbf16>, vector<64x128xf32> -> vector<64x128xf32>
    %63 = arith.addf %59, %62 : vector<64x128xf32>
    %c0_74 = arith.constant 0 : index
    %c0_75 = arith.constant 0 : index
    %64 = vector.load %arg4[%c0_74, %c0_75] : memref<64x128xf32, #tpu.memory_space<vmem>>, vector<64x128xf32>
    tpu.vector_store %arg4[%c0_74, %c0_75], %63 {strides = array<i32>} : memref<64x128xf32, #tpu.memory_space<vmem>>, vector<64x128xf32>,
    %c0_76 = arith.constant 0 : index
    %c10 = arith.constant 10 : index
    %c0_77 = arith.constant 0 : index
    %c0_78 = arith.constant 0 : index
    %65 = vector.load %arg1[%c0_76, %c10, %c0_77, %c0_78] : memref<1x36x9x128xbf16, #tpu.memory_space<vmem>>, vector<1x8x8x128xbf16>
    %66 = vector.shape_cast %65 : vector<1x8x8x128xbf16> to vector<8x8x128xbf16>
    %67 = vector.shape_cast %66 : vector<8x8x128xbf16> to vector<64x128xbf16>
    %c0_79 = arith.constant 0 : index
    %c0_80 = arith.constant 0 : index
    %68 = vector.load %arg4[%c0_79, %c0_80] : memref<64x128xf32, #tpu.memory_space<vmem>>, vector<64x128xf32>
    %c7 = arith.constant 7 : index
    %c0_81 = arith.constant 0 : index
    %c0_82 = arith.constant 0 : index
    %69 = vector.load %arg2[%c7, %c0_81, %c0_82] : memref<9x128x128xbf16, #tpu.memory_space<vmem>>, vector<1x128x128xbf16>
    %70 = vector.shape_cast %69 : vector<1x128x128xbf16> to vector<128x128xbf16>
    %cst_83 = arith.constant dense<0.000000e+00> : vector<64x128xf32>
    %71 = tpu.matmul %67, %70, %cst_83 {dimension_numbers = #tpu.dot_dimension_numbers<[1], [0], [0], [1], [0, 0, 1, 1], [], []>} : vector<64x128xbf16>, vector<128x128xbf16>, vector<64x128xf32> -> vector<64x128xf32>
    %72 = arith.addf %68, %71 : vector<64x128xf32>
    %c0_84 = arith.constant 0 : index
    %c0_85 = arith.constant 0 : index
    %73 = vector.load %arg4[%c0_84, %c0_85] : memref<64x128xf32, #tpu.memory_space<vmem>>, vector<64x128xf32>
    tpu.vector_store %arg4[%c0_84, %c0_85], %72 {strides = array<i32>} : memref<64x128xf32, #tpu.memory_space<vmem>>, vector<64x128xf32>,
    %c0_86 = arith.constant 0 : index
    %c1_87 = arith.constant 1 : index
    %c1_88 = arith.constant 1 : index
    %c0_89 = arith.constant 0 : index
    %74 = vector.load %arg1[%c0_86, %c1_87, %c1_88, %c0_89] : memref<1x36x9x128xbf16, #tpu.memory_space<vmem>>, vector<1x8x8x128xbf16>
    %75 = vector.shape_cast %74 : vector<1x8x8x128xbf16> to vector<8x8x128xbf16>
    %76 = vector.shape_cast %75 : vector<8x8x128xbf16> to vector<64x128xbf16>
    %c0_90 = arith.constant 0 : index
    %c0_91 = arith.constant 0 : index
    %77 = vector.load %arg4[%c0_90, %c0_91] : memref<64x128xf32, #tpu.memory_space<vmem>>, vector<64x128xf32>
    %c8 = arith.constant 8 : index
    %c0_92 = arith.constant 0 : index
    %c0_93 = arith.constant 0 : index
    %78 = vector.load %arg2[%c8, %c0_92, %c0_93] : memref<9x128x128xbf16, #tpu.memory_space<vmem>>, vector<1x128x128xbf16>
    %79 = vector.shape_cast %78 : vector<1x128x128xbf16> to vector<128x128xbf16>
    %cst_94 = arith.constant dense<0.000000e+00> : vector<64x128xf32>
    %80 = tpu.matmul %76, %79, %cst_94 {dimension_numbers = #tpu.dot_dimension_numbers<[1], [0], [0], [1], [0, 0, 1, 1], [], []>} : vector<64x128xbf16>, vector<128x128xbf16>, vector<64x128xf32> -> vector<64x128xf32>
    %81 = arith.addf %77, %80 : vector<64x128xf32>
    %c0_95 = arith.constant 0 : index
    %c0_96 = arith.constant 0 : index
    %82 = vector.load %arg4[%c0_95, %c0_96] : memref<64x128xf32, #tpu.memory_space<vmem>>, vector<64x128xf32>
    tpu.vector_store %arg4[%c0_95, %c0_96], %81 {strides = array<i32>} : memref<64x128xf32, #tpu.memory_space<vmem>>, vector<64x128xf32>,
    %c0_97 = arith.constant 0 : index
    %c0_98 = arith.constant 0 : index
    %83 = vector.load %arg4[%c0_97, %c0_98] : memref<64x128xf32, #tpu.memory_space<vmem>>, vector<64x128xf32>
    %c0_99 = arith.constant 0 : index
    %c0_100 = arith.constant 0 : index
    %c0_101 = arith.constant 0 : index
    %84 = vector.load %arg3[%c0_99, %c0_100, %c0_101] : memref<1x64x128xf32, #tpu.memory_space<vmem>>, vector<1x64x128xf32>
    %85 = vector.shape_cast %84 : vector<1x64x128xf32> to vector<64x128xf32>
    %86 = vector.shape_cast %83 : vector<64x128xf32> to vector<1x64x128xf32>
    tpu.vector_store %arg3[%c0_99, %c0_100, %c0_101], %86 {strides = array<i32>} : memref<1x64x128xf32, #tpu.memory_space<vmem>>, vector<1x64x128xf32>,
    return
  }
  func.func @transform_0(%arg0: i32) -> (i32, i32, i32, i32) {
    %c0_i32 = arith.constant 0 : i32
    %c0_i32_0 = arith.constant 0 : i32
    %c0_i32_1 = arith.constant 0 : i32
    %c0_i32_2 = arith.constant 0 : i32
    return %arg0, %c0_i32, %c0_i32_0, %c0_i32_1 : i32, i32, i32, i32
  }
  func.func @transform_1(%arg0: i32) -> (i32, i32, i32) {
    %c0_i32 = arith.constant 0 : i32
    %c0_i32_0 = arith.constant 0 : i32
    %c0_i32_1 = arith.constant 0 : i32
    %c0_i32_2 = arith.constant 0 : i32
    return %c0_i32, %c0_i32_0, %c0_i32_1 : i32, i32, i32
  }
  func.func @transform_2(%arg0: i32) -> (i32, i32, i32) {
    %c0_i32 = arith.constant 0 : i32
    %c0_i32_0 = arith.constant 0 : i32
    %c0_i32_1 = arith.constant 0 : i32
    return %arg0, %c0_i32, %c0_i32_0 : i32, i32, i32
  }
}

module attributes {stable_mosaic.version = 11 : i64} {
  func.func @_stats_kernel(%arg0: i32, %arg1: memref<128x128xf32, #tpu.memory_space<vmem>>, %arg2: memref<2x128xf32, #tpu.memory_space<vmem>>) attributes {dimension_semantics = [#tpu.dimension_semantics<arbitrary>], iteration_bounds = array<i64: 1>, scalar_prefetch = 0 : i64, scratch_operands = 0 : i64, tpu.core_type = #tpu.core_type<tc>, window_params = [{transform_indices = @transform_0, window_bounds = array<i64: 128, 128>}, {pipeline_mode = #tpu.pipeline_mode<synchronous>, transform_indices = @transform_1, window_bounds = array<i64: 2, 128>}]} {
    %c0_i32 = arith.constant 0 : i32
    %0 = arith.cmpi eq, %arg0, %c0_i32 : i32
    %1 = arith.extui %0 : i1 to i32
    %c0_i32_0 = arith.constant 0 : i32
    %2 = arith.cmpi ne, %1, %c0_i32_0 : i32
    scf.if %2 {
      %cst_7 = arith.constant 0.000000e+00 : f32
      %13 = vector.broadcast %cst_7 : f32 to vector<2x128xf32>
      %c0_8 = arith.constant 0 : index
      %c0_9 = arith.constant 0 : index
      %14 = vector.load %arg2[%c0_8, %c0_9] : memref<2x128xf32, #tpu.memory_space<vmem>>, vector<2x128xf32>
      tpu.vector_store %arg2[%c0_8, %c0_9], %13 {strides = array<i32>} : memref<2x128xf32, #tpu.memory_space<vmem>>, vector<2x128xf32>,
    } else {
    }
    %c0 = arith.constant 0 : index
    %c0_1 = arith.constant 0 : index
    %3 = vector.load %arg1[%c0, %c0_1] : memref<128x128xf32, #tpu.memory_space<vmem>>, vector<128x128xf32>
    %cst = arith.constant dense<0.000000e+00> : vector<128xf32>
    %4 = vector.multi_reduction <add>, %3, %cst [0] : vector<128x128xf32> to vector<128xf32>
    %5 = vector.shape_cast %4 : vector<128xf32> to vector<1x128xf32>
    %6 = arith.mulf %3, %3 : vector<128x128xf32>
    %cst_2 = arith.constant dense<0.000000e+00> : vector<128xf32>
    %7 = vector.multi_reduction <add>, %6, %cst_2 [0] : vector<128x128xf32> to vector<128xf32>
    %8 = vector.shape_cast %7 : vector<128xf32> to vector<1x128xf32>
    %c0_3 = arith.constant 0 : index
    %c0_4 = arith.constant 0 : index
    %9 = vector.load %arg2[%c0_3, %c0_4] : memref<2x128xf32, #tpu.memory_space<vmem>>, vector<2x128xf32>
    %10 = tpu.concatenate %5, %8 in 0 : vector<1x128xf32>, vector<1x128xf32> -> vector<2x128xf32>
    %11 = arith.addf %9, %10 : vector<2x128xf32>
    %c0_5 = arith.constant 0 : index
    %c0_6 = arith.constant 0 : index
    %12 = vector.load %arg2[%c0_5, %c0_6] : memref<2x128xf32, #tpu.memory_space<vmem>>, vector<2x128xf32>
    tpu.vector_store %arg2[%c0_5, %c0_6], %11 {strides = array<i32>} : memref<2x128xf32, #tpu.memory_space<vmem>>, vector<2x128xf32>,
    return
  }
  func.func @transform_0(%arg0: i32) -> (i32, i32) {
    %c0_i32 = arith.constant 0 : i32
    %c0_i32_0 = arith.constant 0 : i32
    return %arg0, %c0_i32 : i32, i32
  }
  func.func @transform_1(%arg0: i32) -> (i32, i32) {
    %c0_i32 = arith.constant 0 : i32
    %c0_i32_0 = arith.constant 0 : i32
    %c0_i32_1 = arith.constant 0 : i32
    return %c0_i32, %c0_i32_0 : i32, i32
  }
}

module attributes {stable_mosaic.version = 11 : i64} {
  func.func @kernel(%arg0: i32, %arg1: memref<1x8x8x128xbf16, #tpu.memory_space<vmem>>, %arg2: memref<1x128x128xbf16, #tpu.memory_space<vmem>>, %arg3: memref<1x64x128xf32, #tpu.memory_space<vmem>>, %arg4: memref<64x128xf32, #tpu.memory_space<vmem>>) attributes {dimension_semantics = [#tpu.dimension_semantics<parallel>], iteration_bounds = array<i64: 2>, scalar_prefetch = 0 : i64, scratch_operands = 1 : i64, tpu.core_type = #tpu.core_type<tc>, window_params = [{transform_indices = @transform_0, window_bounds = array<i64: 1, 8, 8, 128>}, {pipeline_mode = #tpu.pipeline_mode<synchronous>, transform_indices = @transform_1, window_bounds = array<i64: 1, 128, 128>}, {transform_indices = @transform_2, window_bounds = array<i64: 1, 64, 128>}]} {
    %cst = arith.constant 0.000000e+00 : f32
    %0 = vector.broadcast %cst : f32 to vector<64x128xf32>
    %c0 = arith.constant 0 : index
    %c0_0 = arith.constant 0 : index
    %1 = vector.load %arg4[%c0, %c0_0] : memref<64x128xf32, #tpu.memory_space<vmem>>, vector<64x128xf32>
    tpu.vector_store %arg4[%c0, %c0_0], %0 {strides = array<i32>} : memref<64x128xf32, #tpu.memory_space<vmem>>, vector<64x128xf32>,
    %c0_1 = arith.constant 0 : index
    %c0_2 = arith.constant 0 : index
    %c0_3 = arith.constant 0 : index
    %c0_4 = arith.constant 0 : index
    %2 = vector.load %arg1[%c0_1, %c0_2, %c0_3, %c0_4] : memref<1x8x8x128xbf16, #tpu.memory_space<vmem>>, vector<1x8x8x128xbf16>
    %3 = vector.shape_cast %2 : vector<1x8x8x128xbf16> to vector<8x8x128xbf16>
    %4 = vector.shape_cast %3 : vector<8x8x128xbf16> to vector<64x128xbf16>
    %c0_5 = arith.constant 0 : index
    %c0_6 = arith.constant 0 : index
    %5 = vector.load %arg4[%c0_5, %c0_6] : memref<64x128xf32, #tpu.memory_space<vmem>>, vector<64x128xf32>
    %c0_7 = arith.constant 0 : index
    %c0_8 = arith.constant 0 : index
    %c0_9 = arith.constant 0 : index
    %6 = vector.load %arg2[%c0_7, %c0_8, %c0_9] : memref<1x128x128xbf16, #tpu.memory_space<vmem>>, vector<1x128x128xbf16>
    %7 = vector.shape_cast %6 : vector<1x128x128xbf16> to vector<128x128xbf16>
    %cst_10 = arith.constant dense<0.000000e+00> : vector<64x128xf32>
    %8 = tpu.matmul %4, %7, %cst_10 {dimension_numbers = #tpu.dot_dimension_numbers<[1], [0], [0], [1], [0, 0, 1, 1], [], []>} : vector<64x128xbf16>, vector<128x128xbf16>, vector<64x128xf32> -> vector<64x128xf32>
    %9 = arith.addf %5, %8 : vector<64x128xf32>
    %c0_11 = arith.constant 0 : index
    %c0_12 = arith.constant 0 : index
    %10 = vector.load %arg4[%c0_11, %c0_12] : memref<64x128xf32, #tpu.memory_space<vmem>>, vector<64x128xf32>
    tpu.vector_store %arg4[%c0_11, %c0_12], %9 {strides = array<i32>} : memref<64x128xf32, #tpu.memory_space<vmem>>, vector<64x128xf32>,
    %c0_13 = arith.constant 0 : index
    %c0_14 = arith.constant 0 : index
    %11 = vector.load %arg4[%c0_13, %c0_14] : memref<64x128xf32, #tpu.memory_space<vmem>>, vector<64x128xf32>
    %c0_15 = arith.constant 0 : index
    %c0_16 = arith.constant 0 : index
    %c0_17 = arith.constant 0 : index
    %12 = vector.load %arg3[%c0_15, %c0_16, %c0_17] : memref<1x64x128xf32, #tpu.memory_space<vmem>>, vector<1x64x128xf32>
    %13 = vector.shape_cast %12 : vector<1x64x128xf32> to vector<64x128xf32>
    %14 = vector.shape_cast %11 : vector<64x128xf32> to vector<1x64x128xf32>
    tpu.vector_store %arg3[%c0_15, %c0_16, %c0_17], %14 {strides = array<i32>} : memref<1x64x128xf32, #tpu.memory_space<vmem>>, vector<1x64x128xf32>,
    return
  }
  func.func @transform_0(%arg0: i32) -> (i32, i32, i32, i32) {
    %c0_i32 = arith.constant 0 : i32
    %c0_i32_0 = arith.constant 0 : i32
    %c0_i32_1 = arith.constant 0 : i32
    %c0_i32_2 = arith.constant 0 : i32
    return %arg0, %c0_i32, %c0_i32_0, %c0_i32_1 : i32, i32, i32, i32
  }
  func.func @transform_1(%arg0: i32) -> (i32, i32, i32) {
    %c0_i32 = arith.constant 0 : i32
    %c0_i32_0 = arith.constant 0 : i32
    %c0_i32_1 = arith.constant 0 : i32
    %c0_i32_2 = arith.constant 0 : i32
    return %c0_i32, %c0_i32_0, %c0_i32_1 : i32, i32, i32
  }
  func.func @transform_2(%arg0: i32) -> (i32, i32, i32) {
    %c0_i32 = arith.constant 0 : i32
    %c0_i32_0 = arith.constant 0 : i32
    %c0_i32_1 = arith.constant 0 : i32
    return %arg0, %c0_i32, %c0_i32_0 : i32, i32, i32
  }
}

module attributes {stable_mosaic.version = 11 : i64} {
  func.func @kernel(%arg0: i32, %arg1: memref<1x10x10x128xbf16, #tpu.memory_space<vmem>>, %arg2: memref<9x128x128xbf16, #tpu.memory_space<vmem>>, %arg3: memref<1x64x128xf32, #tpu.memory_space<vmem>>, %arg4: memref<1x64x128xf32, #tpu.memory_space<vmem>>, %arg5: memref<64x128xf32, #tpu.memory_space<vmem>>) attributes {dimension_semantics = [#tpu.dimension_semantics<parallel>], iteration_bounds = array<i64: 2>, scalar_prefetch = 0 : i64, scratch_operands = 1 : i64, tpu.core_type = #tpu.core_type<tc>, window_params = [{transform_indices = @transform_0, window_bounds = array<i64: 1, 10, 10, 128>}, {pipeline_mode = #tpu.pipeline_mode<synchronous>, transform_indices = @transform_1, window_bounds = array<i64: 9, 128, 128>}, {transform_indices = @transform_2, window_bounds = array<i64: 1, 64, 128>}, {transform_indices = @transform_3, window_bounds = array<i64: 1, 64, 128>}]} {
    %c0 = arith.constant 0 : index
    %c0_0 = arith.constant 0 : index
    %c0_1 = arith.constant 0 : index
    %0 = vector.load %arg3[%c0, %c0_0, %c0_1] : memref<1x64x128xf32, #tpu.memory_space<vmem>>, vector<1x64x128xf32>
    %1 = vector.shape_cast %0 : vector<1x64x128xf32> to vector<64x128xf32>
    %c0_2 = arith.constant 0 : index
    %c0_3 = arith.constant 0 : index
    %2 = vector.load %arg5[%c0_2, %c0_3] : memref<64x128xf32, #tpu.memory_space<vmem>>, vector<64x128xf32>
    tpu.vector_store %arg5[%c0_2, %c0_3], %1 {strides = array<i32>} : memref<64x128xf32, #tpu.memory_space<vmem>>, vector<64x128xf32>,
    %c0_4 = arith.constant 0 : index
    %c0_5 = arith.constant 0 : index
    %c0_6 = arith.constant 0 : index
    %c0_7 = arith.constant 0 : index
    %3 = vector.load %arg1[%c0_4, %c0_5, %c0_6, %c0_7] : memref<1x10x10x128xbf16, #tpu.memory_space<vmem>>, vector<1x8x8x128xbf16>
    %4 = vector.shape_cast %3 : vector<1x8x8x128xbf16> to vector<8x8x128xbf16>
    %5 = vector.shape_cast %4 : vector<8x8x128xbf16> to vector<64x128xbf16>
    %c0_8 = arith.constant 0 : index
    %c0_9 = arith.constant 0 : index
    %6 = vector.load %arg5[%c0_8, %c0_9] : memref<64x128xf32, #tpu.memory_space<vmem>>, vector<64x128xf32>
    %c0_10 = arith.constant 0 : index
    %c0_11 = arith.constant 0 : index
    %c0_12 = arith.constant 0 : index
    %7 = vector.load %arg2[%c0_10, %c0_11, %c0_12] : memref<9x128x128xbf16, #tpu.memory_space<vmem>>, vector<1x128x128xbf16>
    %8 = vector.shape_cast %7 : vector<1x128x128xbf16> to vector<128x128xbf16>
    %cst = arith.constant dense<0.000000e+00> : vector<64x128xf32>
    %9 = tpu.matmul %5, %8, %cst {dimension_numbers = #tpu.dot_dimension_numbers<[1], [0], [0], [1], [0, 0, 1, 1], [], []>} : vector<64x128xbf16>, vector<128x128xbf16>, vector<64x128xf32> -> vector<64x128xf32>
    %10 = arith.addf %6, %9 : vector<64x128xf32>
    %c0_13 = arith.constant 0 : index
    %c0_14 = arith.constant 0 : index
    %11 = vector.load %arg5[%c0_13, %c0_14] : memref<64x128xf32, #tpu.memory_space<vmem>>, vector<64x128xf32>
    tpu.vector_store %arg5[%c0_13, %c0_14], %10 {strides = array<i32>} : memref<64x128xf32, #tpu.memory_space<vmem>>, vector<64x128xf32>,
    %c0_15 = arith.constant 0 : index
    %c0_16 = arith.constant 0 : index
    %c1 = arith.constant 1 : index
    %c0_17 = arith.constant 0 : index
    %12 = vector.load %arg1[%c0_15, %c0_16, %c1, %c0_17] : memref<1x10x10x128xbf16, #tpu.memory_space<vmem>>, vector<1x8x8x128xbf16>
    %13 = vector.shape_cast %12 : vector<1x8x8x128xbf16> to vector<8x8x128xbf16>
    %14 = vector.shape_cast %13 : vector<8x8x128xbf16> to vector<64x128xbf16>
    %c0_18 = arith.constant 0 : index
    %c0_19 = arith.constant 0 : index
    %15 = vector.load %arg5[%c0_18, %c0_19] : memref<64x128xf32, #tpu.memory_space<vmem>>, vector<64x128xf32>
    %c1_20 = arith.constant 1 : index
    %c0_21 = arith.constant 0 : index
    %c0_22 = arith.constant 0 : index
    %16 = vector.load %arg2[%c1_20, %c0_21, %c0_22] : memref<9x128x128xbf16, #tpu.memory_space<vmem>>, vector<1x128x128xbf16>
    %17 = vector.shape_cast %16 : vector<1x128x128xbf16> to vector<128x128xbf16>
    %cst_23 = arith.constant dense<0.000000e+00> : vector<64x128xf32>
    %18 = tpu.matmul %14, %17, %cst_23 {dimension_numbers = #tpu.dot_dimension_numbers<[1], [0], [0], [1], [0, 0, 1, 1], [], []>} : vector<64x128xbf16>, vector<128x128xbf16>, vector<64x128xf32> -> vector<64x128xf32>
    %19 = arith.addf %15, %18 : vector<64x128xf32>
    %c0_24 = arith.constant 0 : index
    %c0_25 = arith.constant 0 : index
    %20 = vector.load %arg5[%c0_24, %c0_25] : memref<64x128xf32, #tpu.memory_space<vmem>>, vector<64x128xf32>
    tpu.vector_store %arg5[%c0_24, %c0_25], %19 {strides = array<i32>} : memref<64x128xf32, #tpu.memory_space<vmem>>, vector<64x128xf32>,
    %c0_26 = arith.constant 0 : index
    %c0_27 = arith.constant 0 : index
    %c2 = arith.constant 2 : index
    %c0_28 = arith.constant 0 : index
    %21 = vector.load %arg1[%c0_26, %c0_27, %c2, %c0_28] : memref<1x10x10x128xbf16, #tpu.memory_space<vmem>>, vector<1x8x8x128xbf16>
    %22 = vector.shape_cast %21 : vector<1x8x8x128xbf16> to vector<8x8x128xbf16>
    %23 = vector.shape_cast %22 : vector<8x8x128xbf16> to vector<64x128xbf16>
    %c0_29 = arith.constant 0 : index
    %c0_30 = arith.constant 0 : index
    %24 = vector.load %arg5[%c0_29, %c0_30] : memref<64x128xf32, #tpu.memory_space<vmem>>, vector<64x128xf32>
    %c2_31 = arith.constant 2 : index
    %c0_32 = arith.constant 0 : index
    %c0_33 = arith.constant 0 : index
    %25 = vector.load %arg2[%c2_31, %c0_32, %c0_33] : memref<9x128x128xbf16, #tpu.memory_space<vmem>>, vector<1x128x128xbf16>
    %26 = vector.shape_cast %25 : vector<1x128x128xbf16> to vector<128x128xbf16>
    %cst_34 = arith.constant dense<0.000000e+00> : vector<64x128xf32>
    %27 = tpu.matmul %23, %26, %cst_34 {dimension_numbers = #tpu.dot_dimension_numbers<[1], [0], [0], [1], [0, 0, 1, 1], [], []>} : vector<64x128xbf16>, vector<128x128xbf16>, vector<64x128xf32> -> vector<64x128xf32>
    %28 = arith.addf %24, %27 : vector<64x128xf32>
    %c0_35 = arith.constant 0 : index
    %c0_36 = arith.constant 0 : index
    %29 = vector.load %arg5[%c0_35, %c0_36] : memref<64x128xf32, #tpu.memory_space<vmem>>, vector<64x128xf32>
    tpu.vector_store %arg5[%c0_35, %c0_36], %28 {strides = array<i32>} : memref<64x128xf32, #tpu.memory_space<vmem>>, vector<64x128xf32>,
    %c0_37 = arith.constant 0 : index
    %c1_38 = arith.constant 1 : index
    %c0_39 = arith.constant 0 : index
    %c0_40 = arith.constant 0 : index
    %30 = vector.load %arg1[%c0_37, %c1_38, %c0_39, %c0_40] : memref<1x10x10x128xbf16, #tpu.memory_space<vmem>>, vector<1x8x8x128xbf16>
    %31 = vector.shape_cast %30 : vector<1x8x8x128xbf16> to vector<8x8x128xbf16>
    %32 = vector.shape_cast %31 : vector<8x8x128xbf16> to vector<64x128xbf16>
    %c0_41 = arith.constant 0 : index
    %c0_42 = arith.constant 0 : index
    %33 = vector.load %arg5[%c0_41, %c0_42] : memref<64x128xf32, #tpu.memory_space<vmem>>, vector<64x128xf32>
    %c3 = arith.constant 3 : index
    %c0_43 = arith.constant 0 : index
    %c0_44 = arith.constant 0 : index
    %34 = vector.load %arg2[%c3, %c0_43, %c0_44] : memref<9x128x128xbf16, #tpu.memory_space<vmem>>, vector<1x128x128xbf16>
    %35 = vector.shape_cast %34 : vector<1x128x128xbf16> to vector<128x128xbf16>
    %cst_45 = arith.constant dense<0.000000e+00> : vector<64x128xf32>
    %36 = tpu.matmul %32, %35, %cst_45 {dimension_numbers = #tpu.dot_dimension_numbers<[1], [0], [0], [1], [0, 0, 1, 1], [], []>} : vector<64x128xbf16>, vector<128x128xbf16>, vector<64x128xf32> -> vector<64x128xf32>
    %37 = arith.addf %33, %36 : vector<64x128xf32>
    %c0_46 = arith.constant 0 : index
    %c0_47 = arith.constant 0 : index
    %38 = vector.load %arg5[%c0_46, %c0_47] : memref<64x128xf32, #tpu.memory_space<vmem>>, vector<64x128xf32>
    tpu.vector_store %arg5[%c0_46, %c0_47], %37 {strides = array<i32>} : memref<64x128xf32, #tpu.memory_space<vmem>>, vector<64x128xf32>,
    %c0_48 = arith.constant 0 : index
    %c1_49 = arith.constant 1 : index
    %c1_50 = arith.constant 1 : index
    %c0_51 = arith.constant 0 : index
    %39 = vector.load %arg1[%c0_48, %c1_49, %c1_50, %c0_51] : memref<1x10x10x128xbf16, #tpu.memory_space<vmem>>, vector<1x8x8x128xbf16>
    %40 = vector.shape_cast %39 : vector<1x8x8x128xbf16> to vector<8x8x128xbf16>
    %41 = vector.shape_cast %40 : vector<8x8x128xbf16> to vector<64x128xbf16>
    %c0_52 = arith.constant 0 : index
    %c0_53 = arith.constant 0 : index
    %42 = vector.load %arg5[%c0_52, %c0_53] : memref<64x128xf32, #tpu.memory_space<vmem>>, vector<64x128xf32>
    %c4 = arith.constant 4 : index
    %c0_54 = arith.constant 0 : index
    %c0_55 = arith.constant 0 : index
    %43 = vector.load %arg2[%c4, %c0_54, %c0_55] : memref<9x128x128xbf16, #tpu.memory_space<vmem>>, vector<1x128x128xbf16>
    %44 = vector.shape_cast %43 : vector<1x128x128xbf16> to vector<128x128xbf16>
    %cst_56 = arith.constant dense<0.000000e+00> : vector<64x128xf32>
    %45 = tpu.matmul %41, %44, %cst_56 {dimension_numbers = #tpu.dot_dimension_numbers<[1], [0], [0], [1], [0, 0, 1, 1], [], []>} : vector<64x128xbf16>, vector<128x128xbf16>, vector<64x128xf32> -> vector<64x128xf32>
    %46 = arith.addf %42, %45 : vector<64x128xf32>
    %c0_57 = arith.constant 0 : index
    %c0_58 = arith.constant 0 : index
    %47 = vector.load %arg5[%c0_57, %c0_58] : memref<64x128xf32, #tpu.memory_space<vmem>>, vector<64x128xf32>
    tpu.vector_store %arg5[%c0_57, %c0_58], %46 {strides = array<i32>} : memref<64x128xf32, #tpu.memory_space<vmem>>, vector<64x128xf32>,
    %c0_59 = arith.constant 0 : index
    %c1_60 = arith.constant 1 : index
    %c2_61 = arith.constant 2 : index
    %c0_62 = arith.constant 0 : index
    %48 = vector.load %arg1[%c0_59, %c1_60, %c2_61, %c0_62] : memref<1x10x10x128xbf16, #tpu.memory_space<vmem>>, vector<1x8x8x128xbf16>
    %49 = vector.shape_cast %48 : vector<1x8x8x128xbf16> to vector<8x8x128xbf16>
    %50 = vector.shape_cast %49 : vector<8x8x128xbf16> to vector<64x128xbf16>
    %c0_63 = arith.constant 0 : index
    %c0_64 = arith.constant 0 : index
    %51 = vector.load %arg5[%c0_63, %c0_64] : memref<64x128xf32, #tpu.memory_space<vmem>>, vector<64x128xf32>
    %c5 = arith.constant 5 : index
    %c0_65 = arith.constant 0 : index
    %c0_66 = arith.constant 0 : index
    %52 = vector.load %arg2[%c5, %c0_65, %c0_66] : memref<9x128x128xbf16, #tpu.memory_space<vmem>>, vector<1x128x128xbf16>
    %53 = vector.shape_cast %52 : vector<1x128x128xbf16> to vector<128x128xbf16>
    %cst_67 = arith.constant dense<0.000000e+00> : vector<64x128xf32>
    %54 = tpu.matmul %50, %53, %cst_67 {dimension_numbers = #tpu.dot_dimension_numbers<[1], [0], [0], [1], [0, 0, 1, 1], [], []>} : vector<64x128xbf16>, vector<128x128xbf16>, vector<64x128xf32> -> vector<64x128xf32>
    %55 = arith.addf %51, %54 : vector<64x128xf32>
    %c0_68 = arith.constant 0 : index
    %c0_69 = arith.constant 0 : index
    %56 = vector.load %arg5[%c0_68, %c0_69] : memref<64x128xf32, #tpu.memory_space<vmem>>, vector<64x128xf32>
    tpu.vector_store %arg5[%c0_68, %c0_69], %55 {strides = array<i32>} : memref<64x128xf32, #tpu.memory_space<vmem>>, vector<64x128xf32>,
    %c0_70 = arith.constant 0 : index
    %c2_71 = arith.constant 2 : index
    %c0_72 = arith.constant 0 : index
    %c0_73 = arith.constant 0 : index
    %57 = vector.load %arg1[%c0_70, %c2_71, %c0_72, %c0_73] : memref<1x10x10x128xbf16, #tpu.memory_space<vmem>>, vector<1x8x8x128xbf16>
    %58 = vector.shape_cast %57 : vector<1x8x8x128xbf16> to vector<8x8x128xbf16>
    %59 = vector.shape_cast %58 : vector<8x8x128xbf16> to vector<64x128xbf16>
    %c0_74 = arith.constant 0 : index
    %c0_75 = arith.constant 0 : index
    %60 = vector.load %arg5[%c0_74, %c0_75] : memref<64x128xf32, #tpu.memory_space<vmem>>, vector<64x128xf32>
    %c6 = arith.constant 6 : index
    %c0_76 = arith.constant 0 : index
    %c0_77 = arith.constant 0 : index
    %61 = vector.load %arg2[%c6, %c0_76, %c0_77] : memref<9x128x128xbf16, #tpu.memory_space<vmem>>, vector<1x128x128xbf16>
    %62 = vector.shape_cast %61 : vector<1x128x128xbf16> to vector<128x128xbf16>
    %cst_78 = arith.constant dense<0.000000e+00> : vector<64x128xf32>
    %63 = tpu.matmul %59, %62, %cst_78 {dimension_numbers = #tpu.dot_dimension_numbers<[1], [0], [0], [1], [0, 0, 1, 1], [], []>} : vector<64x128xbf16>, vector<128x128xbf16>, vector<64x128xf32> -> vector<64x128xf32>
    %64 = arith.addf %60, %63 : vector<64x128xf32>
    %c0_79 = arith.constant 0 : index
    %c0_80 = arith.constant 0 : index
    %65 = vector.load %arg5[%c0_79, %c0_80] : memref<64x128xf32, #tpu.memory_space<vmem>>, vector<64x128xf32>
    tpu.vector_store %arg5[%c0_79, %c0_80], %64 {strides = array<i32>} : memref<64x128xf32, #tpu.memory_space<vmem>>, vector<64x128xf32>,
    %c0_81 = arith.constant 0 : index
    %c2_82 = arith.constant 2 : index
    %c1_83 = arith.constant 1 : index
    %c0_84 = arith.constant 0 : index
    %66 = vector.load %arg1[%c0_81, %c2_82, %c1_83, %c0_84] : memref<1x10x10x128xbf16, #tpu.memory_space<vmem>>, vector<1x8x8x128xbf16>
    %67 = vector.shape_cast %66 : vector<1x8x8x128xbf16> to vector<8x8x128xbf16>
    %68 = vector.shape_cast %67 : vector<8x8x128xbf16> to vector<64x128xbf16>
    %c0_85 = arith.constant 0 : index
    %c0_86 = arith.constant 0 : index
    %69 = vector.load %arg5[%c0_85, %c0_86] : memref<64x128xf32, #tpu.memory_space<vmem>>, vector<64x128xf32>
    %c7 = arith.constant 7 : index
    %c0_87 = arith.constant 0 : index
    %c0_88 = arith.constant 0 : index
    %70 = vector.load %arg2[%c7, %c0_87, %c0_88] : memref<9x128x128xbf16, #tpu.memory_space<vmem>>, vector<1x128x128xbf16>
    %71 = vector.shape_cast %70 : vector<1x128x128xbf16> to vector<128x128xbf16>
    %cst_89 = arith.constant dense<0.000000e+00> : vector<64x128xf32>
    %72 = tpu.matmul %68, %71, %cst_89 {dimension_numbers = #tpu.dot_dimension_numbers<[1], [0], [0], [1], [0, 0, 1, 1], [], []>} : vector<64x128xbf16>, vector<128x128xbf16>, vector<64x128xf32> -> vector<64x128xf32>
    %73 = arith.addf %69, %72 : vector<64x128xf32>
    %c0_90 = arith.constant 0 : index
    %c0_91 = arith.constant 0 : index
    %74 = vector.load %arg5[%c0_90, %c0_91] : memref<64x128xf32, #tpu.memory_space<vmem>>, vector<64x128xf32>
    tpu.vector_store %arg5[%c0_90, %c0_91], %73 {strides = array<i32>} : memref<64x128xf32, #tpu.memory_space<vmem>>, vector<64x128xf32>,
    %c0_92 = arith.constant 0 : index
    %c2_93 = arith.constant 2 : index
    %c2_94 = arith.constant 2 : index
    %c0_95 = arith.constant 0 : index
    %75 = vector.load %arg1[%c0_92, %c2_93, %c2_94, %c0_95] : memref<1x10x10x128xbf16, #tpu.memory_space<vmem>>, vector<1x8x8x128xbf16>
    %76 = vector.shape_cast %75 : vector<1x8x8x128xbf16> to vector<8x8x128xbf16>
    %77 = vector.shape_cast %76 : vector<8x8x128xbf16> to vector<64x128xbf16>
    %c0_96 = arith.constant 0 : index
    %c0_97 = arith.constant 0 : index
    %78 = vector.load %arg5[%c0_96, %c0_97] : memref<64x128xf32, #tpu.memory_space<vmem>>, vector<64x128xf32>
    %c8 = arith.constant 8 : index
    %c0_98 = arith.constant 0 : index
    %c0_99 = arith.constant 0 : index
    %79 = vector.load %arg2[%c8, %c0_98, %c0_99] : memref<9x128x128xbf16, #tpu.memory_space<vmem>>, vector<1x128x128xbf16>
    %80 = vector.shape_cast %79 : vector<1x128x128xbf16> to vector<128x128xbf16>
    %cst_100 = arith.constant dense<0.000000e+00> : vector<64x128xf32>
    %81 = tpu.matmul %77, %80, %cst_100 {dimension_numbers = #tpu.dot_dimension_numbers<[1], [0], [0], [1], [0, 0, 1, 1], [], []>} : vector<64x128xbf16>, vector<128x128xbf16>, vector<64x128xf32> -> vector<64x128xf32>
    %82 = arith.addf %78, %81 : vector<64x128xf32>
    %c0_101 = arith.constant 0 : index
    %c0_102 = arith.constant 0 : index
    %83 = vector.load %arg5[%c0_101, %c0_102] : memref<64x128xf32, #tpu.memory_space<vmem>>, vector<64x128xf32>
    tpu.vector_store %arg5[%c0_101, %c0_102], %82 {strides = array<i32>} : memref<64x128xf32, #tpu.memory_space<vmem>>, vector<64x128xf32>,
    %c0_103 = arith.constant 0 : index
    %c0_104 = arith.constant 0 : index
    %84 = vector.load %arg5[%c0_103, %c0_104] : memref<64x128xf32, #tpu.memory_space<vmem>>, vector<64x128xf32>
    %c0_105 = arith.constant 0 : index
    %c0_106 = arith.constant 0 : index
    %c0_107 = arith.constant 0 : index
    %85 = vector.load %arg4[%c0_105, %c0_106, %c0_107] : memref<1x64x128xf32, #tpu.memory_space<vmem>>, vector<1x64x128xf32>
    %86 = vector.shape_cast %85 : vector<1x64x128xf32> to vector<64x128xf32>
    %87 = vector.shape_cast %84 : vector<64x128xf32> to vector<1x64x128xf32>
    tpu.vector_store %arg4[%c0_105, %c0_106, %c0_107], %87 {strides = array<i32>} : memref<1x64x128xf32, #tpu.memory_space<vmem>>, vector<1x64x128xf32>,
    return
  }
  func.func @transform_0(%arg0: i32) -> (i32, i32, i32, i32) {
    %c0_i32 = arith.constant 0 : i32
    %c0_i32_0 = arith.constant 0 : i32
    %c0_i32_1 = arith.constant 0 : i32
    %c0_i32_2 = arith.constant 0 : i32
    return %arg0, %c0_i32, %c0_i32_0, %c0_i32_1 : i32, i32, i32, i32
  }
  func.func @transform_1(%arg0: i32) -> (i32, i32, i32) {
    %c0_i32 = arith.constant 0 : i32
    %c0_i32_0 = arith.constant 0 : i32
    %c0_i32_1 = arith.constant 0 : i32
    %c0_i32_2 = arith.constant 0 : i32
    return %c0_i32, %c0_i32_0, %c0_i32_1 : i32, i32, i32
  }
  func.func @transform_2(%arg0: i32) -> (i32, i32, i32) {
    %c0_i32 = arith.constant 0 : i32
    %c0_i32_0 = arith.constant 0 : i32
    %c0_i32_1 = arith.constant 0 : i32
    return %arg0, %c0_i32, %c0_i32_0 : i32, i32, i32
  }
  func.func @transform_3(%arg0: i32) -> (i32, i32, i32) {
    %c0_i32 = arith.constant 0 : i32
    %c0_i32_0 = arith.constant 0 : i32
    %c0_i32_1 = arith.constant 0 : i32
    return %arg0, %c0_i32, %c0_i32_0 : i32, i32, i32
  }
}

</mosaic_0001>

<bundles_post_ra>
// kernel: w_basic_block_forward.5
= control target key start
LH: loop header
LB: loop body
LE: loop exit
PB: predicated region body
PF: predicated region fallthrough
CT: control target
= control target key end

     0   :  { %v289_v0 = vmov 0.0   ;;  %vm280_vm0 = vcmask 1040384   ;;  %s501_s0 = inlined_call_operand.vmem [shape: f32[512,128], index: 0, kind: input, shape index: {}]   ;;  %s502_s1 = inlined_call_operand.vmem [shape: f32[2,128], index: 1, kind: output, shape index: {}]  }
   0x1   :  { %12 = vst [vmem:[%s502_s1] sm:$0x3] %v289_v0  ;;  %v13_v1 = vld [vmem:[%s501_s0] sm:$0xff]  ;;  %v14_v2 = vld [vmem:[%s501_s0 + $0x8] sm:$0xff]  ;;  %v15_v3 = vld [vmem:[%s501_s0 + $0x10] sm:$0xff] }
   0x2   :  { %v16_v4 = vld [vmem:[%s501_s0 + $0x18] sm:$0xff]  ;;  %v77_v5 = vadd.f32 %v14_v2, %v13_v1  ;;  %v146_v6 = vmul.f32 %v13_v1, %v13_v1  ;;  %v147_v7 = vmul.f32 %v14_v2, %v14_v2  ;;  %v148_v8 = vmul.f32 %v15_v3, %v15_v3  ;;  %v17_v9 = vld [vmem:[%s501_s0 + $0x20] sm:$0xff]  ;;  %v18_v13 = vld [vmem:[%s501_s0 + $0x28] sm:$0xff] }
   0x3   :  { %v149_v11 = vmul.f32 %v16_v4, %v16_v4  ;;  %v150_v15 = vmul.f32 %v17_v9, %v17_v9  ;;  %v19_v17 = vld [vmem:[%s501_s0 + $0x30] sm:$0xff]  ;;  %v151_v19 = vmul.f32 %v18_v13, %v18_v13  ;;  %v20_v21 = vld [vmem:[%s501_s0 + $0x38] sm:$0xff]  ;;  %v21_v25 = vld [vmem:[%s501_s0 + $0x40] sm:$0xff] }
   0x4   :  { %v78_v10 = vadd.f32 %v77_v5, %v15_v3  ;;  %v210_v12 = vadd.f32 %v147_v7, %v146_v6  ;;  %v152_v23 = vmul.f32 %v19_v17, %v19_v17  ;;  %v153_v27 = vmul.f32 %v20_v21, %v20_v21  ;;  %v22_v29 = vld [vmem:[%s501_s0 + $0x48] sm:$0xff]  ;;  %v23_v33 = vld [vmem:[%s501_s0 + $0x50] sm:$0xff]  ;;  %v24_v37 = vld [vmem:[%s501_s0 + $0x58] sm:$0xff] }
   0x5   :  { %v154_v31 = vmul.f32 %v21_v25, %v21_v25  ;;  %v155_v35 = vmul.f32 %v22_v29, %v22_v29  ;;  %v156_v39 = vmul.f32 %v23_v33, %v23_v33  ;;  %v25_v41 = vld [vmem:[%s501_s0 + $0x60] sm:$0xff]  ;;  %v157_v43 = vmul.f32 %v24_v37, %v24_v37  ;;  %v26_v45 = vld [vmem:[%s501_s0 + $0x68] sm:$0xff]  ;;  %v27_v49 = vld [vmem:[%s501_s0 + $0x70] sm:$0xff] }
   0x6   :  { %v79_v14 = vadd.f32 %v78_v10, %v16_v4  ;;  %v211_v16 = vadd.f32 %v210_v12, %v148_v8  ;;  %v158_v47 = vmul.f32 %v25_v41, %v25_v41  ;;  %v159_v51 = vmul.f32 %v26_v45, %v26_v45  ;;  %v28_v53 = vld [vmem:[%s501_s0 + $0x78] sm:$0xff]  ;;  %v29_v57 = vld [vmem:[%s501_s0 + $0x80] sm:$0xff]  ;;  %v30_v61 = vld [vmem:[%s501_s0 + $0x88] sm:$0xff] }
   0x7   :  { %v160_v55 = vmul.f32 %v27_v49, %v27_v49  ;;  %v161_v59 = vmul.f32 %v28_v53, %v28_v53  ;;  %v162_v63 = vmul.f32 %v29_v57, %v29_v57  ;;  %v31_v1 = vld [vmem:[%s501_s0 + $0x90] sm:$0xff]  ;;  %v163_v3 = vmul.f32 %v30_v61, %v30_v61  ;;  %v32_v5 = vld [vmem:[%s501_s0 + $0x98] sm:$0xff] }
   0x8   :  { %v80_v18 = vadd.f32 %v79_v14, %v17_v9  ;;  %v212_v20 = vadd.f32 %v211_v16, %v149_v11  ;;  %v164_v7 = vmul.f32 %v31_v1, %v31_v1  ;;  %v33_v9 = vld [vmem:[%s501_s0 + $0xa0] sm:$0xff]  ;;  %v165_v11 = vmul.f32 %v32_v5, %v32_v5 }
   0xa   :  { %v81_v22 = vadd.f32 %v80_v18, %v18_v13  ;;  %v213_v24 = vadd.f32 %v212_v20, %v150_v15  ;;  %v34_v13 = vld [vmem:[%s501_s0 + $0xa8] sm:$0xff]  ;;  %v166_v15 = vmul.f32 %v33_v9, %v33_v9 }
   0xc   :  { %v82_v26 = vadd.f32 %v81_v22, %v19_v17  ;;  %v214_v28 = vadd.f32 %v213_v24, %v151_v19  ;;  %v35_v17 = vld [vmem:[%s501_s0 + $0xb0] sm:$0xff]  ;;  %v167_v19 = vmul.f32 %v34_v13, %v34_v13 }
   0xe   :  { %v83_v30 = vadd.f32 %v82_v26, %v20_v21  ;;  %v215_v32 = vadd.f32 %v214_v28, %v152_v23  ;;  %v36_v21 = vld [vmem:[%s501_s0 + $0xb8] sm:$0xff]  ;;  %v168_v23 = vmul.f32 %v35_v17, %v35_v17 }
  0x10   :  { %v84_v34 = vadd.f32 %v83_v30, %v21_v25  ;;  %v216_v36 = vadd.f32 %v215_v32, %v153_v27  ;;  %v37_v25 = vld [vmem:[%s501_s0 + $0xc0] sm:$0xff]  ;;  %v169_v27 = vmul.f32 %v36_v21, %v36_v21 }
  0x12   :  { %v85_v38 = vadd.f32 %v84_v34, %v22_v29  ;;  %v217_v40 = vadd.f32 %v216_v36, %v154_v31  ;;  %v38_v29 = vld [vmem:[%s501_s0 + $0xc8] sm:$0xff]  ;;  %v170_v31 = vmul.f32 %v37_v25, %v37_v25 }
  0x14   :  { %v86_v42 = vadd.f32 %v85_v38, %v23_v33  ;;  %v218_v44 = vadd.f32 %v217_v40, %v155_v35  ;;  %v39_v33 = vld [vmem:[%s501_s0 + $0xd0] sm:$0xff]  ;;  %v171_v35 = vmul.f32 %v38_v29, %v38_v29 }
  0x16   :  { %v87_v46 = vadd.f32 %v86_v42, %v24_v37  ;;  %v219_v48 = vadd.f32 %v218_v44, %v156_v39  ;;  %v40_v37 = vld [vmem:[%s501_s0 + $0xd8] sm:$0xff]  ;;  %v172_v39 = vmul.f32 %v39_v33, %v39_v33 }
  0x18   :  { %v88_v50 = vadd.f32 %v87_v46, %v25_v41  ;;  %v220_v52 = vadd.f32 %v219_v48, %v157_v43  ;;  %v41_v41 = vld [vmem:[%s501_s0 + $0xe0] sm:$0xff]  ;;  %v173_v43 = vmul.f32 %v40_v37, %v40_v37 }
  0x1a   :  { %v89_v54 = vadd.f32 %v88_v50, %v26_v45  ;;  %v221_v56 = vadd.f32 %v220_v52, %v158_v47  ;;  %v42_v45 = vld [vmem:[%s501_s0 + $0xe8] sm:$0xff]  ;;  %v174_v47 = vmul.f32 %v41_v41, %v41_v41 }
  0x1c   :  { %v90_v58 = vadd.f32 %v89_v54, %v27_v49  ;;  %v222_v60 = vadd.f32 %v221_v56, %v159_v51  ;;  %v43_v49 = vld [vmem:[%s501_s0 + $0xf0] sm:$0xff]  ;;  %v175_v51 = vmul.f32 %v42_v45, %v42_v45 }
  0x1e   :  { %v91_v62 = vadd.f32 %v90_v58, %v28_v53  ;;  %v223_v0 = vadd.f32 %v222_v60, %v160_v55  ;;  %v44_v53 = vld [vmem:[%s501_s0 + $0xf8] sm:$0xff]  ;;  %v176_v55 = vmul.f32 %v43_v49, %v43_v49 }
  0x20   :  { %v92_v2 = vadd.f32 %v91_v62, %v29_v57  ;;  %v224_v4 = vadd.f32 %v223_v0, %v161_v59  ;;  %v45_v57 = vld [vmem:[%s501_s0 + $0x100] sm:$0xff]  ;;  %v177_v59 = vmul.f32 %v44_v53, %v44_v53 }
  0x22   :  { %v93_v6 = vadd.f32 %v92_v2, %v30_v61  ;;  %v225_v8 = vadd.f32 %v224_v4, %v162_v63  ;;  %v46_v61 = vld [vmem:[%s501_s0 + $0x108] sm:$0xff]  ;;  %v178_v63 = vmul.f32 %v45_v57, %v45_v57 }
  0x24   :  { %v94_v10 = vadd.f32 %v93_v6, %v31_v1  ;;  %v226_v12 = vadd.f32 %v225_v8, %v163_v3  ;;  %v47_v1 = vld [vmem:[%s501_s0 + $0x110] sm:$0xff]  ;;  %v179_v3 = vmul.f32 %v46_v61, %v46_v61 }
  0x26   :  { %v95_v14 = vadd.f32 %v94_v10, %v32_v5  ;;  %v227_v16 = vadd.f32 %v226_v12, %v164_v7  ;;  %v48_v5 = vld [vmem:[%s501_s0 + $0x118] sm:$0xff]  ;;  %v180_v7 = vmul.f32 %v47_v1, %v47_v1 }
  0x28   :  { %v96_v18 = vadd.f32 %v95_v14, %v33_v9  ;;  %v228_v20 = vadd.f32 %v227_v16, %v165_v11  ;;  %v49_v9 = vld [vmem:[%s501_s0 + $0x120] sm:$0xff]  ;;  %v181_v11 = vmul.f32 %v48_v5, %v48_v5 }
  0x2a   :  { %v97_v22 = vadd.f32 %v96_v18, %v34_v13  ;;  %v229_v24 = vadd.f32 %v228_v20, %v166_v15  ;;  %v50_v13 = vld [vmem:[%s501_s0 + $0x128] sm:$0xff]  ;;  %v182_v15 = vmul.f32 %v49_v9, %v49_v9 }
  0x2c   :  { %v98_v26 = vadd.f32 %v97_v22, %v35_v17  ;;  %v230_v28 = vadd.f32 %v229_v24, %v167_v19  ;;  %v51_v17 = vld [vmem:[%s501_s0 + $0x130] sm:$0xff]  ;;  %v183_v19 = vmul.f32 %v50_v13, %v50_v13 }
  0x2e   :  { %v99_v30 = vadd.f32 %v98_v26, %v36_v21  ;;  %v231_v32 = vadd.f32 %v230_v28, %v168_v23  ;;  %v52_v21 = vld [vmem:[%s501_s0 + $0x138] sm:$0xff]  ;;  %v184_v23 = vmul.f32 %v51_v17, %v51_v17 }
  0x30   :  { %v100_v34 = vadd.f32 %v99_v30, %v37_v25  ;;  %v232_v36 = vadd.f32 %v231_v32, %v169_v27  ;;  %v53_v25 = vld [vmem:[%s501_s0 + $0x140] sm:$0xff]  ;;  %v185_v27 = vmul.f32 %v52_v21, %v52_v21 }
  0x32   :  { %v101_v38 = vadd.f32 %v100_v34, %v38_v29  ;;  %v233_v40 = vadd.f32 %v232_v36, %v170_v31  ;;  %v54_v29 = vld [vmem:[%s501_s0 + $0x148] sm:$0xff]  ;;  %v186_v31 = vmul.f32 %v53_v25, %v53_v25 }
  0x34   :  { %v102_v42 = vadd.f32 %v101_v38, %v39_v33  ;;  %v234_v44 = vadd.f32 %v233_v40, %v171_v35  ;;  %v55_v33 = vld [vmem:[%s501_s0 + $0x150] sm:$0xff]  ;;  %v187_v35 = vmul.f32 %v54_v29, %v54_v29 }
  0x36   :  { %v103_v46 = vadd.f32 %v102_v42, %v40_v37  ;;  %v235_v48 = vadd.f32 %v234_v44, %v172_v39  ;;  %v56_v37 = vld [vmem:[%s501_s0 + $0x158] sm:$0xff]  ;;  %v188_v39 = vmul.f32 %v55_v33, %v55_v33 }
  0x38   :  { %v104_v50 = vadd.f32 %v103_v46, %v41_v41  ;;  %v236_v52 = vadd.f32 %v235_v48, %v173_v43  ;;  %v57_v41 = vld [vmem:[%s501_s0 + $0x160] sm:$0xff]  ;;  %v189_v43 = vmul.f32 %v56_v37, %v56_v37 }
  0x3a   :  { %v105_v54 = vadd.f32 %v104_v50, %v42_v45  ;;  %v237_v56 = vadd.f32 %v236_v52, %v174_v47  ;;  %v58_v45 = vld [vmem:[%s501_s0 + $0x168] sm:$0xff]  ;;  %v190_v47 = vmul.f32 %v57_v41, %v57_v41 }
  0x3c   :  { %v106_v58 = vadd.f32 %v105_v54, %v43_v49  ;;  %v238_v60 = vadd.f32 %v237_v56, %v175_v51  ;;  %v59_v49 = vld [vmem:[%s501_s0 + $0x170] sm:$0xff]  ;;  %v191_v51 = vmul.f32 %v58_v45, %v58_v45 }
  0x3e   :  { %v107_v62 = vadd.f32 %v106_v58, %v44_v53  ;;  %v239_v0 = vadd.f32 %v238_v60, %v176_v55  ;;  %v60_v53 = vld [vmem:[%s501_s0 + $0x178] sm:$0xff]  ;;  %v192_v55 = vmul.f32 %v59_v49, %v59_v49 }
  0x40   :  { %v108_v2 = vadd.f32 %v107_v62, %v45_v57  ;;  %v240_v4 = vadd.f32 %v239_v0, %v177_v59  ;;  %v61_v57 = vld [vmem:[%s501_s0 + $0x180] sm:$0xff]  ;;  %v193_v59 = vmul.f32 %v60_v53, %v60_v53 }
  0x42   :  { %v109_v6 = vadd.f32 %v108_v2, %v46_v61  ;;  %v241_v8 = vadd.f32 %v240_v4, %v178_v63  ;;  %v62_v61 = vld [vmem:[%s501_s0 + $0x188] sm:$0xff]  ;;  %v194_v63 = vmul.f32 %v61_v57, %v61_v57 }
  0x44   :  { %v110_v10 = vadd.f32 %v109_v6, %v47_v1  ;;  %v242_v12 = vadd.f32 %v241_v8, %v179_v3  ;;  %v63_v1 = vld [vmem:[%s501_s0 + $0x190] sm:$0xff]  ;;  %v195_v3 = vmul.f32 %v62_v61, %v62_v61 }
  0x46   :  { %v111_v14 = vadd.f32 %v110_v10, %v48_v5  ;;  %v243_v16 = vadd.f32 %v242_v12, %v180_v7  ;;  %v64_v5 = vld [vmem:[%s501_s0 + $0x198] sm:$0xff]  ;;  %v196_v7 = vmul.f32 %v63_v1, %v63_v1 }
  0x48   :  { %v112_v18 = vadd.f32 %v111_v14, %v49_v9  ;;  %v244_v20 = vadd.f32 %v243_v16, %v181_v11  ;;  %v65_v9 = vld [vmem:[%s501_s0 + $0x1a0] sm:$0xff]  ;;  %v197_v11 = vmul.f32 %v64_v5, %v64_v5 }
  0x4a   :  { %v113_v22 = vadd.f32 %v112_v18, %v50_v13  ;;  %v245_v24 = vadd.f32 %v244_v20, %v182_v15  ;;  %v66_v13 = vld [vmem:[%s501_s0 + $0x1a8] sm:$0xff]  ;;  %v198_v15 = vmul.f32 %v65_v9, %v65_v9 }
  0x4c   :  { %v114_v26 = vadd.f32 %v113_v22, %v51_v17  ;;  %v246_v28 = vadd.f32 %v245_v24, %v183_v19  ;;  %v67_v17 = vld [vmem:[%s501_s0 + $0x1b0] sm:$0xff]  ;;  %v199_v19 = vmul.f32 %v66_v13, %v66_v13 }
  0x4e   :  { %v115_v30 = vadd.f32 %v114_v26, %v52_v21  ;;  %v247_v32 = vadd.f32 %v246_v28, %v184_v23  ;;  %v68_v21 = vld [vmem:[%s501_s0 + $0x1b8] sm:$0xff]  ;;  %v200_v23 = vmul.f32 %v67_v17, %v67_v17 }
  0x50   :  { %v116_v34 = vadd.f32 %v115_v30, %v53_v25  ;;  %v248_v36 = vadd.f32 %v247_v32, %v185_v27  ;;  %v69_v25 = vld [vmem:[%s501_s0 + $0x1c0] sm:$0xff]  ;;  %v201_v27 = vmul.f32 %v68_v21, %v68_v21 }
  0x52   :  { %v117_v38 = vadd.f32 %v116_v34, %v54_v29  ;;  %v249_v40 = vadd.f32 %v248_v36, %v186_v31  ;;  %v70_v29 = vld [vmem:[%s501_s0 + $0x1c8] sm:$0xff]  ;;  %v202_v31 = vmul.f32 %v69_v25, %v69_v25 }
  0x54   :  { %v118_v42 = vadd.f32 %v117_v38, %v55_v33  ;;  %v250_v44 = vadd.f32 %v249_v40, %v187_v35  ;;  %v71_v33 = vld [vmem:[%s501_s0 + $0x1d0] sm:$0xff]  ;;  %v203_v35 = vmul.f32 %v70_v29, %v70_v29 }
  0x56   :  { %v119_v46 = vadd.f32 %v118_v42, %v56_v37  ;;  %v251_v48 = vadd.f32 %v250_v44, %v188_v39  ;;  %v72_v37 = vld [vmem:[%s501_s0 + $0x1d8] sm:$0xff]  ;;  %v204_v39 = vmul.f32 %v71_v33, %v71_v33 }
  0x58   :  { %v120_v50 = vadd.f32 %v119_v46, %v57_v41  ;;  %v252_v52 = vadd.f32 %v251_v48, %v189_v43  ;;  %v73_v41 = vld [vmem:[%s501_s0 + $0x1e0] sm:$0xff]  ;;  %v205_v43 = vmul.f32 %v72_v37, %v72_v37 }
  0x5a   :  { %v121_v54 = vadd.f32 %v120_v50, %v58_v45  ;;  %v253_v56 = vadd.f32 %v252_v52, %v190_v47  ;;  %v74_v45 = vld [vmem:[%s501_s0 + $0x1e8] sm:$0xff]  ;;  %v206_v47 = vmul.f32 %v73_v41, %v73_v41 }
  0x5c   :  { %v122_v58 = vadd.f32 %v121_v54, %v59_v49  ;;  %v254_v60 = vadd.f32 %v253_v56, %v191_v51  ;;  %v75_v49 = vld [vmem:[%s501_s0 + $0x1f0] sm:$0xff]  ;;  %v207_v51 = vmul.f32 %v74_v45, %v74_v45 }
  0x5e   :  { %v123_v62 = vadd.f32 %v122_v58, %v60_v53  ;;  %v255_v0 = vadd.f32 %v254_v60, %v192_v55  ;;  %v76_v53 = vld [vmem:[%s501_s0 + $0x1f8] sm:$0xff]  ;;  %v208_v55 = vmul.f32 %v75_v49, %v75_v49 }
  0x5f   :  { %v209_v58 = vmul.f32 %v76_v53, %v76_v53 }
  0x60   :  { %v124_v2 = vadd.f32 %v123_v62, %v61_v57  ;;  %v256_v4 = vadd.f32 %v255_v0, %v193_v59 }
  0x62   :  { %v125_v6 = vadd.f32 %v124_v2, %v62_v61  ;;  %v257_v8 = vadd.f32 %v256_v4, %v194_v63 }
  0x64   :  { %v126_v10 = vadd.f32 %v125_v6, %v63_v1  ;;  %v258_v12 = vadd.f32 %v257_v8, %v195_v3 }
  0x66   :  { %v127_v14 = vadd.f32 %v126_v10, %v64_v5  ;;  %v259_v16 = vadd.f32 %v258_v12, %v196_v7 }
  0x68   :  { %v128_v18 = vadd.f32 %v127_v14, %v65_v9  ;;  %v260_v20 = vadd.f32 %v259_v16, %v197_v11  ;;  %v279_v11 = vld [vmem:[%s502_s1] sm:$0x3] }
  0x6a   :  { %v129_v22 = vadd.f32 %v128_v18, %v66_v13  ;;  %v261_v24 = vadd.f32 %v260_v20, %v198_v15 }
  0x6c   :  { %v130_v26 = vadd.f32 %v129_v22, %v67_v17  ;;  %v262_v28 = vadd.f32 %v261_v24, %v199_v19 }
  0x6e   :  { %v131_v30 = vadd.f32 %v130_v26, %v68_v21  ;;  %v263_v32 = vadd.f32 %v262_v28, %v200_v23 }
  0x70   :  { %v132_v34 = vadd.f32 %v131_v30, %v69_v25  ;;  %v264_v36 = vadd.f32 %v263_v32, %v201_v27 }
  0x72   :  { %v133_v38 = vadd.f32 %v132_v34, %v70_v29  ;;  %v265_v40 = vadd.f32 %v264_v36, %v202_v31 }
  0x74   :  { %v134_v42 = vadd.f32 %v133_v38, %v71_v33  ;;  %v266_v44 = vadd.f32 %v265_v40, %v203_v35 }
  0x76   :  { %v135_v46 = vadd.f32 %v134_v42, %v72_v37  ;;  %v267_v48 = vadd.f32 %v266_v44, %v204_v39 }
  0x78   :  { %v136_v50 = vadd.f32 %v135_v46, %v73_v41  ;;  %v268_v52 = vadd.f32 %v267_v48, %v205_v43 }
  0x7a   :  { %v137_v54 = vadd.f32 %v136_v50, %v74_v45  ;;  %v269_v56 = vadd.f32 %v268_v52, %v206_v47 }
  0x7c   :  { %v138_v57 = vadd.f32 %v137_v54, %v75_v49  ;;  %v270_v59 = vadd.f32 %v269_v56, %v207_v51 }
  0x7e   :  { %v139_v60 = vadd.f32 %v138_v57, %v76_v53  ;;  %v271_v61 = vadd.f32 %v270_v59, %v208_v55 }
  0x80   :  { %v140_v62 = vrot.slane %v139_v60, 4  ;;  %v272_v63 = vadd.f32 %v271_v61, %v209_v58 }
  0x82   :  { %v141_v0 = vadd.f32 %v140_v62, %v139_v60  ;;  %v273_v1 = vrot.slane %v272_v63, 4 }
  0x84   :  { %v142_v2 = vrot.slane %v141_v0, 2  ;;  %v274_v3 = vadd.f32 %v273_v1, %v272_v63 }
  0x86   :  { %v143_v4 = vadd.f32 %v142_v2, %v141_v0  ;;  %v275_v5 = vrot.slane %v274_v3, 2 }
  0x88   :  { %v144_v6 = vrot.slane %v143_v4, 1  ;;  %v276_v7 = vadd.f32 %v275_v5, %v274_v3 }
  0x8a   :  { %v145_v8 = vadd.f32 %v144_v6, %v143_v4  ;;  %v277_v9 = vrot.slane %v276_v7, 1 }
  0x8c   :  { %v278_v10 = vadd.f32 %v277_v9, %v276_v7 }
  0x8e   :  { %v281_v12 = vsel %vm280_vm0, %v145_v8, %v278_v10 }
  0x8f   :  { %v282_v13 = vadd.f32 %v281_v12, %v279_v11 }
  0x91   :  { %283 = vst [vmem:[%s502_s1] sm:$0x3] %v282_v13 }

// kernel: w_basic_block_forward.7
= control target key start
LH: loop header
LB: loop body
LE: loop exit
PB: predicated region body
PF: predicated region fallthrough
CT: control target
= control target key end

     0   :  { %v97_v0 = vmov 0.0   ;;  %vm88_vm0 = vcmask 1040384   ;;  %s165_s1 = inlined_call_operand.vmem [shape: f32[2,128], index: 1, kind: output, shape index: {}]   ;;  %s166_s0 = inlined_call_operand.vmem [shape: f32[128,128], index: 0, kind: input, shape index: {}]  }
   0x1   :  { %12 = vst [vmem:[%s165_s1] sm:$0x3] %v97_v0  ;;  %v13_v1 = vld [vmem:[%s166_s0] sm:$0xff]  ;;  %v14_v2 = vld [vmem:[%s166_s0 + $0x8] sm:$0xff]  ;;  %v15_v3 = vld [vmem:[%s166_s0 + $0x10] sm:$0xff] }
   0x2   :  { %v16_v4 = vld [vmem:[%s166_s0 + $0x18] sm:$0xff]  ;;  %v29_v5 = vadd.f32 %v14_v2, %v13_v1  ;;  %v50_v6 = vmul.f32 %v13_v1, %v13_v1  ;;  %v51_v7 = vmul.f32 %v14_v2, %v14_v2  ;;  %v52_v8 = vmul.f32 %v15_v3, %v15_v3  ;;  %v17_v9 = vld [vmem:[%s166_s0 + $0x20] sm:$0xff]  ;;  %v18_v13 = vld [vmem:[%s166_s0 + $0x28] sm:$0xff] }
   0x3   :  { %v53_v11 = vmul.f32 %v16_v4, %v16_v4  ;;  %v54_v15 = vmul.f32 %v17_v9, %v17_v9  ;;  %v19_v17 = vld [vmem:[%s166_s0 + $0x30] sm:$0xff]  ;;  %v55_v19 = vmul.f32 %v18_v13, %v18_v13  ;;  %v20_v21 = vld [vmem:[%s166_s0 + $0x38] sm:$0xff]  ;;  %v21_v25 = vld [vmem:[%s166_s0 + $0x40] sm:$0xff] }
   0x4   :  { %v30_v10 = vadd.f32 %v29_v5, %v15_v3  ;;  %v66_v12 = vadd.f32 %v51_v7, %v50_v6  ;;  %v56_v23 = vmul.f32 %v19_v17, %v19_v17  ;;  %v57_v27 = vmul.f32 %v20_v21, %v20_v21  ;;  %v22_v29 = vld [vmem:[%s166_s0 + $0x48] sm:$0xff]  ;;  %v23_v33 = vld [vmem:[%s166_s0 + $0x50] sm:$0xff]  ;;  %v24_v37 = vld [vmem:[%s166_s0 + $0x58] sm:$0xff] }
   0x5   :  { %v58_v31 = vmul.f32 %v21_v25, %v21_v25  ;;  %v59_v35 = vmul.f32 %v22_v29, %v22_v29  ;;  %v60_v39 = vmul.f32 %v23_v33, %v23_v33  ;;  %v25_v41 = vld [vmem:[%s166_s0 + $0x60] sm:$0xff]  ;;  %v61_v43 = vmul.f32 %v24_v37, %v24_v37  ;;  %v26_v45 = vld [vmem:[%s166_s0 + $0x68] sm:$0xff]  ;;  %v27_v49 = vld [vmem:[%s166_s0 + $0x70] sm:$0xff] }
   0x6   :  { %v31_v14 = vadd.f32 %v30_v10, %v16_v4  ;;  %v67_v16 = vadd.f32 %v66_v12, %v52_v8  ;;  %v62_v47 = vmul.f32 %v25_v41, %v25_v41  ;;  %v63_v51 = vmul.f32 %v26_v45, %v26_v45  ;;  %v28_v53 = vld [vmem:[%s166_s0 + $0x78] sm:$0xff] }
   0x7   :  { %v64_v55 = vmul.f32 %v27_v49, %v27_v49  ;;  %v65_v58 = vmul.f32 %v28_v53, %v28_v53 }
   0x8   :  { %v32_v18 = vadd.f32 %v31_v14, %v17_v9  ;;  %v68_v20 = vadd.f32 %v67_v16, %v53_v11  ;;  %v87_v11 = vld [vmem:[%s165_s1] sm:$0x3] }
   0xa   :  { %v33_v22 = vadd.f32 %v32_v18, %v18_v13  ;;  %v69_v24 = vadd.f32 %v68_v20, %v54_v15 }
   0xc   :  { %v34_v26 = vadd.f32 %v33_v22, %v19_v17  ;;  %v70_v28 = vadd.f32 %v69_v24, %v55_v19 }
   0xe   :  { %v35_v30 = vadd.f32 %v34_v26, %v20_v21  ;;  %v71_v32 = vadd.f32 %v70_v28, %v56_v23 }
  0x10   :  { %v36_v34 = vadd.f32 %v35_v30, %v21_v25  ;;  %v72_v36 = vadd.f32 %v71_v32, %v57_v27 }
  0x12   :  { %v37_v38 = vadd.f32 %v36_v34, %v22_v29  ;;  %v73_v40 = vadd.f32 %v72_v36, %v58_v31 }
  0x14   :  { %v38_v42 = vadd.f32 %v37_v38, %v23_v33  ;;  %v74_v44 = vadd.f32 %v73_v40, %v59_v35 }
  0x16   :  { %v39_v46 = vadd.f32 %v38_v42, %v24_v37  ;;  %v75_v48 = vadd.f32 %v74_v44, %v60_v39 }
  0x18   :  { %v40_v50 = vadd.f32 %v39_v46, %v25_v41  ;;  %v76_v52 = vadd.f32 %v75_v48, %v61_v43 }
  0x1a   :  { %v41_v54 = vadd.f32 %v40_v50, %v26_v45  ;;  %v77_v56 = vadd.f32 %v76_v52, %v62_v47 }
  0x1c   :  { %v42_v57 = vadd.f32 %v41_v54, %v27_v49  ;;  %v78_v59 = vadd.f32 %v77_v56, %v63_v51 }
  0x1e   :  { %v43_v60 = vadd.f32 %v42_v57, %v28_v53  ;;  %v79_v61 = vadd.f32 %v78_v59, %v64_v55 }
  0x20   :  { %v44_v62 = vrot.slane %v43_v60, 4  ;;  %v80_v63 = vadd.f32 %v79_v61, %v65_v58 }
  0x22   :  { %v45_v0 = vadd.f32 %v44_v62, %v43_v60  ;;  %v81_v1 = vrot.slane %v80_v63, 4 }
  0x24   :  { %v46_v2 = vrot.slane %v45_v0, 2  ;;  %v82_v3 = vadd.f32 %v81_v1, %v80_v63 }
  0x26   :  { %v47_v4 = vadd.f32 %v46_v2, %v45_v0  ;;  %v83_v5 = vrot.slane %v82_v3, 2 }
  0x28   :  { %v48_v6 = vrot.slane %v47_v4, 1  ;;  %v84_v7 = vadd.f32 %v83_v5, %v82_v3 }
  0x2a   :  { %v49_v8 = vadd.f32 %v48_v6, %v47_v4  ;;  %v85_v9 = vrot.slane %v84_v7, 1 }
  0x2c   :  { %v86_v10 = vadd.f32 %v85_v9, %v84_v7 }
  0x2e   :  { %v89_v12 = vsel %vm88_vm0, %v49_v8, %v86_v10 }
  0x2f   :  { %v90_v13 = vadd.f32 %v89_v12, %v87_v11 }
  0x31   :  { %91 = vst [vmem:[%s165_s1] sm:$0x3] %v90_v13 }

// kernel: w_basic_block_forward.8
= control target key start
LH: loop header
LB: loop body
LE: loop exit
PB: predicated region body
PF: predicated region fallthrough
CT: control target
= control target key end

     0   :  { %s529_s9 = smov 0   ;;  %s580_s0 = inlined_call_operand.vmem [shape: bf16[2,8,8,128], index: 0, kind: input, shape index: {}]   ;;  %s581_s1 = inlined_call_operand.vmem [shape: bf16[1,128,128], index: 1, kind: input, shape index: {}]   ;;  %s582_s2 = inlined_call_operand.vmem [shape: f32[2,64,128], index: 2, kind: output, shape index: {}]  }
   0x1 LB: > { %s409_s10 = sadd.s32 4294967295, %s512_s9   ;;  %p413_p0 = scmp.ge.s32.totalorder %s512_s9, 1  ;;  %s512_s9 = sphi %s529_s9, %s12_s9  }
   0x2   : > { %p112_p1 = scmp.lt.s32.totalorder %s512_s9, 3 }
   0x4   : > { %p113_p2 = pnand %p413_p0, %p112_p1 }
   0x5   : > { %v494_v0 = vld [vmem:[%s581_s1] sm:$0xff] (!%p113_p2)   ;;  %p134_p3 = scmp.lt.s32.totalorder (!%p113_p2), %s409_s10, 1  ;;  %v495_v1 = vld [vmem:[%s581_s1 + $0x8] sm:$0xff] (!%p113_p2)   ;;  %v496_v2 = vld [vmem:[%s581_s1 + $0x10] sm:$0xff] (!%p113_p2)  }
   0x6   : > { %116 = sbr.rel (%p113_p2) target bundleno = 254 (0xfe), region = 28  ;;  %446 = vmatprep.subr.bf16.mxu0 (!%p113_p2), %v494_v0  ;;  %470 = vmatprep.subr.bf16.mxu1 (!%p113_p2), %v494_v0  ;;  %v497_v3 = vld [vmem:[%s581_s1 + $0x18] sm:$0xff] (!%p113_p2)   ;;  %v498_v6 = vld [vmem:[%s581_s1 + $0x20] sm:$0xff] (!%p113_p2)   ;;  %v499_v7 = vld [vmem:[%s581_s1 + $0x28] sm:$0xff] (!%p113_p2)  }
   0x7   : > { %447 = vmatpush3.bf16.msra.mxu0 (!%p113_p2), %v494_v0  ;;  %478 = vmatpush3.bf16.msra.mxu1 (!%p113_p2), %v494_v0  ;;  %v500_v8 = vld [vmem:[%s581_s1 + $0x30] sm:$0xff] (!%p113_p2)   ;;  %v501_v9 = vld [vmem:[%s581_s1 + $0x38] sm:$0xff] (!%p113_p2)  }
   0x8   : > { %448 = vmatprep.subr.bf16.mxu0 (!%p113_p2), %v495_v1  ;;  %471 = vmatprep.subr.bf16.mxu1 (!%p113_p2), %v495_v1 }
   0xb   : > { %449 = vmatpush3.bf16.msra.mxu0 (!%p113_p2), %v495_v1  ;;  %479 = vmatpush3.bf16.msra.mxu1 (!%p113_p2), %v495_v1 }
   0xc   : > { %450 = vmatprep.subr.bf16.mxu0 (!%p113_p2), %v496_v2  ;;  %472 = vmatprep.subr.bf16.mxu1 (!%p113_p2), %v496_v2 }
   0xd   : > { %s584_s10 = smov (!%p134_p3, %s409_s10), 1 }
   0xe   : > { %s432_s17 = sshll.u32 %s584_s10, 5  ;;  %s433_s3 = sshll.u32 %s584_s10, 6 }
   0xf   : > { %s552_s20 = scalar_lea.vmem %s580_s0, %s432_s17  ;;  %451 = vmatpush3.bf16.msra.mxu0 %v496_v2  ;;  %480 = vmatpush3.bf16.msra.mxu1 %v496_v2  ;;  %s143_s6 = scalar_lea.vmem %s582_s2, %s433_s3 }
  0x10   : > { %v502_v4 = vld [vmem:[%s552_s20] sm:$0xff]   ;;  %v503_v5 = vld [vmem:[%s552_s20 + $0x10] sm:$0xff]   ;;  %452 = vmatprep.subr.bf16.mxu0 %v497_v3  ;;  %473 = vmatprep.subr.bf16.mxu1 %v497_v3  ;;  %v504_v10 = vld [vmem:[%s552_s20 + $0x8] sm:$0xff]  }
  0x11   : > { %462 = vmatprep.mubr.bf16.mxu0 %v502_v4  ;;  %466 = vmatprep.mubr.bf16.mxu1 %v503_v5  ;;  %v505_v11 = vld [vmem:[%s552_s20 + $0x18] sm:$0xff]  }
  0x13   : > { %453 = vmatpush3.bf16.msra.mxu0 %v497_v3  ;;  %481 = vmatpush3.bf16.msra.mxu1 %v497_v3 }
  0x14   : > { %454 = vmatprep.subr.bf16.mxu0 %v498_v6  ;;  %474 = vmatprep.subr.bf16.mxu1 %v498_v6 }
  0x17   : > { %455 = vmatpush3.bf16.msra.mxu0 %v498_v6  ;;  %482 = vmatpush3.bf16.msra.mxu1 %v498_v6 }
  0x18   : > { %456 = vmatprep.subr.bf16.mxu0 %v499_v7  ;;  %475 = vmatprep.subr.bf16.mxu1 %v499_v7 }
  0x1b   : > { %457 = vmatpush3.bf16.msra.mxu0 %v499_v7  ;;  %483 = vmatpush3.bf16.msra.mxu1 %v499_v7 }
  0x1c   : > { %458 = vmatprep.subr.bf16.mxu0 %v500_v8  ;;  %476 = vmatprep.subr.bf16.mxu1 %v500_v8 }
  0x1f   : > { %459 = vmatpush3.bf16.msra.mxu0 %v500_v8  ;;  %484 = vmatpush3.bf16.msra.mxu1 %v500_v8 }
  0x20   : > { %460 = vmatprep.subr.bf16.mxu0 %v501_v9  ;;  %477 = vmatprep.subr.bf16.mxu1 %v501_v9 }
  0x23   : > { %461 = vmatpush3.bf16.msra.mxu0 %v501_v9  ;;  %485 = vmatpush3.bf16.msra.mxu1 %v501_v9 }
  0x26   : > { %463 = vmatmul.mubr.bf16.vlgmr.msra.gmra.mrb[0].mxu0 %v504_v10  ;;  %467 = vmatmul.mubr.bf16.vlgmr.msra.gmra.mrb[0].mxu1 %v505_v11 }
  0xf9   : > { %v464_v12 = vpop.f32.mrb[0].mxu0  ;;  %v468_v13 = vpop.f32.mrb[0].mxu1 }
  0xfa   : > { %348 = vst [vmem:[%s143_s6 + $0x10] sm:$0xff] %v464_v12  ;;  %352 = vst [vmem:[%s143_s6 + $0x30] sm:$0xff] %v468_v13  ;;  %v291_v14 = vpop.f32.mrb[1].mxu0  ;;  %v307_v15 = vpop.f32.mrb[1].mxu1 }
  0xfb   : > { %346 = vst [vmem:[%s143_s6] sm:$0xff] %v291_v14  ;;  %350 = vst [vmem:[%s143_s6 + $0x20] sm:$0xff] %v307_v15  ;;  %v465_v16 = vpop.f32.mrb[2].mxu0  ;;  %v469_v17 = vpop.f32.mrb[2].mxu1 }
  0xfc   : > { %349 = vst [vmem:[%s143_s6 + $0x18] sm:$0xff] %v465_v16  ;;  %353 = vst [vmem:[%s143_s6 + $0x38] sm:$0xff] %v469_v17  ;;  %v294_v18 = vpop.f32.mrb[3].mxu0  ;;  %v310_v19 = vpop.f32.mrb[3].mxu1 }
  0xfd   : > { %347 = vst [vmem:[%s143_s6 + $0x8] sm:$0xff] %v294_v18  ;;  %351 = vst [vmem:[%s143_s6 + $0x28] sm:$0xff] %v310_v19 }
  0xfe PF: > { %s12_s9 = sadd.s32 1, %s512_s9  }
  0xff   : > { %p9_p4 = scmp.ge.s32.totalorder %s12_s9, 4  }
 0x101   :  { %11 = sbr.rel (!%p9_p4) target bundleno = 1 (0x1), region = 58 }

// kernel: w_basic_block_forward.6
= control target key start
LH: loop header
LB: loop body
LE: loop exit
PB: predicated region body
PF: predicated region fallthrough
CT: control target
= control target key end

     0   :  { %s3092_s9 = smov 0   ;;  %s3457_s0 = inlined_call_operand.vmem [shape: bf16[2,36,9,128], index: 0, kind: input, shape index: {}]   ;;  %s3458_s1 = inlined_call_operand.vmem [shape: bf16[9,128,128], index: 1, kind: input, shape index: {}]   ;;  %s3459_s2 = inlined_call_operand.vmem [shape: f32[2,64,128], index: 2, kind: output, shape index: {}]  }
   0x1 LB: > { %s2241_s10 = sadd.s32 4294967295, %s3075_s9   ;;  %p2245_p0 = scmp.ge.s32.totalorder %s3075_s9, 1  ;;  %s3075_s9 = sphi %s3092_s9, %s12_s9  }
   0x2   : > { %p112_p1 = scmp.lt.s32.totalorder %s3075_s9, 3 }
   0x4   : > { %p113_p2 = pnand %p2245_p0, %p112_p1 }
   0x5   : > { %v2973_v0 = vld [vmem:[%s3458_s1] sm:$0xff] (!%p113_p2)   ;;  %p134_p3 = scmp.lt.s32.totalorder (!%p113_p2), %s2241_s10, 1  ;;  %v2975_v2 = vld [vmem:[%s3458_s1 + $0x8] sm:$0xff] (!%p113_p2)   ;;  %v2977_v4 = vld [vmem:[%s3458_s1 + $0x10] sm:$0xff] (!%p113_p2)   ;;  %vm541_vm0 = vsmask.f32 (!%p113_p2), 3328 }
   0x6   : > { %116 = sbr.rel (%p113_p2) target bundleno = 385 (0x181), region = 28  ;;  %v2974_v1 = vld [vmem:[%s3458_s1 + $0x100] sm:$0xff] (!%p113_p2)   ;;  %2668 = vmatprep.subr.bf16.mxu1 (!%p113_p2), %v2973_v0  ;;  %v2976_v3 = vld [vmem:[%s3458_s1 + $0x108] sm:$0xff] (!%p113_p2)   ;;  %v2978_v5 = vld [vmem:[%s3458_s1 + $0x110] sm:$0xff] (!%p113_p2)   ;;  %vm542_vm1 = vsmask.f32 (!%p113_p2), 7440 }
   0x7   : > { %2764 = vmatprep.subr.bf16.mxu0 (!%p113_p2), %v2974_v1  ;;  %2669 = vmatpush3.bf16.msra.mxu1 (!%p113_p2), %v2973_v0  ;;  %v2979_v6 = vld [vmem:[%s3458_s1 + $0x18] sm:$0xff] (!%p113_p2)   ;;  %v2981_v8 = vld [vmem:[%s3458_s1 + $0x20] sm:$0xff] (!%p113_p2)   ;;  %v2983_v10 = vld [vmem:[%s3458_s1 + $0x28] sm:$0xff] (!%p113_p2)  }
   0x8   : > { %2765 = vmatpush3.bf16.msra.mxu0 (!%p113_p2), %v2974_v1  ;;  %2670 = vmatprep.subr.bf16.mxu1 (!%p113_p2), %v2975_v2  ;;  %v2980_v7 = vld [vmem:[%s3458_s1 + $0x118] sm:$0xff] (!%p113_p2)   ;;  %v2982_v9 = vld [vmem:[%s3458_s1 + $0x120] sm:$0xff] (!%p113_p2)   ;;  %v2984_v12 = vld [vmem:[%s3458_s1 + $0x128] sm:$0xff] (!%p113_p2)  }
   0x9   : > { %2766 = vmatprep.subr.bf16.mxu0 (!%p113_p2), %v2976_v3  ;;  %v2985_v14 = vld [vmem:[%s3458_s1 + $0x30] sm:$0xff] (!%p113_p2)   ;;  %v2987_v16 = vld [vmem:[%s3458_s1 + $0x38] sm:$0xff] (!%p113_p2)   ;;  %v2990_v18 = vld [vmem:[%s3458_s1 + $0x40] sm:$0xff] (!%p113_p2)  }
   0xa   : > { %v2986_v15 = vld [vmem:[%s3458_s1 + $0x130] sm:$0xff] (!%p113_p2)   ;;  %v2988_v17 = vld [vmem:[%s3458_s1 + $0x138] sm:$0xff] (!%p113_p2)   ;;  %v2992_v19 = vld [vmem:[%s3458_s1 + $0x140] sm:$0xff] (!%p113_p2)  }
   0xb   : > { %2671 = vmatpush3.bf16.msra.mxu1 (!%p113_p2), %v2975_v2  ;;  %v2995_v22 = vld [vmem:[%s3458_s1 + $0x48] sm:$0xff] (!%p113_p2)   ;;  %v2997_v26 = vld [vmem:[%s3458_s1 + $0x50] sm:$0xff] (!%p113_p2)   ;;  %v2999_v28 = vld [vmem:[%s3458_s1 + $0x58] sm:$0xff] (!%p113_p2)  }
   0xc   : > { %2767 = vmatpush3.bf16.msra.mxu0 (!%p113_p2), %v2976_v3  ;;  %2672 = vmatprep.subr.bf16.mxu1 (!%p113_p2), %v2977_v4  ;;  %v2996_v23 = vld [vmem:[%s3458_s1 + $0x148] sm:$0xff] (!%p113_p2)   ;;  %v2998_v27 = vld [vmem:[%s3458_s1 + $0x150] sm:$0xff] (!%p113_p2)   ;;  %v3000_v31 = vld [vmem:[%s3458_s1 + $0x158] sm:$0xff] (!%p113_p2)  }
   0xd   : > { %s3463_s10 = smov (!%p134_p3, %s2241_s10), 1  ;;  %2768 = vmatprep.subr.bf16.mxu0 %v2978_v5  ;;  %v3001_v38 = vld [vmem:[%s3458_s1 + $0x60] sm:$0xff]   ;;  %v3003_v47 = vld [vmem:[%s3458_s1 + $0x68] sm:$0xff]   ;;  %vm3207_vm2 = vmor %vm541_vm0, %vm542_vm1 }
   0xe   : > { %s2964_s27 = smul.u32 288, %s3463_s10  ;;  %v3002_v43 = vld [vmem:[%s3458_s1 + $0x160] sm:$0xff]   ;;  %v3004_v50 = vld [vmem:[%s3458_s1 + $0x168] sm:$0xff]   ;;  %v3006_v2 = vld [vmem:[%s3458_s1 + $0x70] sm:$0xff]   ;;  %s2559_s4 = sshll.u32 %s3463_s10, 6 }
   0xf   : > { %2673 = vmatpush3.bf16.msra.mxu1 %v2977_v4  ;;  %s143_s8 = scalar_lea.vmem %s3459_s2, %s2559_s4 }
  0x10   : > { %2769 = vmatpush3.bf16.msra.mxu0 %v2978_v5  ;;  %2674 = vmatprep.subr.bf16.mxu1 %v2979_v6  ;;  %s3136_s6 = scalar_lea.vmem %s3457_s0, %s2964_s27 }
  0x11   : > { %2770 = vmatprep.subr.bf16.mxu0 %v2980_v7  ;;  %v2989_v11 = vld [vmem:[%s3136_s6] ss:$8 sps:$4 sm:$0xff]   ;;  %v2993_v20 = vld [vmem:[%s3136_s6 + $0x10] ss:$8 sps:$4 sm:$0xff]   ;;  %v2398_v34 = vld [vmem:[%s3136_s6 + $0x94] sm:$0x1] }
  0x12   : > { %2684 = vmatprep.mubr.bf16.mxu1 %v2989_v11  ;;  %v2991_v13 = vld [vmem:[%s3136_s6 + $0xd8] ss:$8 sps:$4 sm:$0xff]   ;;  %v2994_v21 = vld [vmem:[%s3136_s6 + $0xe8] ss:$8 sps:$4 sm:$0xff]   ;;  %v2400_v39 = vld [vmem:[%s3136_s6 + $0x9c] sm:$0x1] }
  0x13   : > { %2675 = vmatpush3.bf16.msra.mxu1 %v2979_v6  ;;  %2780 = vmatprep.mubr.bf16.mxu0 %v2991_v13  ;;  %v3005_v24 = vld [vmem:[%s3136_s6 + $0x20] ss:$8 sps:$4 sm:$0xff]   ;;  %v3009_v29 = vld [vmem:[%s3136_s6 + $0x30] ss:$8 sps:$4 sm:$0xff]   ;;  %v1226_v40 = vshll.u32 %v2398_v34, 16  ;;  %v1240_v46 = vshll.u32 %v2400_v39, 16 }
  0x14   : > { %2771 = vmatpush3.bf16.msra.mxu0 %v2980_v7  ;;  %2676 = vmatprep.subr.bf16.mxu1 %v2981_v8  ;;  %v3007_v25 = vld [vmem:[%s3136_s6 + $0xf8] ss:$8 sps:$4 sm:$0xff]   ;;  %v3010_v30 = vld [vmem:[%s3136_s6 + $0x108] ss:$8 sps:$4 sm:$0xff]   ;;  %v2402_v57 = vld [vmem:[%s3136_s6 + $0xa4] sm:$0x1] }
  0x15   : > { %2772 = vmatprep.subr.bf16.mxu0 %v2982_v9  ;;  %v3013_v32 = vld [vmem:[%s3136_s6 + $0x48] ss:$8 sps:$4 sm:$0xff]   ;;  %v2399_v35 = vld [vmem:[%s3136_s6 + $0x98] sm:$0xf]  ;;  %v1228_v52 = vrot.slane %v1226_v40, 5  ;;  %v1242_v55 = vrot.slane %v1240_v46, 5 }
  0x16   : > { %v2397_v33 = vld [vmem:[%s3136_s6 + $0x90] sm:$0xf]  ;;  %v1231_v41 = vshrl.u32 %v2399_v35, 16  ;;  %v1234_v42 = vshll.u32 %v2399_v35, 16  ;;  %v2401_v56 = vld [vmem:[%s3136_s6 + $0xa0] sm:$0xf] }
  0x17   : > { %2677 = vmatpush3.bf16.msra.mxu1 %v2981_v8  ;;  %v1217_v36 = vshrl.u32 %v2397_v33, 16  ;;  %v1220_v37 = vshll.u32 %v2397_v33, 16  ;;  %v2403_v59 = vld [vmem:[%s3136_s6 + $0xa8] sm:$0xf]  ;;  %v2404_v60 = vld [vmem:[%s3136_s6 + $0xac] sm:$0x1] }
  0x18   : > { %2773 = vmatpush3.bf16.msra.mxu0 %v2982_v9  ;;  %2678 = vmatprep.subr.bf16.mxu1 %v2983_v10  ;;  %v1233_v48 = vrot.slane %v1231_v41, 4  ;;  %v1236_v49 = vrot.slane %v1234_v42, 5  ;;  %v1245_v61 = vshrl.u32 %v2401_v56, 16  ;;  %v1248_v63 = vshll.u32 %v2401_v56, 16  ;;  %v3008_v6 = vld [vmem:[%s3458_s1 + $0x170] sm:$0xff]  }
  0x19   : > { %2774 = vmatprep.subr.bf16.mxu0 %v2984_v12  ;;  %v1219_v44 = vrot.slane %v1217_v36, 4  ;;  %v1222_v45 = vrot.slane %v1220_v37, 5  ;;  %v1254_v0 = vshll.u32 %v2402_v57, 16  ;;  %v1259_v1 = vshrl.u32 %v2403_v59, 16  ;;  %v3027_v37 = vld [vmem:[%s3136_s6 + $0x68] ss:$8 sps:$4 sm:$0xff]  }
  0x1a   : > { %v1237_v54 = vor.u32 %v1236_v49, %v1233_v48  ;;  %v1247_v4 = vrot.slane %v1245_v61, 4  ;;  %v1262_v5 = vshll.u32 %v2403_v59, 16  ;;  %v1250_v8 = vrot.slane %v1248_v63, 5  ;;  %v3030_v48 = vld [vmem:[%s3136_s6 + $0x78] ss:$8 sps:$4 sm:$0xff]  }
  0x1b   : > { %2679 = vmatpush3.bf16.msra.mxu1 %v2983_v10  ;;  %v1223_v51 = vor.u32 %v1222_v45, %v1219_v44  ;;  %v1261_v9 = vrot.slane %v1259_v1, 4  ;;  %v1268_v10 = vshll.u32 %v2404_v60, 16  ;;  %v2409_v49 = vld [vmem:[%s3136_s6 + $0xc0] sm:$0xf]  ;;  %v3021_v59 = vld [vmem:[%s3458_s1 + $0x98] sm:$0xff]  }
  0x1c   : > { %2775 = vmatpush3.bf16.msra.mxu0 %v2984_v12  ;;  %2680 = vmatprep.subr.bf16.mxu1 %v2985_v14  ;;  %v1238_v62 = vrot.slane %v1237_v54, 4  ;;  %v1256_v12 = vrot.slane %v1254_v0, 5  ;;  %v1264_v13 = vrot.slane %v1262_v5, 5  ;;  %v1301_v56 = vshrl.u32 %v2409_v49, 16 }
  0x1d   : > { %2776 = vmatprep.subr.bf16.mxu0 %v2986_v15  ;;  %v1224_v58 = vrot.slane %v1223_v51, 4  ;;  %v2411_v51 = vld [vmem:[%s3136_s6 + $0xc8] sm:$0xf]  ;;  %v1304_v57 = vshll.u32 %v2409_v49, 16 }
  0x1e   : > { %v1243_v7 = vsel %vm3207_vm2, %v1238_v62, %v1242_v55  ;;  %v2412_v55 = vld [vmem:[%s3136_s6 + $0xcc] sm:$0x1]  ;;  %v1315_v61 = vshrl.u32 %v2411_v51, 16  ;;  %v1318_v62 = vshll.u32 %v2411_v51, 16  ;;  %v1303_v1 = vrot.slane %v1301_v56, 4 }
  0x1f   : > { %2681 = vmatpush3.bf16.msra.mxu1 %v2985_v14  ;;  %v1229_v3 = vsel %vm3207_vm2, %v1224_v58, %v1228_v52  ;;  %v3011_v14 = vld [vmem:[%s3458_s1 + $0x78] sm:$0xff]   ;;  %v3020_v52 = vld [vmem:[%s3458_s1 + $0x190] sm:$0xff]   ;;  %v1324_v63 = vshll.u32 %v2412_v55, 16 }
  0x20   : > { %2777 = vmatpush3.bf16.msra.mxu0 %v2986_v15  ;;  %2682 = vmatprep.subr.bf16.mxu1 %v2987_v16  ;;  %v2429_v11 = vcombine.low %v1229_v3, %v1243_v7  ;;  %v1251_v15 = vor.u32 %v1250_v8, %v1247_v4  ;;  %v3022_v4 = vld [vmem:[%s3458_s1 + $0x198] sm:$0xff]   ;;  %v1320_v7 = vrot.slane %v1318_v62, 5 }
  0x21   : > { %2778 = vmatprep.subr.bf16.mxu0 %v2988_v17  ;;  %v1326_v8 = vrot.slane %v1324_v63, 5 }
  0x23   : > { %2683 = vmatpush3.bf16.msra.mxu1 %v2987_v16  ;;  %v1265_v16 = vor.u32 %v1264_v13, %v1261_v9  ;;  %v3023_v13 = vld [vmem:[%s3458_s1 + $0xa0] sm:$0xff]  }
  0x24   : > { %2779 = vmatpush3.bf16.msra.mxu0 %v2988_v17  ;;  %2692 = vmatprep.subr.bf16.mxu1 %v2990_v18  ;;  %v1252_v17 = vrot.slane %v1251_v15, 4 }
  0x25   : > { %2788 = vmatprep.subr.bf16.mxu0 %v2992_v19 }
  0x26   : > { %2685 = vmatmul.mubr.bf16.vlgmr.msra.gmra.mrb[0].mxu1 %v2993_v20  ;;  %v1266_v20 = vrot.slane %v1265_v16, 4  ;;  %v527_v16 = vld [vmem:[%s3136_s6 + $0x8] sm:$0xf] }
  0x27   : > { %2693 = vmatpush3.bf16.msra.mxu1 %v2990_v18  ;;  %2781 = vmatmul.mubr.bf16.vlgmr.msra.gmra.mrb[0].mxu0 %v2994_v21  ;;  %v1270_v18 = vrot.slane %v1268_v10, 5  ;;  %v3014_v21 = vld [vmem:[%s3458_s1 + $0x80] sm:$0xff]  }
  0x28   : > { %2789 = vmatpush3.bf16.msra.mxu0 %v2992_v19  ;;  %2694 = vmatprep.subr.bf16.mxu1 %v2995_v22  ;;  %v3012_v19 = vld [vmem:[%s3458_s1 + $0x178] sm:$0xff]  }
  0x29   : > { %2790 = vmatprep.subr.bf16.mxu0 %v2996_v23  ;;  %2688 = vmatprep.mubr.bf16.mxu1 %v3005_v24  ;;  %v3015_v24 = vld [vmem:[%s3458_s1 + $0x180] sm:$0xff]  }
  0x2a   : > { %2784 = vmatprep.mubr.bf16.mxu0 %v3007_v25  ;;  %v3016_v25 = vld [vmem:[%s3136_s6 + $0x58] ss:$8 sps:$4 sm:$0xff]  }
  0x2b   : > { %2695 = vmatpush3.bf16.msra.mxu1 %v2995_v22  ;;  %v1257_v22 = vsel %vm3207_vm2, %v1252_v17, %v1256_v12  ;;  %v526_v12 = vld [vmem:[%s3136_s6 + $0x4] sm:$0x1]  ;;  %v528_v17 = vld [vmem:[%s3136_s6 + $0xc] sm:$0x1] }
  0x2c   : > { %2791 = vmatpush3.bf16.msra.mxu0 %v2996_v23  ;;  %2696 = vmatprep.subr.bf16.mxu1 %v2997_v26  ;;  %v1271_v23 = vsel %vm3207_vm2, %v1266_v20, %v1270_v18 }
  0x2d   : > { %2792 = vmatprep.subr.bf16.mxu0 %v2998_v27 }
  0x2e   : > { %2689 = vmatmul.mubr.bf16.gmra.mrb[4].mxu1 %v3009_v29  ;;  %v3018_v29 = vld [vmem:[%s3458_s1 + $0x188] sm:$0xff]  }
  0x2f   : > { %2697 = vmatpush3.bf16.msra.mxu1 %v2997_v26  ;;  %2785 = vmatmul.mubr.bf16.gmra.mrb[4].mxu0 %v3010_v30  ;;  %v3017_v26 = vld [vmem:[%s3458_s1 + $0x88] sm:$0xff]   ;;  %v2406_v30 = vld [vmem:[%s3136_s6 + $0xb4] sm:$0x1] }
  0x30   : > { %2793 = vmatpush3.bf16.msra.mxu0 %v2998_v27  ;;  %2698 = vmatprep.subr.bf16.mxu1 %v2999_v28  ;;  %v2405_v27 = vld [vmem:[%s3136_s6 + $0xb0] sm:$0xf]  ;;  %v1282_v35 = vshll.u32 %v2406_v30, 16 }
  0x31   : > { %2794 = vmatprep.subr.bf16.mxu0 %v3000_v31  ;;  %2708 = vmatprep.mubr.bf16.mxu1 %v3013_v32  ;;  %v2408_v32 = vld [vmem:[%s3136_s6 + $0xbc] sm:$0x1]  ;;  %v1273_v33 = vshrl.u32 %v2405_v27, 16  ;;  %v1276_v34 = vshll.u32 %v2405_v27, 16  ;;  %v568_v27 = vshll.u32 %v528_v17, 16 }
  0x32   : > { %2804 = vmatprep.mubr.bf16.mxu0 %v2429_v11  ;;  %v1296_v39 = vshll.u32 %v2408_v32, 16  ;;  %v1284_v44 = vrot.slane %v1282_v35, 5  ;;  %v525_v11 = vld [vmem:[%s3136_s6] sm:$0xf]  ;;  %v3025_v32 = vld [vmem:[%s3458_s1 + $0xa8] sm:$0xff]  }
  0x33   : > { %2699 = vmatpush3.bf16.msra.mxu1 %v2999_v28  ;;  %v2430_v28 = vcombine.low %v1257_v22, %v1271_v23  ;;  %v1275_v40 = vrot.slane %v1273_v33, 4  ;;  %v1278_v41 = vrot.slane %v1276_v34, 5  ;;  %v545_v18 = vshrl.u32 %v525_v11, 16  ;;  %v536_v17 = vld [vmem:[%s3136_s6 + $0x2c] sm:$0x1] }
  0x34   : > { %2795 = vmatpush3.bf16.msra.mxu0 %v3000_v31  ;;  %2700 = vmatprep.subr.bf16.mxu1 %v3001_v38  ;;  %v2407_v31 = vld [vmem:[%s3136_s6 + $0xb8] sm:$0xf]  ;;  %v1298_v46 = vrot.slane %v1296_v39, 5  ;;  %v559_v22 = vshrl.u32 %v527_v16, 16  ;;  %v562_v23 = vshll.u32 %v527_v16, 16 }
  0x35   : > { %2796 = vmatprep.subr.bf16.mxu0 %v3002_v43  ;;  %v1287_v36 = vshrl.u32 %v2407_v31, 16  ;;  %v535_v16 = vld [vmem:[%s3136_s6 + $0x28] sm:$0xf] }
  0x36   : > { %v561_v30 = vrot.slane %v559_v22, 4  ;;  %v615_v22 = vshrl.u32 %v535_v16, 16 }
  0x37   : > { %2701 = vmatpush3.bf16.msra.mxu1 %v3001_v38  ;;  %v1290_v38 = vshll.u32 %v2407_v31, 16  ;;  %v1289_v42 = vrot.slane %v1287_v36, 4  ;;  %v564_v31 = vrot.slane %v562_v23, 5  ;;  %v570_v36 = vrot.slane %v568_v27, 5 }
  0x38   : > { %2797 = vmatpush3.bf16.msra.mxu0 %v3002_v43  ;;  %2702 = vmatprep.subr.bf16.mxu1 %v3003_v47  ;;  %v3019_v43 = vld [vmem:[%s3458_s1 + $0x90] sm:$0xff]   ;;  %v618_v23 = vshll.u32 %v535_v16, 16  ;;  %v2514_v16 = vld [vmem:[%s3136_s6 + $0xc] sm:$0x1] }
  0x39   : > { %2798 = vmatprep.subr.bf16.mxu0 %v3004_v50  ;;  %v1292_v45 = vrot.slane %v1290_v38, 5  ;;  %v3026_v38 = vld [vmem:[%s3458_s1 + $0x1a8] sm:$0xff]  }
  0x3b   : > { %2703 = vmatpush3.bf16.msra.mxu1 %v3003_v47  ;;  %v1279_v47 = vor.u32 %v1278_v41, %v1275_v40  ;;  %v1293_v54 = vor.u32 %v1292_v45, %v1289_v42  ;;  %v565_v40 = vor.u32 %v564_v31, %v561_v30  ;;  %v529_v41 = vld [vmem:[%s3136_s6 + $0x10] sm:$0xf]  ;;  %v620_v31 = vrot.slane %v618_v23, 5 }
  0x3c   : > { %2799 = vmatpush3.bf16.msra.mxu0 %v3004_v50  ;;  %2704 = vmatprep.subr.bf16.mxu1 %v3006_v2  ;;  %v2410_v50 = vld [vmem:[%s3136_s6 + $0xc4] sm:$0x1]  ;;  %v573_v45 = vshrl.u32 %v529_v41, 16  ;;  %v537_v30 = vld [vmem:[%s3136_s6 + $0x30] sm:$0xf] }
  0x3d   : > { %2800 = vmatprep.subr.bf16.mxu0 %v3008_v6  ;;  %v1310_v58 = vshll.u32 %v2410_v50, 16  ;;  %v1280_v60 = vrot.slane %v1279_v47, 4  ;;  %v1294_v0 = vrot.slane %v1293_v54, 4  ;;  %v532_v47 = vld [vmem:[%s3136_s6 + $0x1c] sm:$0x1] }
  0x3f   : > { %2705 = vmatpush3.bf16.msra.mxu1 %v3006_v2  ;;  %v1306_v2 = vrot.slane %v1304_v57, 5  ;;  %v1312_v3 = vrot.slane %v1310_v58, 5  ;;  %v1285_v5 = vsel %vm3207_vm2, %v1280_v60, %v1284_v44  ;;  %v1299_v9 = vsel %vm3207_vm2, %v1294_v0, %v1298_v46  ;;  %v531_v44 = vld [vmem:[%s3136_s6 + $0x18] sm:$0xf]  ;;  %v3029_v60 = vld [vmem:[%s3458_s1 + $0x1b0] sm:$0xff]  }
  0x40   : > { %2801 = vmatpush3.bf16.msra.mxu0 %v3008_v6  ;;  %2706 = vmatprep.subr.bf16.mxu1 %v3011_v14  ;;  %v1317_v6 = vrot.slane %v1315_v61, 4  ;;  %v566_v46 = vrot.slane %v565_v40, 4  ;;  %v587_v50 = vshrl.u32 %v531_v44, 16  ;;  %v590_v54 = vshll.u32 %v531_v44, 16 }
  0x41   : > { %2802 = vmatprep.subr.bf16.mxu0 %v3012_v19  ;;  %v1307_v10 = vor.u32 %v1306_v2, %v1303_v1  ;;  %v596_v58 = vshll.u32 %v532_v47, 16 }
  0x42   : > { %v1321_v15 = vor.u32 %v1320_v7, %v1317_v6  ;;  %v571_v55 = vsel %vm3207_vm2, %v566_v46, %v570_v36  ;;  %v589_v57 = vrot.slane %v587_v50, 4  ;;  %v592_v63 = vrot.slane %v590_v54, 5  ;;  %v3032_v6 = vld [vmem:[%s3458_s1 + $0x1b8] sm:$0xff]   ;;  %v3033_v7 = vld [vmem:[%s3458_s1 + $0xc0] sm:$0xff]  }
  0x43   : > { %2707 = vmatpush3.bf16.msra.mxu1 %v3011_v14  ;;  %v2431_v14 = vcombine.low %v1285_v5, %v1299_v9  ;;  %v1308_v20 = vrot.slane %v1307_v10, 4  ;;  %v3035_v10 = vld [vmem:[%s3458_s1 + $0x1c0] sm:$0xff]   ;;  %v3041_v50 = vld [vmem:[%s3458_s1 + $0xd8] sm:$0xff]  }
  0x44   : > { %2803 = vmatpush3.bf16.msra.mxu0 %v3012_v19  ;;  %2716 = vmatprep.subr.bf16.mxu1 %v3014_v21  ;;  %v548_v19 = vshll.u32 %v525_v11, 16  ;;  %v593_v1 = vor.u32 %v592_v63, %v589_v57  ;;  %v3036_v11 = vld [vmem:[%s3136_s6 + $0x18] ss:$8 sps:$4 sm:$0xff]  }
  0x45   : > { %2812 = vmatprep.subr.bf16.mxu0 %v3015_v24 }
  0x46   : > { %2709 = vmatmul.mubr.bf16.vlgmr.msra.gmra.mrb[0].mxu1 %v3016_v25  ;;  %v547_v25 = vrot.slane %v545_v18, 4  ;;  %v594_v5 = vrot.slane %v593_v1, 4  ;;  %v3038_v18 = vld [vmem:[%s3458_s1 + $0x1c8] sm:$0xff]   ;;  %v3043_v1 = vld [vmem:[%s3458_s1 + $0xe0] sm:$0xff]  }
  0x47   : > { %2717 = vmatpush3.bf16.msra.mxu1 %v3014_v21  ;;  %2805 = vmatmul.mubr.bf16.vlgmr.msra.gmra.mrb[0].mxu0 %v2430_v28  ;;  %v554_v21 = vshll.u32 %v526_v12, 16  ;;  %v3024_v28 = vld [vmem:[%s3458_s1 + $0x1a0] sm:$0xff]  }
  0x48   : > { %2813 = vmatpush3.bf16.msra.mxu0 %v3015_v24  ;;  %2718 = vmatprep.subr.bf16.mxu1 %v3017_v26  ;;  %v1322_v24 = vrot.slane %v1321_v15, 4  ;;  %v533_v12 = vld [vmem:[%s3136_s6 + $0x20] sm:$0xf]  ;;  %v534_v15 = vld [vmem:[%s3136_s6 + $0x24] sm:$0x1] }
  0x49   : > { %2814 = vmatprep.subr.bf16.mxu0 %v3018_v29  ;;  %2712 = vmatprep.mubr.bf16.mxu1 %v3027_v37  ;;  %v556_v35 = vrot.slane %v554_v21, 5  ;;  %v3034_v37 = vld [vmem:[%s3136_s6 + $0x8] ss:$8 sps:$4 sm:$0xff]   ;;  %v610_v21 = vshll.u32 %v534_v15, 16 }
  0x4a   : > { %2808 = vmatprep.mubr.bf16.mxu0 %v2431_v14  ;;  %v1327_v33 = vsel %vm3207_vm2, %v1322_v24, %v1326_v8  ;;  %v3037_v14 = vld [vmem:[%s3458_s1 + $0xc8] sm:$0xff]   ;;  %v624_v24 = vshll.u32 %v536_v17, 16  ;;  %v2515_v17 = vld [vmem:[%s3136_s6 + $0x10] sm:$0xf] }
  0x4b   : > { %2719 = vmatpush3.bf16.msra.mxu1 %v3017_v26  ;;  %v550_v26 = vrot.slane %v548_v19, 5  ;;  %v601_v19 = vshrl.u32 %v533_v12, 16  ;;  %v2513_v15 = vld [vmem:[%s3136_s6 + $0x8] sm:$0xf]  ;;  %v1906_v23 = vshll.u32 %v2515_v17, 16 }
  0x4c   : > { %2815 = vmatpush3.bf16.msra.mxu0 %v3018_v29  ;;  %2720 = vmatprep.subr.bf16.mxu1 %v3019_v43  ;;  %v1313_v29 = vsel %vm3207_vm2, %v1308_v20, %v1312_v3  ;;  %v598_v3 = vrot.slane %v596_v58, 5  ;;  %v604_v20 = vshll.u32 %v533_v12, 16  ;;  %v3049_v58 = vld [vmem:[%s3136_s6 + $0x38] ss:$8 sps:$4 sm:$0xff]  }
  0x4d   : > { %2816 = vmatprep.subr.bf16.mxu0 %v3020_v52  ;;  %v551_v34 = vor.u32 %v550_v26, %v547_v25  ;;  %v2432_v39 = vcombine.low %v1313_v29, %v1327_v33  ;;  %v3047_v25 = vld [vmem:[%s3136_s6 + $0x28] ss:$8 sps:$4 sm:$0xff]   ;;  %v603_v26 = vrot.slane %v601_v19, 4  ;;  %v617_v29 = vrot.slane %v615_v22, 4  ;;  %v538_v33 = vld [vmem:[%s3136_s6 + $0x34] sm:$0x1] }
  0x4e   : > { %2713 = vmatmul.mubr.bf16.gmra.mrb[4].mxu1 %v3030_v48  ;;  %v576_v48 = vshll.u32 %v529_v41, 16  ;;  %v599_v9 = vsel %vm3207_vm2, %v594_v5, %v598_v3  ;;  %v606_v27 = vrot.slane %v604_v20, 5  ;;  %v638_v40 = vshll.u32 %v538_v33, 16  ;;  %v3040_v41 = vld [vmem:[%s3458_s1 + $0x1d0] sm:$0xff]   ;;  %v3044_v5 = vld [vmem:[%s3458_s1 + $0x1e0] sm:$0xff]   ;;  %v3051_v12 = vld [vmem:[%s3458_s1 + $0xf8] sm:$0xff]  }
  0x4f   : > { %2721 = vmatpush3.bf16.msra.mxu1 %v3019_v43  ;;  %v552_v42 = vrot.slane %v551_v34, 4  ;;  %v530_v43 = vld [vmem:[%s3136_s6 + $0x14] sm:$0x1]  ;;  %2809 = vmatmul.mubr.bf16.gmra.mrb[4].mxu0 %v2432_v39  ;;  %v539_v34 = vld [vmem:[%s3136_s6 + $0x38] sm:$0xf]  ;;  %v632_v39 = vshll.u32 %v537_v30, 16 }
  0x50   : > { %2817 = vmatpush3.bf16.msra.mxu0 %v3020_v52  ;;  %2722 = vmatprep.subr.bf16.mxu1 %v3021_v59  ;;  %v582_v49 = vshll.u32 %v530_v43, 16  ;;  %v575_v52 = vrot.slane %v573_v45, 4  ;;  %v578_v56 = vrot.slane %v576_v48, 5  ;;  %v607_v36 = vor.u32 %v606_v27, %v603_v26  ;;  %v2524_v33 = vld [vmem:[%s3136_s6 + $0x34] sm:$0x1] }
  0x51   : > { %2818 = vmatprep.subr.bf16.mxu0 %v3022_v4  ;;  %v557_v51 = vsel %vm3207_vm2, %v552_v42, %v556_v35  ;;  %2828 = vmatprep.mubr.bf16.mxu0 %v3034_v37  ;;  %v3039_v35 = vld [vmem:[%s3458_s1 + $0xd0] sm:$0xff]   ;;  %v540_v37 = vld [vmem:[%s3136_s6 + $0x3c] sm:$0x1]  ;;  %v621_v42 = vor.u32 %v620_v31, %v617_v29  ;;  %v643_v43 = vshrl.u32 %v539_v34, 16  ;;  %v646_v44 = vshll.u32 %v539_v34, 16 }
  0x52   : > { %v2313_v61 = vcombine.low %v557_v51, %v571_v55  ;;  %v584_v62 = vrot.slane %v582_v49, 5  ;;  %v579_v0 = vor.u32 %v578_v56, %v575_v52  ;;  %v652_v45 = vshll.u32 %v540_v37, 16  ;;  %v2523_v29 = vld [vmem:[%s3136_s6 + $0x30] sm:$0xf]  ;;  %v3056_v34 = vld [vmem:[%s3136_s6 + $0x60] ss:$8 sps:$4 sm:$0xff]  }
  0x53   : > { %2723 = vmatpush3.bf16.msra.mxu1 %v3021_v59  ;;  %v3028_v59 = vld [vmem:[%s3458_s1 + $0xb0] sm:$0xff]   ;;  %v608_v46 = vrot.slane %v607_v36, 4  ;;  %v634_v48 = vrot.slane %v632_v39, 5  ;;  %v640_v49 = vrot.slane %v638_v40, 5  ;;  %v622_v51 = vrot.slane %v621_v42, 4  ;;  %v3058_v39 = vld [vmem:[%s3458_s1 + $0x208] sm:$0xff]  }
  0x54   : > { %2819 = vmatpush3.bf16.msra.mxu0 %v3022_v4  ;;  %2724 = vmatprep.subr.bf16.mxu1 %v3023_v13  ;;  %v580_v2 = vrot.slane %v579_v0, 4  ;;  %v3031_v4 = vld [vmem:[%s3458_s1 + $0xb8] sm:$0xff]   ;;  %v645_v52 = vrot.slane %v643_v43, 4  ;;  %v648_v54 = vrot.slane %v646_v44, 5  ;;  %v654_v55 = vrot.slane %v652_v45, 5 }
  0x55   : > { %2820 = vmatprep.subr.bf16.mxu0 %v3024_v28  ;;  %2732 = vmatprep.mubr.bf16.mxu1 %v2313_v61  ;;  %v3042_v61 = vld [vmem:[%s3458_s1 + $0x1d8] sm:$0xff]   ;;  %v1889_v19 = vshrl.u32 %v2513_v15, 16  ;;  %v1892_v20 = vshll.u32 %v2513_v15, 16  ;;  %v1903_v22 = vshrl.u32 %v2515_v17, 16  ;;  %v1962_v42 = vshll.u32 %v2523_v29, 16  ;;  %v3065_v15 = vld [vmem:[%s3458_s1 + $0x220] sm:$0xff]  }
  0x56   : > { %v585_v8 = vsel %vm3207_vm2, %v580_v2, %v584_v62  ;;  %v1968_v43 = vshll.u32 %v2524_v33, 16  ;;  %v3059_v44 = vld [vmem:[%s3136_s6 + $0xb0] ss:$8 sps:$4 sm:$0xff]  }
  0x57   : > { %2725 = vmatpush3.bf16.msra.mxu1 %v3023_v13  ;;  %v2314_v13 = vcombine.low %v585_v8, %v599_v9  ;;  %v3045_v8 = vld [vmem:[%s3458_s1 + $0xe8] sm:$0xff]   ;;  %v1891_v26 = vrot.slane %v1889_v19, 4  ;;  %v1894_v27 = vrot.slane %v1892_v20, 5  ;;  %v1905_v31 = vrot.slane %v1903_v22, 4 }
  0x58   : > { %2821 = vmatpush3.bf16.msra.mxu0 %v3024_v28  ;;  %2726 = vmatprep.subr.bf16.mxu1 %v3025_v32  ;;  %v612_v28 = vrot.slane %v610_v21, 5  ;;  %v3046_v9 = vld [vmem:[%s3458_s1 + $0x1e8] sm:$0xff]   ;;  %v1898_v21 = vshll.u32 %v2514_v16, 16 }
  0x59   : > { %2822 = vmatprep.subr.bf16.mxu0 %v3026_v38  ;;  %v3066_v20 = vld [vmem:[%s3458_s1 + $0x228] sm:$0xff]  }
  0x5a   : > { %v613_v56 = vsel %vm3207_vm2, %v608_v46, %v612_v28  ;;  %v2522_v28 = vld [vmem:[%s3136_s6 + $0x2c] sm:$0x1]  ;;  %v1900_v45 = vrot.slane %v1898_v21, 5  ;;  %v2526_v21 = vld [vmem:[%s3136_s6 + $0x3c] sm:$0x1] }
  0x5b   : > { %2727 = vmatpush3.bf16.msra.mxu1 %v3025_v32  ;;  %v626_v32 = vrot.slane %v624_v24, 5 }
  0x5c   : > { %2823 = vmatpush3.bf16.msra.mxu0 %v3026_v38  ;;  %2728 = vmatprep.subr.bf16.mxu1 %v3028_v59  ;;  %v629_v38 = vshrl.u32 %v537_v30, 16  ;;  %v3055_v30 = vld [vmem:[%s3136_s6 + $0xa0] ss:$8 sps:$4 sm:$0xff]  }
  0x5d   : > { %2824 = vmatprep.subr.bf16.mxu0 %v3029_v60 }
  0x5e   : > { %v631_v47 = vrot.slane %v629_v38, 4  ;;  %v1954_v38 = vshll.u32 %v2522_v28, 16 }
  0x5f   : > { %2729 = vmatpush3.bf16.msra.mxu1 %v3028_v59  ;;  %v627_v59 = vsel %vm3207_vm2, %v622_v51, %v626_v32  ;;  %v1908_v32 = vrot.slane %v1906_v23, 5 }
  0x60   : > { %2825 = vmatpush3.bf16.msra.mxu0 %v3029_v60  ;;  %2730 = vmatprep.subr.bf16.mxu1 %v3031_v4  ;;  %v635_v57 = vor.u32 %v634_v48, %v631_v47  ;;  %v649_v60 = vor.u32 %v648_v54, %v645_v52  ;;  %v2315_v62 = vcombine.low %v613_v56, %v627_v59  ;;  %v1964_v54 = vrot.slane %v1962_v42, 5 }
  0x61   : > { %2826 = vmatprep.subr.bf16.mxu0 %v3032_v6  ;;  %v1909_v40 = vor.u32 %v1908_v32, %v1905_v31  ;;  %v1956_v56 = vrot.slane %v1954_v38, 5  ;;  %v1970_v59 = vrot.slane %v1968_v43, 5  ;;  %v2518_v31 = vld [vmem:[%s3136_s6 + $0x1c] sm:$0x1]  ;;  %v2520_v32 = vld [vmem:[%s3136_s6 + $0x24] sm:$0x1] }
  0x62   : > { %v636_v63 = vrot.slane %v635_v57, 4  ;;  %v650_v0 = vrot.slane %v649_v60, 4  ;;  %v3063_v57 = vld [vmem:[%s3458_s1 + $0x210] sm:$0xff]  }
  0x63   : > { %2731 = vmatpush3.bf16.msra.mxu1 %v3031_v4  ;;  %v3054_v4 = vld [vmem:[%s3136_s6 + $0x50] ss:$8 sps:$4 sm:$0xff]   ;;  %v1910_v51 = vrot.slane %v1909_v40, 4 }
  0x64   : > { %2827 = vmatpush3.bf16.msra.mxu0 %v3032_v6  ;;  %2740 = vmatprep.subr.bf16.mxu1 %v3033_v7  ;;  %v641_v2 = vsel %vm3207_vm2, %v636_v63, %v640_v49  ;;  %v655_v3 = vsel %vm3207_vm2, %v650_v0, %v654_v55  ;;  %v3060_v49 = vld [vmem:[%s3136_s6 + $0x70] ss:$8 sps:$4 sm:$0xff]  }
  0x65   : > { %2836 = vmatprep.subr.bf16.mxu0 %v3035_v10  ;;  %v2316_v6 = vcombine.low %v641_v2, %v655_v3  ;;  %v3064_v3 = vld [vmem:[%s3458_s1 + $0x218] sm:$0xff]  }
  0x66   : > { %2733 = vmatmul.mubr.bf16.vlgmr.msra.gmra.mrb[0].mxu1 %v2314_v13  ;;  %v3052_v13 = vld [vmem:[%s3458_s1 + $0x1f8] sm:$0xff]  }
  0x67   : > { %2741 = vmatpush3.bf16.msra.mxu1 %v3033_v7  ;;  %2829 = vmatmul.mubr.bf16.vlgmr.msra.gmra.mrb[0].mxu0 %v3036_v11  ;;  %v3053_v7 = vld [vmem:[%s3136_s6 + $0x90] ss:$8 sps:$4 sm:$0xff]  }
  0x68   : > { %2837 = vmatpush3.bf16.msra.mxu0 %v3035_v10  ;;  %2742 = vmatprep.subr.bf16.mxu1 %v3037_v14  ;;  %v3048_v10 = vld [vmem:[%s3458_s1 + $0xf0] sm:$0xff]  }
  0x69   : > { %2838 = vmatprep.subr.bf16.mxu0 %v3038_v18  ;;  %2832 = vmatprep.mubr.bf16.mxu0 %v3047_v25  ;;  %v3050_v11 = vld [vmem:[%s3458_s1 + $0x1f0] sm:$0xff]   ;;  %v2521_v25 = vld [vmem:[%s3136_s6 + $0x28] sm:$0xf] }
  0x6a   : > { %2736 = vmatprep.mubr.bf16.mxu1 %v2315_v62  ;;  %v1945_v36 = vshrl.u32 %v2521_v25, 16  ;;  %v1948_v37 = vshll.u32 %v2521_v25, 16 }
  0x6b   : > { %2743 = vmatpush3.bf16.msra.mxu1 %v3037_v14  ;;  %v3057_v14 = vld [vmem:[%s3458_s1 + $0x200] sm:$0xff]  }
  0x6c   : > { %2839 = vmatpush3.bf16.msra.mxu0 %v3038_v18  ;;  %2744 = vmatprep.subr.bf16.mxu1 %v3039_v35  ;;  %v2516_v18 = vld [vmem:[%s3136_s6 + $0x14] sm:$0x1]  ;;  %v1947_v47 = vrot.slane %v1945_v36, 4  ;;  %v1950_v48 = vrot.slane %v1948_v37, 5 }
  0x6d   : > { %2840 = vmatprep.subr.bf16.mxu0 %v3040_v41  ;;  %v1912_v24 = vshll.u32 %v2516_v18, 16  ;;  %v3067_v37 = vld [vmem:[%s3458_s1 + $0x230] sm:$0xff]  }
  0x6e   : > { %2737 = vmatmul.mubr.bf16.gmra.mrb[4].mxu1 %v2316_v6  ;;  %v1951_v55 = vor.u32 %v1950_v48, %v1947_v47  ;;  %v2527_v6 = vld [vmem:[%s3136_s6 + $0x40] sm:$0xf] }
  0x6f   : > { %2745 = vmatpush3.bf16.msra.mxu1 %v3039_v35  ;;  %2833 = vmatmul.mubr.bf16.gmra.mrb[4].mxu0 %v3049_v58  ;;  %v1895_v35 = vor.u32 %v1894_v27, %v1891_v26  ;;  %v1914_v46 = vrot.slane %v1912_v24, 5 }
  0x70   : > { %2841 = vmatpush3.bf16.msra.mxu0 %v3040_v41  ;;  %2746 = vmatprep.subr.bf16.mxu1 %v3041_v50  ;;  %v1959_v41 = vshrl.u32 %v2523_v29, 16  ;;  %v1952_v60 = vrot.slane %v1951_v55, 4 }
  0x71   : > { %2842 = vmatprep.subr.bf16.mxu0 %v3042_v61  ;;  %2852 = vmatprep.mubr.bf16.mxu0 %v3054_v4  ;;  %v1915_v63 = vsel %vm3207_vm2, %v1910_v51, %v1914_v46  ;;  %v3068_v46 = vld [vmem:[%s3458_s1 + $0x238] sm:$0xff]  }
  0x72   : > { %2756 = vmatprep.mubr.bf16.mxu1 %v3053_v7  ;;  %v1961_v52 = vrot.slane %v1959_v41, 4  ;;  %v1957_v2 = vsel %vm3207_vm2, %v1952_v60, %v1956_v56  ;;  %v1940_v41 = vshll.u32 %v2520_v32, 16 }
  0x73   : > { %2747 = vmatpush3.bf16.msra.mxu1 %v3041_v50  ;;  %v1896_v50 = vrot.slane %v1895_v35, 4 }
  0x74   : > { %2843 = vmatpush3.bf16.msra.mxu0 %v3042_v61  ;;  %2748 = vmatprep.subr.bf16.mxu1 %v3043_v1  ;;  %v1965_v58 = vor.u32 %v1964_v54, %v1961_v52  ;;  %v3061_v61 = vld [vmem:[%s3136_s6 + $0xc0] ss:$8 sps:$4 sm:$0xff]  }
  0x75   : > { %2844 = vmatprep.subr.bf16.mxu0 %v3044_v5  ;;  %v1901_v62 = vsel %vm3207_vm2, %v1896_v50, %v1900_v45  ;;  %v1942_v50 = vrot.slane %v1940_v41, 5 }
  0x76   : > { %v1966_v0 = vrot.slane %v1965_v58, 4  ;;  %v2545_v7 = vcombine.low %v1901_v62, %v1915_v63 }
  0x77   : > { %2749 = vmatpush3.bf16.msra.mxu1 %v3043_v1  ;;  %v3062_v1 = vld [vmem:[%s3136_s6 + $0x80] ss:$8 sps:$4 sm:$0xff]  }
  0x78   : > { %2845 = vmatpush3.bf16.msra.mxu0 %v3044_v5  ;;  %2750 = vmatprep.subr.bf16.mxu1 %v3045_v8  ;;  %v1971_v4 = vsel %vm3207_vm2, %v1966_v0, %v1970_v59  ;;  %v2525_v5 = vld [vmem:[%s3136_s6 + $0x38] sm:$0xf] }
  0x79   : > { %2846 = vmatprep.subr.bf16.mxu0 %v3046_v9 }
  0x7b   : > { %2751 = vmatpush3.bf16.msra.mxu1 %v3045_v8  ;;  %v2517_v8 = vld [vmem:[%s3136_s6 + $0x18] sm:$0xf] }
  0x7c   : > { %2847 = vmatpush3.bf16.msra.mxu0 %v3046_v9  ;;  %2752 = vmatprep.subr.bf16.mxu1 %v3048_v10  ;;  %v2519_v9 = vld [vmem:[%s3136_s6 + $0x20] sm:$0xf]  ;;  %v1917_v16 = vshrl.u32 %v2517_v8, 16  ;;  %v1920_v17 = vshll.u32 %v2517_v8, 16 }
  0x7d   : > { %2848 = vmatprep.subr.bf16.mxu0 %v3050_v11  ;;  %v1931_v18 = vshrl.u32 %v2519_v9, 16  ;;  %v1934_v19 = vshll.u32 %v2519_v9, 16 }
  0x7e   : > { %v1919_v26 = vrot.slane %v1917_v16, 4  ;;  %v1922_v27 = vrot.slane %v1920_v17, 5 }
  0x7f   : > { %2753 = vmatpush3.bf16.msra.mxu1 %v3048_v10  ;;  %v2547_v10 = vcombine.low %v1957_v2, %v1971_v4  ;;  %v1933_v28 = vrot.slane %v1931_v18, 4  ;;  %v1936_v29 = vrot.slane %v1934_v19, 5 }
  0x80   : > { %2849 = vmatpush3.bf16.msra.mxu0 %v3050_v11  ;;  %2754 = vmatprep.subr.bf16.mxu1 %v3051_v12  ;;  %v1973_v11 = vshrl.u32 %v2525_v5, 16  ;;  %v1923_v38 = vor.u32 %v1922_v27, %v1919_v26 }
  0x81   : > { %2850 = vmatprep.subr.bf16.mxu0 %v3052_v13  ;;  %v1937_v40 = vor.u32 %v1936_v29, %v1933_v28 }
  0x82   : > { %v1975_v22 = vrot.slane %v1973_v11, 4  ;;  %v1924_v47 = vrot.slane %v1923_v38, 4 }
  0x83   : > { %2755 = vmatpush3.bf16.msra.mxu1 %v3051_v12  ;;  %v1976_v12 = vshll.u32 %v2525_v5, 16 }
  0x84   : > { %2851 = vmatpush3.bf16.msra.mxu0 %v3052_v13  ;;  %2884 = vmatprep.subr.bf16.mxu1 %v3057_v14  ;;  %v1987_v13 = vshrl.u32 %v2527_v6, 16 }
  0x85   : > { %2860 = vmatprep.subr.bf16.mxu0 %v3057_v14  ;;  %v1978_v23 = vrot.slane %v1976_v12, 5 }
  0x86   : > { %2757 = vmatmul.mubr.bf16.vlgmr.msra.gmra.mrb[0].mxu1 %v3055_v30  ;;  %v1989_v24 = vrot.slane %v1987_v13, 4  ;;  %v2528_v30 = vld [vmem:[%s3136_s6 + $0x44] sm:$0x1] }
  0x87   : > { %2853 = vmatmul.mubr.bf16.vlgmr.msra.gmra.mrb[0].mxu0 %v3056_v34  ;;  %2892 = vmatpush3.bf16.msra.mxu1 %v3057_v14  ;;  %v1979_v33 = vor.u32 %v1978_v23, %v1975_v22  ;;  %v1982_v34 = vshll.u32 %v2526_v21, 16  ;;  %v1996_v36 = vshll.u32 %v2528_v30, 16 }
  0x88   : > { %2861 = vmatpush3.bf16.msra.mxu0 %v3057_v14  ;;  %2885 = vmatprep.subr.bf16.mxu1 %v3058_v39  ;;  %v1990_v14 = vshll.u32 %v2527_v6, 16 }
  0x89   : > { %2862 = vmatprep.subr.bf16.mxu0 %v3058_v39  ;;  %2760 = vmatprep.mubr.bf16.mxu1 %v3059_v44  ;;  %v1980_v42 = vrot.slane %v1979_v33, 4  ;;  %v1984_v43 = vrot.slane %v1982_v34, 5  ;;  %v1998_v45 = vrot.slane %v1996_v36, 5 }
  0x8a   : > { %2856 = vmatprep.mubr.bf16.mxu0 %v3060_v49  ;;  %v1992_v25 = vrot.slane %v1990_v14, 5  ;;  %v1938_v49 = vrot.slane %v1937_v40, 4 }
  0x8b   : > { %2893 = vmatpush3.bf16.msra.mxu1 %v3058_v39  ;;  %v1985_v51 = vsel %vm3207_vm2, %v1980_v42, %v1984_v43 }
  0x8c   : > { %2863 = vmatpush3.bf16.msra.mxu0 %v3058_v39  ;;  %2886 = vmatprep.subr.bf16.mxu1 %v3063_v57  ;;  %v1993_v35 = vor.u32 %v1992_v25, %v1989_v24  ;;  %v1926_v39 = vshll.u32 %v2518_v31, 16  ;;  %v1943_v55 = vsel %vm3207_vm2, %v1938_v49, %v1942_v50 }
  0x8d   : > { %2864 = vmatprep.subr.bf16.mxu0 %v3063_v57 }
  0x8e   : > { %2761 = vmatmul.mubr.bf16.gmra.mrb[4].mxu1 %v3061_v61  ;;  %v1994_v44 = vrot.slane %v1993_v35, 4  ;;  %v1928_v48 = vrot.slane %v1926_v39, 5 }
  0x8f   : > { %2857 = vmatmul.mubr.bf16.gmra.mrb[4].mxu0 %v3062_v1  ;;  %2894 = vmatpush3.bf16.msra.mxu1 %v3063_v57 }
  0x90   : > { %2865 = vmatpush3.bf16.msra.mxu0 %v3063_v57  ;;  %2887 = vmatprep.subr.bf16.mxu1 %v3064_v3  ;;  %v1999_v52 = vsel %vm3207_vm2, %v1994_v44, %v1998_v45  ;;  %v1929_v54 = vsel %vm3207_vm2, %v1924_v47, %v1928_v48 }
  0x91   : > { %2866 = vmatprep.subr.bf16.mxu0 %v3064_v3  ;;  %2876 = vmatprep.mubr.bf16.mxu0 %v2545_v7  ;;  %v2548_v56 = vcombine.low %v1985_v51, %v1999_v52  ;;  %v2546_v57 = vcombine.low %v1929_v54, %v1943_v55 }
  0x92   : > { %2880 = vmatprep.mubr.bf16.mxu1 %v2547_v10 }
  0x93   : > { %2895 = vmatpush3.bf16.msra.mxu1 %v3064_v3 }
  0x94   : > { %2867 = vmatpush3.bf16.msra.mxu0 %v3064_v3  ;;  %2888 = vmatprep.subr.bf16.mxu1 %v3065_v15 }
  0x95   : > { %2868 = vmatprep.subr.bf16.mxu0 %v3065_v15 }
  0x97   : > { %2896 = vmatpush3.bf16.msra.mxu1 %v3065_v15 }
  0x98   : > { %2869 = vmatpush3.bf16.msra.mxu0 %v3065_v15  ;;  %2889 = vmatprep.subr.bf16.mxu1 %v3066_v20 }
  0x99   : > { %2870 = vmatprep.subr.bf16.mxu0 %v3066_v20 }
  0x9b   : > { %2897 = vmatpush3.bf16.msra.mxu1 %v3066_v20 }
  0x9c   : > { %2871 = vmatpush3.bf16.msra.mxu0 %v3066_v20  ;;  %2890 = vmatprep.subr.bf16.mxu1 %v3067_v37 }
  0x9d   : > { %2872 = vmatprep.subr.bf16.mxu0 %v3067_v37 }
  0x9f   : > { %2898 = vmatpush3.bf16.msra.mxu1 %v3067_v37 }
  0xa0   : > { %2873 = vmatpush3.bf16.msra.mxu0 %v3067_v37  ;;  %2891 = vmatprep.subr.bf16.mxu1 %v3068_v46 }
  0xa1   : > { %2874 = vmatprep.subr.bf16.mxu0 %v3068_v46 }
  0xa3   : > { %2899 = vmatpush3.bf16.msra.mxu1 %v3068_v46 }
  0xa4   : > { %2875 = vmatpush3.bf16.msra.mxu0 %v3068_v46 }
  0xa6   : > { %2881 = vmatmul.mubr.bf16.vlgmr.msra.gmra.mrb[8].mxu1 %v2548_v56 }
  0xa7   : > { %2877 = vmatmul.mubr.bf16.vlgmr.msra.gmra.mrb[0].mxu0 %v2546_v57 }
 0x159   : > { %v2758_v58 = vpop.f32.mrb[0].mxu1 }
 0x15a   : > { %v966_v59 = vpop.f32.mrb[1].mxu1 }
 0x15b   : > { %v2759_v60 = vpop.f32.mrb[2].mxu1 }
 0x15c   : > { %v969_v61 = vpop.f32.mrb[3].mxu1 }
 0x161   : > { %v2762_v62 = vpop.f32.mrb[4].mxu1 }
 0x162   : > { %v2858_v63 = vpop.f32.mrb[4].mxu0  ;;  %v982_v0 = vpop.f32.mrb[5].mxu1 }
 0x163   : > { %v2904_v1 = vadd.f32 %v2858_v63, %v2762_v62  ;;  %v1841_v2 = vpop.f32.mrb[5].mxu0  ;;  %v2763_v3 = vpop.f32.mrb[6].mxu1 }
 0x164   : > { %v2906_v53 = vadd.f32 %v1841_v2, %v982_v0  ;;  %v2859_v4 = vpop.f32.mrb[6].mxu0  ;;  %v985_v5 = vpop.f32.mrb[7].mxu1 }
 0x165   : > { %v2908_v6 = vadd.f32 %v2859_v4, %v2763_v3  ;;  %v1844_v7 = vpop.f32.mrb[7].mxu0 }
 0x166   : > { %v2910_v8 = vadd.f32 %v1844_v7, %v985_v5 }
 0x179   : > { %v2882_v9 = vpop.f32.mrb[8].mxu1 }
 0x17a   : > { %v2878_v10 = vpop.f32.mrb[0].mxu0  ;;  %v2905_v11 = vadd.f32 %v2904_v1, %v2882_v9  ;;  %v2139_v12 = vpop.f32.mrb[9].mxu1 }
 0x17b   : > { %v2900_v13 = vadd.f32 %v2878_v10, %v2758_v58  ;;  %v2123_v14 = vpop.f32.mrb[1].mxu0  ;;  %v2907_v15 = vadd.f32 %v2906_v53, %v2139_v12  ;;  %v2883_v16 = vpop.f32.mrb[10].mxu1 }
 0x17c   : > { %2184 = vst [vmem:[%s143_s8 + $0x30] sm:$0xff] %v2905_v11  ;;  %v2901_v17 = vadd.f32 %v2123_v14, %v966_v59  ;;  %v2879_v18 = vpop.f32.mrb[2].mxu0  ;;  %v2909_v19 = vadd.f32 %v2908_v6, %v2883_v16  ;;  %v2142_v20 = vpop.f32.mrb[11].mxu1 }
 0x17d   : > { %2180 = vst [vmem:[%s143_s8 + $0x10] sm:$0xff] %v2900_v13  ;;  %2182 = vst [vmem:[%s143_s8 + $0x20] sm:$0xff] %v2907_v15  ;;  %v2902_v21 = vadd.f32 %v2879_v18, %v2759_v60  ;;  %v2126_v22 = vpop.f32.mrb[3].mxu0  ;;  %v2911_v23 = vadd.f32 %v2910_v8, %v2142_v20 }
 0x17e   : > { %2178 = vst [vmem:[%s143_s8] sm:$0xff] %v2901_v17  ;;  %2185 = vst [vmem:[%s143_s8 + $0x38] sm:$0xff] %v2909_v19  ;;  %v2903_v24 = vadd.f32 %v2126_v22, %v969_v61 }
 0x17f   : > { %2181 = vst [vmem:[%s143_s8 + $0x18] sm:$0xff] %v2902_v21  ;;  %2183 = vst [vmem:[%s143_s8 + $0x28] sm:$0xff] %v2911_v23 }
 0x180   : > { %2179 = vst [vmem:[%s143_s8 + $0x8] sm:$0xff] %v2903_v24 }
 0x181 PF: > { %s12_s9 = sadd.s32 1, %s3075_s9  }
 0x182   : > { %p9_p4 = scmp.ge.s32.totalorder %s12_s9, 4  }
 0x184   :  { %11 = sbr.rel (!%p9_p4) target bundleno = 1 (0x1), region = 71 }

// kernel: w_basic_block_forward.9
= control target key start
LH: loop header
LB: loop body
LE: loop exit
PB: predicated region body
PF: predicated region fallthrough
CT: control target
= control target key end

     0   :  { %s3339_s12 = smov 0   ;;  %s3801_s0 = inlined_call_operand.vmem [shape: bf16[2,10,10,128], index: 0, kind: input, shape index: {}]   ;;  %s3802_s1 = inlined_call_operand.vmem [shape: bf16[9,128,128], index: 1, kind: input, shape index: {}]   ;;  %s3803_s2 = inlined_call_operand.vmem [shape: f32[2,64,128], index: 2, kind: input, shape index: {}]   ;;  %s3804_s3 = inlined_call_operand.vmem [shape: f32[2,64,128], index: 3, kind: output, shape index: {}]  }
   0x1 LB: > { %s2452_s13 = sadd.s32 4294967295, %s3317_s12   ;;  %p2456_p0 = scmp.ge.s32.totalorder %s3317_s12, 1  ;;  %s3317_s12 = sphi %s3339_s12, %s13_s12  }
   0x2   : > { %p147_p1 = scmp.lt.s32.totalorder %s3317_s12, 3 }
   0x4   : > { %p148_p2 = pnand %p2456_p0, %p147_p1 }
   0x5   : > { %v3227_v0 = vld [vmem:[%s3802_s1] sm:$0xff] (!%p148_p2)   ;;  %v3229_v2 = vld [vmem:[%s3802_s1 + $0x8] sm:$0xff] (!%p148_p2)   ;;  %p176_p3 = scmp.lt.s32.totalorder (!%p148_p2), %s2452_s13, 1  ;;  %v3231_v4 = vld [vmem:[%s3802_s1 + $0x10] sm:$0xff] (!%p148_p2)   ;;  %vm409_vm0 = vsmask.f32 (!%p148_p2), 3328 }
   0x6   : > { %151 = sbr.rel (%p148_p2) target bundleno = 385 (0x181), region = 32  ;;  %v3228_v1 = vld [vmem:[%s3802_s1 + $0x100] sm:$0xff] (!%p148_p2)   ;;  %2914 = vmatprep.subr.bf16.mxu1 (!%p148_p2), %v3227_v0  ;;  %v3230_v3 = vld [vmem:[%s3802_s1 + $0x108] sm:$0xff] (!%p148_p2)   ;;  %v3232_v5 = vld [vmem:[%s3802_s1 + $0x110] sm:$0xff] (!%p148_p2)   ;;  %vm410_vm1 = vsmask.f32 (!%p148_p2), 7440 }
   0x7   : > { %3010 = vmatprep.subr.bf16.mxu0 (!%p148_p2), %v3228_v1  ;;  %2915 = vmatpush3.bf16.msra.mxu1 (!%p148_p2), %v3227_v0  ;;  %v3233_v6 = vld [vmem:[%s3802_s1 + $0x18] sm:$0xff] (!%p148_p2)   ;;  %v3235_v8 = vld [vmem:[%s3802_s1 + $0x20] sm:$0xff] (!%p148_p2)   ;;  %v3237_v10 = vld [vmem:[%s3802_s1 + $0x28] sm:$0xff] (!%p148_p2)   ;;  %vm726_vm3 = vcmask (!%p148_p2), 1042432   ;;  %vm727_vm4 = vcmask (!%p148_p2), 1046532  }
   0x8   : > { %3011 = vmatpush3.bf16.msra.mxu0 (!%p148_p2), %v3228_v1  ;;  %2916 = vmatprep.subr.bf16.mxu1 (!%p148_p2), %v3229_v2  ;;  %v3234_v7 = vld [vmem:[%s3802_s1 + $0x118] sm:$0xff] (!%p148_p2)   ;;  %v3236_v9 = vld [vmem:[%s3802_s1 + $0x120] sm:$0xff] (!%p148_p2)   ;;  %v3238_v12 = vld [vmem:[%s3802_s1 + $0x128] sm:$0xff] (!%p148_p2)  }
   0x9   : > { %3012 = vmatprep.subr.bf16.mxu0 (!%p148_p2), %v3230_v3  ;;  %v3239_v18 = vld [vmem:[%s3802_s1 + $0x30] sm:$0xff] (!%p148_p2)   ;;  %v3241_v27 = vld [vmem:[%s3802_s1 + $0x38] sm:$0xff] (!%p148_p2)   ;;  %vm3410_vm2 = vmor (!%p148_p2), %vm409_vm0, %vm410_vm1 }
   0xa   : > { %v3240_v23 = vld [vmem:[%s3802_s1 + $0x130] sm:$0xff] (!%p148_p2)   ;;  %v3242_v30 = vld [vmem:[%s3802_s1 + $0x138] sm:$0xff] (!%p148_p2)   ;;  %v3244_v46 = vld [vmem:[%s3802_s1 + $0x40] sm:$0xff] (!%p148_p2)  }
   0xb   : > { %2917 = vmatpush3.bf16.msra.mxu1 (!%p148_p2), %v3229_v2  ;;  %v3245_v52 = vld [vmem:[%s3802_s1 + $0x140] sm:$0xff] (!%p148_p2)   ;;  %v3247_v63 = vld [vmem:[%s3802_s1 + $0x48] sm:$0xff] (!%p148_p2)   ;;  %vm3497_vm5 = vmor (!%p148_p2), %vm726_vm3, %vm727_vm4 }
   0xc   : > { %3013 = vmatpush3.bf16.msra.mxu0 (!%p148_p2), %v3230_v3  ;;  %2918 = vmatprep.subr.bf16.mxu1 (!%p148_p2), %v3231_v4  ;;  %v3248_v3 = vld [vmem:[%s3802_s1 + $0x148] sm:$0xff] (!%p148_p2)  }
   0xd   : > { %s3810_s13 = smov (!%p176_p3, %s2452_s13), 1  ;;  %3014 = vmatprep.subr.bf16.mxu0 %v3232_v5 }
   0xe   : > { %s3218_s30 = smul.u32 80, %s3810_s13 }
   0xf   : > { %2919 = vmatpush3.bf16.msra.mxu1 %v3231_v4 }
  0x10   : > { %3015 = vmatpush3.bf16.msra.mxu0 %v3232_v5  ;;  %2920 = vmatprep.subr.bf16.mxu1 %v3233_v6  ;;  %s3386_s14 = scalar_lea.vmem %s3801_s0, %s3218_s30  ;;  %v3249_v5 = vld [vmem:[%s3802_s1 + $0x50] sm:$0xff]  }
  0x11   : > { %3016 = vmatprep.subr.bf16.mxu0 %v3234_v7  ;;  %v3243_v11 = vld [vmem:[%s3386_s14] ss:$8 sps:$4 sm:$0xff]   ;;  %v2575_v14 = vld [vmem:[%s3386_s14 + $0xc] sm:$0x1]  ;;  %v2576_v15 = vld [vmem:[%s3386_s14 + $0x10] sm:$0xf] }
  0x12   : > { %2930 = vmatprep.mubr.bf16.mxu1 %v3243_v11  ;;  %v2574_v13 = vld [vmem:[%s3386_s14 + $0x8] sm:$0xf]  ;;  %v2577_v19 = vld [vmem:[%s3386_s14 + $0x14] sm:$0x1]  ;;  %v1144_v20 = vshll.u32 %v2575_v14, 16  ;;  %v1149_v21 = vshrl.u32 %v2576_v15, 16 }
  0x13   : > { %2921 = vmatpush3.bf16.msra.mxu1 %v3233_v6  ;;  %v1135_v16 = vshrl.u32 %v2574_v13, 16  ;;  %v1138_v17 = vshll.u32 %v2574_v13, 16  ;;  %v1152_v22 = vshll.u32 %v2576_v15, 16  ;;  %v1158_v26 = vshll.u32 %v2577_v19, 16  ;;  %v2578_v36 = vld [vmem:[%s3386_s14 + $0x18] sm:$0xf] }
  0x14   : > { %3017 = vmatpush3.bf16.msra.mxu0 %v3234_v7  ;;  %2922 = vmatprep.subr.bf16.mxu1 %v3235_v8  ;;  %v1151_v28 = vrot.slane %v1149_v21, 4  ;;  %v1146_v32 = vrot.slane %v1144_v20, 5  ;;  %v2579_v37 = vld [vmem:[%s3386_s14 + $0x1c] sm:$0x1]  ;;  %v2580_v39 = vld [vmem:[%s3386_s14 + $0x20] sm:$0xf] }
  0x15   : > { %3018 = vmatprep.subr.bf16.mxu0 %v3236_v9  ;;  %v1137_v24 = vrot.slane %v1135_v16, 4  ;;  %v1140_v25 = vrot.slane %v1138_v17, 5  ;;  %v1154_v29 = vrot.slane %v1152_v22, 5  ;;  %v1160_v35 = vrot.slane %v1158_v26, 5  ;;  %v2581_v40 = vld [vmem:[%s3386_s14 + $0x24] sm:$0x1] }
  0x16   : > { %v1163_v41 = vshrl.u32 %v2578_v36, 16  ;;  %v1166_v43 = vshll.u32 %v2578_v36, 16  ;;  %v1172_v44 = vshll.u32 %v2579_v37, 16  ;;  %v1177_v45 = vshrl.u32 %v2580_v39, 16  ;;  %v3246_v53 = vld [vmem:[%s3386_s14 + $0x10] ss:$8 sps:$4 sm:$0xff]  }
  0x17   : > { %2923 = vmatpush3.bf16.msra.mxu1 %v3235_v8  ;;  %v1141_v31 = vor.u32 %v1140_v25, %v1137_v24  ;;  %v1155_v34 = vor.u32 %v1154_v29, %v1151_v28  ;;  %v1180_v49 = vshll.u32 %v2580_v39, 16  ;;  %v1186_v50 = vshll.u32 %v2581_v40, 16  ;;  %v3257_v6 = vld [vmem:[%s3386_s14 + $0x20] ss:$8 sps:$4 sm:$0xff]   ;;  %v3250_v7 = vld [vmem:[%s3802_s1 + $0x150] sm:$0xff]   ;;  %v3251_v8 = vld [vmem:[%s3802_s1 + $0x58] sm:$0xff]  }
  0x18   : > { %3019 = vmatpush3.bf16.msra.mxu0 %v3236_v9  ;;  %2924 = vmatprep.subr.bf16.mxu1 %v3237_v10  ;;  %v1165_v48 = vrot.slane %v1163_v41, 4  ;;  %v1168_v54 = vrot.slane %v1166_v43, 5  ;;  %v1174_v55 = vrot.slane %v1172_v44, 5  ;;  %v1179_v56 = vrot.slane %v1177_v45, 4  ;;  %v2582_v9 = vld [vmem:[%s3386_s14 + $0x28] sm:$0xf] }
  0x19   : > { %3020 = vmatprep.subr.bf16.mxu0 %v3238_v12  ;;  %v1142_v38 = vrot.slane %v1141_v31, 4  ;;  %v1156_v42 = vrot.slane %v1155_v34, 4  ;;  %v1182_v58 = vrot.slane %v1180_v49, 5  ;;  %v1188_v59 = vrot.slane %v1186_v50, 5  ;;  %v2584_v11 = vld [vmem:[%s3386_s14 + $0x30] sm:$0xf] }
  0x1a   : > { %v1169_v60 = vor.u32 %v1168_v54, %v1165_v48  ;;  %v1191_v13 = vshrl.u32 %v2582_v9, 16  ;;  %v1194_v14 = vshll.u32 %v2582_v9, 16  ;;  %v1205_v16 = vshrl.u32 %v2584_v11, 16  ;;  %v3252_v19 = vld [vmem:[%s3802_s1 + $0x158] sm:$0xff]   ;;  %v3253_v20 = vld [vmem:[%s3802_s1 + $0x60] sm:$0xff]  }
  0x1b   : > { %2925 = vmatpush3.bf16.msra.mxu1 %v3237_v10  ;;  %v1147_v47 = vsel %vm3410_vm2, %v1142_v38, %v1146_v32  ;;  %v1161_v51 = vsel %vm3410_vm2, %v1156_v42, %v1160_v35  ;;  %v1183_v61 = vor.u32 %v1182_v58, %v1179_v56  ;;  %v2583_v10 = vld [vmem:[%s3386_s14 + $0x2c] sm:$0x1]  ;;  %v1208_v17 = vshll.u32 %v2584_v11, 16  ;;  %v2586_v29 = vld [vmem:[%s3386_s14 + $0x38] sm:$0xf]  ;;  %v3254_v38 = vld [vmem:[%s3802_s1 + $0x160] sm:$0xff]  }
  0x1c   : > { %3021 = vmatpush3.bf16.msra.mxu0 %v3238_v12  ;;  %2926 = vmatprep.subr.bf16.mxu1 %v3239_v18  ;;  %v2606_v57 = vcombine.low %v1147_v47, %v1161_v51  ;;  %v1170_v62 = vrot.slane %v1169_v60, 4  ;;  %v2585_v12 = vld [vmem:[%s3386_s14 + $0x34] sm:$0x1]  ;;  %v1200_v15 = vshll.u32 %v2583_v10, 16  ;;  %v1193_v21 = vrot.slane %v1191_v13, 4  ;;  %v3255_v47 = vld [vmem:[%s3802_s1 + $0x68] sm:$0xff]  }
  0x1d   : > { %3022 = vmatprep.subr.bf16.mxu0 %v3240_v23  ;;  %v1184_v0 = vrot.slane %v1183_v61, 4  ;;  %v1196_v22 = vrot.slane %v1194_v14, 5  ;;  %v1207_v24 = vrot.slane %v1205_v16, 4  ;;  %v1210_v25 = vrot.slane %v1208_v17, 5  ;;  %v2588_v31 = vld [vmem:[%s3386_s14 + $0x40] sm:$0xf] }
  0x1e   : > { %3026 = vmatprep.mubr.bf16.mxu0 %v2606_v57  ;;  %v1175_v1 = vsel %vm3410_vm2, %v1170_v62, %v1174_v55  ;;  %v2589_v34 = vld [vmem:[%s3386_s14 + $0x44] sm:$0x1]  ;;  %v1219_v35 = vshrl.u32 %v2586_v29, 16  ;;  %v1222_v36 = vshll.u32 %v2586_v29, 16  ;;  %v1233_v40 = vshrl.u32 %v2588_v31, 16  ;;  %v3256_v56 = vld [vmem:[%s3802_s1 + $0x168] sm:$0xff]  }
  0x1f   : > { %2927 = vmatpush3.bf16.msra.mxu1 %v3239_v18  ;;  %v1189_v2 = vsel %vm3410_vm2, %v1184_v0, %v1188_v59  ;;  %v1214_v18 = vshll.u32 %v2585_v12, 16  ;;  %v1197_v28 = vor.u32 %v1196_v22, %v1193_v21  ;;  %v1211_v32 = vor.u32 %v1210_v25, %v1207_v24  ;;  %v393_v54 = vld [vmem:[%s3386_s14] sm:$0xf]  ;;  %v394_v55 = vld [vmem:[%s3386_s14 + $0x4] sm:$0x1]  ;;  %v3258_v57 = vld [vmem:[%s3802_s1 + $0x70] sm:$0xff]  }
  0x20   : > { %3023 = vmatpush3.bf16.msra.mxu0 %v3240_v23  ;;  %2928 = vmatprep.subr.bf16.mxu1 %v3241_v27  ;;  %v2607_v4 = vcombine.low %v1175_v1, %v1189_v2  ;;  %v1202_v23 = vrot.slane %v1200_v15, 5  ;;  %v1236_v41 = vshll.u32 %v2588_v31, 16  ;;  %v1242_v42 = vshll.u32 %v2589_v34, 16  ;;  %v395_v60 = vld [vmem:[%s3386_s14 + $0x8] sm:$0xf]  ;;  %v3259_v13 = vld [vmem:[%s3802_s1 + $0x170] sm:$0xff]  }
  0x21   : > { %3024 = vmatprep.subr.bf16.mxu0 %v3242_v30  ;;  %v1216_v26 = vrot.slane %v1214_v18, 5  ;;  %v1198_v39 = vrot.slane %v1197_v28, 4  ;;  %v1212_v43 = vrot.slane %v1211_v32, 4  ;;  %v1221_v44 = vrot.slane %v1219_v35, 4  ;;  %v396_v61 = vld [vmem:[%s3386_s14 + $0xc] sm:$0x1] }
  0x22   : > { %v1224_v45 = vrot.slane %v1222_v36, 5  ;;  %v1235_v49 = vrot.slane %v1233_v40, 4  ;;  %v1238_v50 = vrot.slane %v1236_v41, 5  ;;  %v1244_v51 = vrot.slane %v1242_v42, 5  ;;  %v2618_v12 = vld [vmem:[%s3386_s14 + $0x8] sm:$0xe] }
  0x23   : > { %2929 = vmatpush3.bf16.msra.mxu1 %v3241_v27  ;;  %v3260_v27 = vld [vmem:[%s3386_s14 + $0x30] ss:$8 sps:$4 sm:$0xff]   ;;  %v1203_v48 = vsel %vm3410_vm2, %v1198_v39, %v1202_v23  ;;  %v413_v62 = vshrl.u32 %v393_v54, 16  ;;  %v422_v1 = vshll.u32 %v394_v55, 16  ;;  %v427_v2 = vshrl.u32 %v395_v60, 16 }
  0x24   : > { %3025 = vmatpush3.bf16.msra.mxu0 %v3242_v30  ;;  %2938 = vmatprep.subr.bf16.mxu1 %v3244_v46  ;;  %v2587_v30 = vld [vmem:[%s3386_s14 + $0x3c] sm:$0x1]  ;;  %v1239_v59 = vor.u32 %v1238_v50, %v1235_v49  ;;  %v2634_v21 = vrot.slane %v2618_v12, 9  ;;  %v2621_v24 = vld [vmem:[%s3386_s14 + $0x14] sm:$0x1]  ;;  %v3263_v50 = vld [vmem:[%s3802_s1 + $0x80] sm:$0xff]  }
  0x25   : > { %3034 = vmatprep.subr.bf16.mxu0 %v3245_v52  ;;  %v1228_v37 = vshll.u32 %v2587_v30, 16  ;;  %v424_v9 = vrot.slane %v422_v1, 5  ;;  %v429_v10 = vrot.slane %v427_v2, 4  ;;  %v3261_v15 = vld [vmem:[%s3802_s1 + $0x78] sm:$0xff]   ;;  %v1454_v28 = vrot.slane %v2621_v24, 5  ;;  %v3267_v12 = vld [vmem:[%s3802_s1 + $0x90] sm:$0xff]  }
  0x26   : > { %2931 = vmatmul.mubr.bf16.vlgmr.msra.gmra.mrb[0].mxu1 %v3246_v53  ;;  %v1225_v53 = vor.u32 %v1224_v45, %v1221_v44  ;;  %v397_v29 = vld [vmem:[%s3386_s14 + $0x10] sm:$0xf]  ;;  %v398_v32 = vld [vmem:[%s3386_s14 + $0x14] sm:$0x1]  ;;  %v399_v34 = vld [vmem:[%s3386_s14 + $0x18] sm:$0xf] }
  0x27   : > { %2939 = vmatpush3.bf16.msra.mxu1 %v3244_v46  ;;  %3027 = vmatmul.mubr.bf16.vlgmr.msra.gmra.mrb[0].mxu0 %v2607_v4  ;;  %v1230_v46 = vrot.slane %v1228_v37, 5  ;;  %v1240_v4 = vrot.slane %v1239_v59, 4  ;;  %v441_v35 = vshrl.u32 %v397_v29, 16  ;;  %v3262_v36 = vld [vmem:[%s3802_s1 + $0x178] sm:$0xff]   ;;  %v444_v40 = vshll.u32 %v397_v29, 16 }
  0x28   : > { %2940 = vmatprep.subr.bf16.mxu1 %v3247_v63  ;;  %3035 = vmatpush3.bf16.msra.mxu0 %v3245_v52  ;;  %v1217_v52 = vsel %vm3410_vm2, %v1212_v43, %v1216_v26  ;;  %v1226_v0 = vrot.slane %v1225_v53, 4  ;;  %v400_v39 = vld [vmem:[%s3386_s14 + $0x1c] sm:$0x1]  ;;  %v450_v41 = vshll.u32 %v398_v32, 16  ;;  %v2622_v42 = vld [vmem:[%s3386_s14 + $0x18] sm:$0xe] }
  0x29   : > { %3036 = vmatprep.subr.bf16.mxu0 %v3248_v3  ;;  %2934 = vmatprep.mubr.bf16.mxu1 %v3257_v6  ;;  %v2608_v58 = vcombine.low %v1203_v48, %v1217_v52  ;;  %v1245_v14 = vsel %vm3410_vm2, %v1240_v4, %v1244_v51  ;;  %v443_v45 = vrot.slane %v441_v35, 4  ;;  %v2624_v48 = vld [vmem:[%s3386_s14 + $0x20] sm:$0xe]  ;;  %v446_v51 = vrot.slane %v444_v40, 5  ;;  %v2626_v29 = vld [vmem:[%s3386_s14 + $0x28] sm:$0xe] }
  0x2a   : > { %v452_v52 = vrot.slane %v450_v41, 5  ;;  %v458_v53 = vshll.u32 %v399_v34, 16  ;;  %v2627_v32 = vld [vmem:[%s3386_s14 + $0x2c] sm:$0x1]  ;;  %v3269_v35 = vld [vmem:[%s3802_s1 + $0x98] sm:$0xff]  }
  0x2b   : > { %2941 = vmatpush3.bf16.msra.mxu1 %v3247_v63  ;;  %v416_v63 = vshll.u32 %v393_v54, 16  ;;  %3030 = vmatprep.mubr.bf16.mxu0 %v2608_v58  ;;  %v2625_v54 = vld [vmem:[%s3386_s14 + $0x24] sm:$0x1]  ;;  %v447_v59 = vor.u32 %v446_v51, %v443_v45  ;;  %v2761_v33 = vld [vmem:[%s3386_s14 + $0x3c] sm:$0x1] }
  0x2c   : > { %2942 = vmatprep.subr.bf16.mxu1 %v3249_v5  ;;  %3037 = vmatpush3.bf16.msra.mxu0 %v3248_v3  ;;  %v430_v3 = vshll.u32 %v395_v60, 16  ;;  %v460_v60 = vrot.slane %v458_v53, 5  ;;  %v3272_v45 = vld [vmem:[%s3802_s1 + $0x1a0] sm:$0xff]   ;;  %v408_v53 = vld [vmem:[%s3386_s14 + $0x3c] sm:$0x1] }
  0x2d   : > { %3038 = vmatprep.subr.bf16.mxu0 %v3250_v7  ;;  %v418_v6 = vrot.slane %v416_v63, 5  ;;  %v3264_v63 = vld [vmem:[%s3802_s1 + $0x180] sm:$0xff]   ;;  %v448_v1 = vrot.slane %v447_v59, 4  ;;  %v2630_v59 = vld [vmem:[%s3386_s14 + $0x38] sm:$0xe] }
  0x2e   : > { %2935 = vmatmul.mubr.bf16.gmra.mrb[4].mxu1 %v3260_v27  ;;  %v432_v11 = vrot.slane %v430_v3, 5 }
  0x2f   : > { %2943 = vmatpush3.bf16.msra.mxu1 %v3249_v5  ;;  %v415_v5 = vrot.slane %v413_v62, 4  ;;  %v1462_v62 = vrot.slane %v2625_v54, 5 }
  0x30   : > { %2944 = vmatprep.subr.bf16.mxu1 %v3251_v8  ;;  %3039 = vmatpush3.bf16.msra.mxu0 %v3250_v7  ;;  %v436_v7 = vshll.u32 %v396_v61, 16  ;;  %v433_v23 = vor.u32 %v432_v11, %v429_v10  ;;  %v2637_v61 = vrot.slane %v2624_v48, 9  ;;  %v3265_v11 = vld [vmem:[%s3802_s1 + $0x88] sm:$0xff]   ;;  %v405_v48 = vld [vmem:[%s3386_s14 + $0x30] sm:$0xf] }
  0x31   : > { %3040 = vmatprep.subr.bf16.mxu0 %v3252_v19  ;;  %v419_v16 = vor.u32 %v418_v6, %v415_v5  ;;  %v453_v5 = vsel %vm3410_vm2, %v448_v1, %v452_v52  ;;  %v407_v52 = vld [vmem:[%s3386_s14 + $0x38] sm:$0xf]  ;;  %v497_v54 = vshrl.u32 %v405_v48, 16  ;;  %v2632_v1 = vld [vmem:[%s3386_s14 + $0x40] sm:$0xe] }
  0x32   : > { %v438_v17 = vrot.slane %v436_v7, 5  ;;  %v434_v30 = vrot.slane %v433_v23, 4  ;;  %v1463_v4 = vsel %vm3497_vm5, %v2637_v61, %v1462_v62 }
  0x33   : > { %2945 = vmatpush3.bf16.msra.mxu1 %v3251_v8  ;;  %v1231_v8 = vsel %vm3410_vm2, %v1226_v0, %v1230_v46  ;;  %v420_v27 = vrot.slane %v419_v16, 4  ;;  %v455_v46 = vshrl.u32 %v399_v34, 16  ;;  %v403_v16 = vld [vmem:[%s3386_s14 + $0x28] sm:$0xf]  ;;  %v2628_v34 = vld [vmem:[%s3386_s14 + $0x30] sm:$0xe] }
  0x34   : > { %2946 = vmatprep.subr.bf16.mxu1 %v3253_v20  ;;  %3041 = vmatpush3.bf16.msra.mxu0 %v3252_v19  ;;  %v2619_v19 = vld [vmem:[%s3386_s14 + $0xc] sm:$0x1]  ;;  %v2609_v22 = vcombine.low %v1231_v8, %v1245_v14  ;;  %v439_v43 = vsel %vm3410_vm2, %v434_v30, %v438_v17  ;;  %v401_v14 = vld [vmem:[%s3386_s14 + $0x20] sm:$0xf]  ;;  %v486_v23 = vshll.u32 %v403_v16, 16  ;;  %v2639_v40 = vrot.slane %v2628_v34, 9 }
  0x35   : > { %3042 = vmatprep.subr.bf16.mxu0 %v3254_v38  ;;  %v1450_v25 = vrot.slane %v2619_v19, 5  ;;  %v425_v37 = vsel %vm3410_vm2, %v420_v27, %v424_v9  ;;  %v457_v55 = vrot.slane %v455_v46, 4  ;;  %v3266_v9 = vld [vmem:[%s3802_s1 + $0x188] sm:$0xff]   ;;  %v469_v19 = vshrl.u32 %v401_v14, 16 }
  0x36   : > { %3031 = vmatmul.mubr.bf16.gmra.mrb[4].mxu0 %v2609_v22  ;;  %v2490_v49 = vcombine.low %v425_v37, %v439_v43  ;;  %v404_v17 = vld [vmem:[%s3386_s14 + $0x2c] sm:$0x1]  ;;  %v483_v22 = vshrl.u32 %v403_v16, 16  ;;  %v2629_v37 = vld [vmem:[%s3386_s14 + $0x34] sm:$0x1]  ;;  %v499_v62 = vrot.slane %v497_v54, 4 }
  0x37   : > { %2947 = vmatpush3.bf16.msra.mxu1 %v3253_v20  ;;  %v2620_v20 = vld [vmem:[%s3386_s14 + $0x10] sm:$0xe]  ;;  %v1451_v31 = vsel %vm3497_vm5, %v2634_v21, %v1450_v25  ;;  %v461_v2 = vor.u32 %v460_v60, %v457_v55  ;;  %v492_v24 = vshll.u32 %v404_v17, 16  ;;  %v3270_v25 = vld [vmem:[%s3802_s1 + $0x198] sm:$0xff]   ;;  %v1470_v43 = vrot.slane %v2629_v37, 5 }
  0x38   : > { %2948 = vmatprep.subr.bf16.mxu1 %v3255_v47  ;;  %3043 = vmatpush3.bf16.msra.mxu0 %v3254_v38  ;;  %v2635_v26 = vrot.slane %v2620_v20, 9  ;;  %v472_v20 = vshll.u32 %v401_v14, 16  ;;  %v2631_v60 = vld [vmem:[%s3386_s14 + $0x3c] sm:$0x1] }
  0x39   : > { %3044 = vmatprep.subr.bf16.mxu0 %v3256_v56  ;;  %2954 = vmatprep.mubr.bf16.mxu1 %v2490_v49  ;;  %v462_v6 = vrot.slane %v461_v2, 4  ;;  %v406_v49 = vld [vmem:[%s3386_s14 + $0x34] sm:$0x1]  ;;  %v1471_v51 = vsel %vm3497_vm5, %v2639_v40, %v1470_v43  ;;  %v3274_v2 = vld [vmem:[%s3802_s1 + $0x1a8] sm:$0xff]   ;;  %v3278_v37 = vld [vmem:[%s3802_s1 + $0x1b8] sm:$0xff]  }
  0x3a   : > { %v1455_v38 = vsel %vm3497_vm5, %v2635_v26, %v1454_v28  ;;  %v471_v26 = vrot.slane %v469_v19, 4  ;;  %v474_v27 = vrot.slane %v472_v20, 5  ;;  %v485_v28 = vrot.slane %v483_v22, 4  ;;  %v694_v20 = vld [vmem:[%s3386_s14] sm:$0xe] }
  0x3b   : > { %2949 = vmatpush3.bf16.msra.mxu1 %v3255_v47  ;;  %v2658_v44 = vcombine.low %v1451_v31, %v1455_v38  ;;  %v2623_v47 = vld [vmem:[%s3386_s14 + $0x1c] sm:$0x1]  ;;  %v488_v31 = vrot.slane %v486_v23, 5  ;;  %v2638_v38 = vrot.slane %v2626_v29, 9  ;;  %v695_v23 = vld [vmem:[%s3386_s14 + $0x4] sm:$0x1] }
  0x3c   : > { %2950 = vmatprep.subr.bf16.mxu1 %v3258_v57  ;;  %3045 = vmatpush3.bf16.msra.mxu0 %v3256_v56  ;;  %v464_v56 = vshll.u32 %v400_v39, 16  ;;  %v1458_v58 = vrot.slane %v2623_v47, 5  ;;  %v1466_v39 = vrot.slane %v2627_v32, 5  ;;  %v697_v29 = vld [vmem:[%s3386_s14 + $0xc] sm:$0x1]  ;;  %v3275_v32 = vld [vmem:[%s3802_s1 + $0xb0] sm:$0xff]  }
  0x3d   : > { %3046 = vmatprep.subr.bf16.mxu0 %v3259_v13  ;;  %3050 = vmatprep.mubr.bf16.mxu0 %v2658_v44  ;;  %v489_v41 = vor.u32 %v488_v31, %v485_v28  ;;  %v3271_v44 = vld [vmem:[%s3802_s1 + $0xa0] sm:$0xff]   ;;  %v698_v43 = vld [vmem:[%s3386_s14 + $0x10] sm:$0xe] }
  0x3e   : > { %v466_v3 = vrot.slane %v464_v56, 5  ;;  %v1467_v47 = vsel %vm3497_vm5, %v2638_v38, %v1466_v39  ;;  %v3280_v39 = vld [vmem:[%s3386_s14 + $0x10] ss:$8 sps:$4 sm:$0xff]  }
  0x3f   : > { %2951 = vmatpush3.bf16.msra.mxu1 %v3258_v57  ;;  %v2636_v57 = vrot.slane %v2622_v42, 9  ;;  %v494_v42 = vrot.slane %v492_v24, 5  ;;  %v2660_v56 = vcombine.low %v1467_v47, %v1471_v51  ;;  %v696_v24 = vld [vmem:[%s3386_s14 + $0x8] sm:$0xe]  ;;  %v701_v47 = vld [vmem:[%s3386_s14 + $0x1c] sm:$0x1] }
  0x40   : > { %2952 = vmatprep.subr.bf16.mxu1 %v3261_v15  ;;  %3047 = vmatpush3.bf16.msra.mxu0 %v3259_v13  ;;  %v467_v8 = vsel %vm3410_vm2, %v462_v6, %v466_v3  ;;  %v3268_v13 = vld [vmem:[%s3802_s1 + $0x190] sm:$0xff]   ;;  %v520_v6 = vshll.u32 %v408_v53, 16  ;;  %v2503_v31 = vrot.slane %v696_v24, 9  ;;  %v743_v51 = vrot.slane %v701_v47, 5  ;;  %v3279_v53 = vld [vmem:[%s3802_s1 + $0xc0] sm:$0xff]  }
  0x41   : > { %v1459_v0 = vsel %vm3497_vm5, %v2636_v57, %v1458_v58  ;;  %3048 = vmatprep.subr.bf16.mxu0 %v3262_v36  ;;  %v2491_v10 = vcombine.low %v453_v5, %v467_v8  ;;  %v500_v57 = vshll.u32 %v405_v48, 16  ;;  %v506_v58 = vshll.u32 %v406_v49, 16  ;;  %v2710_v47 = vld [vmem:[%s3386_s14 + $0x20] sm:$0xf] }
  0x42   : > { %v2659_v7 = vcombine.low %v1459_v0, %v1463_v4  ;;  %v514_v0 = vshll.u32 %v407_v52, 16  ;;  %v522_v14 = vrot.slane %v520_v6, 5  ;;  %v2504_v48 = vrot.slane %v698_v43, 9  ;;  %v3288_v6 = vld [vmem:[%s3802_s1 + $0x1d8] sm:$0xff]  }
  0x43   : > { %2953 = vmatpush3.bf16.msra.mxu1 %v3261_v15  ;;  %v402_v15 = vld [vmem:[%s3386_s14 + $0x24] sm:$0x1]  ;;  %v502_v4 = vrot.slane %v500_v57, 5  ;;  %v508_v5 = vrot.slane %v506_v58, 5  ;;  %v3284_v58 = vld [vmem:[%s3802_s1 + $0x1c8] sm:$0xff]  }
  0x44   : > { %2962 = vmatprep.subr.bf16.mxu1 %v3263_v50  ;;  %3049 = vmatpush3.bf16.msra.mxu0 %v3262_v36  ;;  %v478_v21 = vshll.u32 %v402_v15, 16  ;;  %v475_v36 = vor.u32 %v474_v27, %v471_v26  ;;  %v2641_v15 = vrot.slane %v2632_v1, 9  ;;  %v3276_v26 = vld [vmem:[%s3802_s1 + $0x1b0] sm:$0xff]   ;;  %v705_v1 = vld [vmem:[%s3386_s14 + $0x2c] sm:$0x1] }
  0x45   : > { %3058 = vmatprep.subr.bf16.mxu0 %v3264_v63 }
  0x46   : > { %2955 = vmatmul.mubr.bf16.vlgmr.msra.gmra.mrb[0].mxu1 %v2491_v10  ;;  %v480_v30 = vrot.slane %v478_v21, 5  ;;  %v476_v46 = vrot.slane %v475_v36, 4  ;;  %v2640_v10 = vrot.slane %v2630_v59, 9  ;;  %v3283_v59 = vld [vmem:[%s3802_s1 + $0xc8] sm:$0xff]  }
  0x47   : > { %3051 = vmatmul.mubr.bf16.vlgmr.msra.gmra.mrb[0].mxu0 %v2659_v7  ;;  %2963 = vmatpush3.bf16.msra.mxu1 %v3263_v50  ;;  %v490_v50 = vrot.slane %v489_v41, 4  ;;  %v2633_v7 = vld [vmem:[%s3386_s14 + $0x44] sm:$0x1]  ;;  %v3277_v41 = vld [vmem:[%s3802_s1 + $0xb8] sm:$0xff]  }
  0x48   : > { %3059 = vmatpush3.bf16.msra.mxu0 %v3264_v63  ;;  %2964 = vmatprep.subr.bf16.mxu1 %v3265_v11  ;;  %v481_v55 = vsel %vm3410_vm2, %v476_v46, %v480_v30  ;;  %v511_v63 = vshrl.u32 %v407_v52, 16  ;;  %v1478_v16 = vrot.slane %v2633_v7, 5  ;;  %v731_v30 = vrot.slane %v695_v23, 5  ;;  %v700_v46 = vld [vmem:[%s3386_s14 + $0x18] sm:$0xe]  ;;  %v3281_v52 = vld [vmem:[%s3802_s1 + $0x1c0] sm:$0xff]  }
  0x49   : > { %3060 = vmatprep.subr.bf16.mxu0 %v3266_v9  ;;  %v495_v61 = vsel %vm3410_vm2, %v490_v50, %v494_v42  ;;  %3054 = vmatprep.mubr.bf16.mxu0 %v2660_v56  ;;  %v2505_v50 = vrot.slane %v700_v46, 9  ;;  %v3282_v56 = vld [vmem:[%s3386_s14 + $0x20] ss:$8 sps:$4 sm:$0xff]  }
  0x4a   : > { %v2492_v3 = vcombine.low %v481_v55, %v495_v61  ;;  %v513_v8 = vrot.slane %v511_v63, 4  ;;  %v1479_v22 = vsel %vm3497_vm5, %v2641_v15, %v1478_v16  ;;  %v3286_v61 = vld [vmem:[%s3802_s1 + $0x1d0] sm:$0xff]   ;;  %v703_v63 = vld [vmem:[%s3386_s14 + $0x24] sm:$0x1]  ;;  %v3295_v23 = vld [vmem:[%s3386_s14 + $0x40] ss:$8 sps:$4 sm:$0xff]  }
  0x4b   : > { %2965 = vmatpush3.bf16.msra.mxu1 %v3265_v11  ;;  %v1474_v11 = vrot.slane %v2631_v60, 5  ;;  %v744_v55 = vsel %vm3497_vm5, %v2505_v50, %v743_v51  ;;  %v3285_v60 = vld [vmem:[%s3802_s1 + $0xd0] sm:$0xff]   ;;  %v2711_v50 = vld [vmem:[%s3386_s14 + $0x24] sm:$0x1]  ;;  %v2712_v51 = vld [vmem:[%s3386_s14 + $0x28] sm:$0xf] }
  0x4c   : > { %3061 = vmatpush3.bf16.msra.mxu0 %v3266_v9  ;;  %2966 = vmatprep.subr.bf16.mxu1 %v3267_v12  ;;  %v516_v9 = vrot.slane %v514_v0, 5  ;;  %v704_v0 = vld [vmem:[%s3386_s14 + $0x28] sm:$0xe] }
  0x4d   : > { %3062 = vmatprep.subr.bf16.mxu0 %v3268_v13  ;;  %2958 = vmatprep.mubr.bf16.mxu1 %v2492_v3  ;;  %v1475_v19 = vsel %vm3497_vm5, %v2640_v10, %v1474_v11  ;;  %v747_v3 = vrot.slane %v703_v63, 5  ;;  %v707_v10 = vld [vmem:[%s3386_s14 + $0x34] sm:$0x1] }
  0x4e   : > { %v517_v17 = vor.u32 %v516_v9, %v513_v8  ;;  %v2661_v28 = vcombine.low %v1475_v19, %v1479_v22  ;;  %v3293_v8 = vld [vmem:[%s3386_s14 + $0x30] ss:$8 sps:$4 sm:$0xff]   ;;  %v755_v15 = vrot.slane %v707_v10, 5 }
  0x4f   : > { %2967 = vmatpush3.bf16.msra.mxu1 %v3267_v12  ;;  %v3273_v12 = vld [vmem:[%s3802_s1 + $0xa8] sm:$0xff]   ;;  %v706_v9 = vld [vmem:[%s3386_s14 + $0x30] sm:$0xe] }
  0x50   : > { %3063 = vmatpush3.bf16.msra.mxu0 %v3268_v13  ;;  %2968 = vmatprep.subr.bf16.mxu1 %v3269_v35  ;;  %v503_v13 = vor.u32 %v502_v4, %v499_v62  ;;  %v518_v27 = vrot.slane %v517_v17, 4  ;;  %v702_v62 = vld [vmem:[%s3386_s14 + $0x20] sm:$0xe]  ;;  %v2507_v4 = vrot.slane %v704_v0, 9 }
  0x51   : > { %3064 = vmatprep.subr.bf16.mxu0 %v3270_v25  ;;  %3055 = vmatmul.mubr.bf16.gmra.mrb[4].mxu0 %v2661_v28  ;;  %v3299_v28 = vld [vmem:[%s3386_s14 + $0x8] ss:$8 sps:$4 sm:$0xff]  }
  0x52   : > { %v504_v21 = vrot.slane %v503_v13, 4  ;;  %v523_v36 = vsel %vm3410_vm2, %v518_v27, %v522_v14  ;;  %3074 = vmatprep.mubr.bf16.mxu0 %v3280_v39  ;;  %v709_v13 = vld [vmem:[%s3386_s14 + $0x3c] sm:$0x1]  ;;  %v2508_v14 = vrot.slane %v706_v9, 9  ;;  %v3292_v27 = vld [vmem:[%s3802_s1 + $0x1e8] sm:$0xff]  }
  0x53   : > { %2969 = vmatpush3.bf16.msra.mxu1 %v3269_v35  ;;  %v735_v35 = vrot.slane %v697_v29, 5  ;;  %v759_v19 = vrot.slane %v709_v13, 5  ;;  %v2706_v29 = vld [vmem:[%s3386_s14 + $0x10] sm:$0xf]  ;;  %v2715_v13 = vld [vmem:[%s3386_s14 + $0x34] sm:$0x1] }
  0x54   : > { %3065 = vmatpush3.bf16.msra.mxu0 %v3270_v25  ;;  %2970 = vmatprep.subr.bf16.mxu1 %v3271_v44  ;;  %v2502_v25 = vrot.slane %v694_v20, 9  ;;  %v509_v34 = vsel %vm3410_vm2, %v504_v21, %v508_v5  ;;  %v751_v5 = vrot.slane %v705_v1, 5  ;;  %v3287_v20 = vld [vmem:[%s3802_s1 + $0xd8] sm:$0xff]   ;;  %v756_v21 = vsel %vm3497_vm5, %v2508_v14, %v755_v15 }
  0x55   : > { %3066 = vmatprep.subr.bf16.mxu0 %v3272_v45  ;;  %v2493_v40 = vcombine.low %v509_v34, %v523_v36  ;;  %v736_v42 = vsel %vm3497_vm5, %v2503_v31, %v735_v35  ;;  %v2708_v31 = vld [vmem:[%s3386_s14 + $0x18] sm:$0xf]  ;;  %v1854_v34 = vshrl.u32 %v2706_v29, 16  ;;  %v1857_v35 = vshll.u32 %v2706_v29, 16 }
  0x56   : > { %v732_v38 = vsel %vm3497_vm5, %v2502_v25, %v731_v30  ;;  %v752_v11 = vsel %vm3497_vm5, %v2507_v4, %v751_v5  ;;  %v3290_v25 = vld [vmem:[%s3802_s1 + $0x1e0] sm:$0xff]   ;;  %v2707_v30 = vld [vmem:[%s3386_s14 + $0x14] sm:$0x1]  ;;  %v3297_v1 = vld [vmem:[%s3802_s1 + $0xf8] sm:$0xff]  }
  0x57   : > { %2971 = vmatpush3.bf16.msra.mxu1 %v3271_v44  ;;  %v2526_v44 = vcombine.low %v732_v38, %v736_v42  ;;  %v1863_v36 = vshll.u32 %v2707_v30, 16  ;;  %v1871_v38 = vshll.u32 %v2708_v31, 16  ;;  %v1859_v42 = vrot.slane %v1857_v35, 5  ;;  %v2716_v14 = vld [vmem:[%s3386_s14 + $0x38] sm:$0xf] }
  0x58   : > { %3067 = vmatpush3.bf16.msra.mxu0 %v3272_v45  ;;  %2972 = vmatprep.subr.bf16.mxu1 %v3273_v12  ;;  %v699_v45 = vld [vmem:[%s3386_s14 + $0x14] sm:$0x1]  ;;  %v3300_v30 = vld [vmem:[%s3386_s14 + $0x18] ss:$8 sps:$4 sm:$0xff]  }
  0x59   : > { %3068 = vmatprep.subr.bf16.mxu0 %v3274_v2  ;;  %2959 = vmatmul.mubr.bf16.gmra.mrb[4].mxu1 %v2493_v40  ;;  %v739_v49 = vrot.slane %v699_v45, 5  ;;  %v3291_v40 = vld [vmem:[%s3802_s1 + $0xe8] sm:$0xff]   ;;  %v1865_v43 = vrot.slane %v1863_v36, 5  ;;  %v1873_v45 = vrot.slane %v1871_v38, 5  ;;  %v2718_v38 = vld [vmem:[%s3386_s14 + $0x40] sm:$0xf] }
  0x5a   : > { %2978 = vmatprep.mubr.bf16.mxu1 %v2526_v44 }
  0x5b   : > { %2973 = vmatpush3.bf16.msra.mxu1 %v3273_v12  ;;  %v740_v54 = vsel %vm3497_vm5, %v2504_v48, %v739_v49  ;;  %v708_v12 = vld [vmem:[%s3386_s14 + $0x38] sm:$0xe]  ;;  %v3294_v48 = vld [vmem:[%s3802_s1 + $0xf0] sm:$0xff]  }
  0x5c   : > { %3069 = vmatpush3.bf16.msra.mxu0 %v3274_v2  ;;  %2974 = vmatprep.subr.bf16.mxu1 %v3275_v32  ;;  %v2527_v57 = vcombine.low %v740_v54, %v744_v55  ;;  %v2506_v2 = vrot.slane %v702_v62, 9  ;;  %v2509_v17 = vrot.slane %v708_v12, 9  ;;  %v1882_v55 = vshrl.u32 %v2710_v47, 16  ;;  %v2714_v12 = vld [vmem:[%s3386_s14 + $0x30] sm:$0xf] }
  0x5d   : > { %3070 = vmatprep.subr.bf16.mxu0 %v3276_v26 }
  0x5e   : > { %v748_v7 = vsel %vm3497_vm5, %v2506_v2, %v747_v3  ;;  %v760_v22 = vsel %vm3497_vm5, %v2509_v17, %v759_v19  ;;  %v1884_v63 = vrot.slane %v1882_v55, 4  ;;  %v3298_v2 = vld [vmem:[%s3802_s1 + $0x1f8] sm:$0xff]   ;;  %v1910_v17 = vshrl.u32 %v2714_v12, 16 }
  0x5f   : > { %2975 = vmatpush3.bf16.msra.mxu1 %v3275_v32  ;;  %v2528_v16 = vcombine.low %v748_v7, %v752_v11  ;;  %v2529_v24 = vcombine.low %v756_v21, %v760_v22  ;;  %v2709_v32 = vld [vmem:[%s3386_s14 + $0x1c] sm:$0x1]  ;;  %v1913_v19 = vshll.u32 %v2714_v12, 16  ;;  %v1924_v22 = vshrl.u32 %v2716_v14, 16 }
  0x60   : > { %3071 = vmatpush3.bf16.msra.mxu0 %v3276_v26  ;;  %2976 = vmatprep.subr.bf16.mxu1 %v3277_v41  ;;  %v3289_v26 = vld [vmem:[%s3802_s1 + $0xe0] sm:$0xff]   ;;  %v1877_v39 = vshll.u32 %v2709_v32, 16 }
  0x61   : > { %3072 = vmatprep.subr.bf16.mxu0 %v3278_v37  ;;  %v1926_v32 = vrot.slane %v1924_v22, 4 }
  0x62   : > { %v1879_v46 = vrot.slane %v1877_v39, 5  ;;  %v2719_v39 = vld [vmem:[%s3386_s14 + $0x44] sm:$0x1] }
  0x63   : > { %2977 = vmatpush3.bf16.msra.mxu1 %v3277_v41  ;;  %v1856_v41 = vrot.slane %v1854_v34, 4 }
  0x64   : > { %3073 = vmatpush3.bf16.msra.mxu0 %v3278_v37  ;;  %2986 = vmatprep.subr.bf16.mxu1 %v3279_v53  ;;  %v1868_v37 = vshrl.u32 %v2708_v31, 16 }
  0x65   : > { %3082 = vmatprep.subr.bf16.mxu0 %v3281_v52  ;;  %v1860_v49 = vor.u32 %v1859_v42, %v1856_v41  ;;  %v3302_v41 = vld [vmem:[%s3802_s1 + $0x208] sm:$0xff]  }
  0x66   : > { %2979 = vmatmul.mubr.bf16.vlgmr.msra.gmra.mrb[0].mxu1 %v2527_v57  ;;  %v1870_v44 = vrot.slane %v1868_v37, 4  ;;  %v1891_v57 = vshll.u32 %v2711_v50, 16  ;;  %v3303_v42 = vld [vmem:[%s3386_s14 + $0x28] ss:$8 sps:$4 sm:$0xff]  }
  0x67   : > { %3075 = vmatmul.mubr.bf16.vlgmr.msra.gmra.mrb[0].mxu0 %v3282_v56  ;;  %2987 = vmatpush3.bf16.msra.mxu1 %v3279_v53  ;;  %v3296_v53 = vld [vmem:[%s3802_s1 + $0x1f0] sm:$0xff]   ;;  %v1885_v56 = vshll.u32 %v2710_v47, 16  ;;  %v1947_v47 = vshll.u32 %v2719_v39, 16  ;;  %v2763_v39 = vld [vmem:[%s3386_s14 + $0x44] sm:$0x1] }
  0x68   : > { %3083 = vmatpush3.bf16.msra.mxu0 %v3281_v52  ;;  %2988 = vmatprep.subr.bf16.mxu1 %v3283_v59  ;;  %v2713_v52 = vld [vmem:[%s3386_s14 + $0x2c] sm:$0x1]  ;;  %v1874_v54 = vor.u32 %v1873_v45, %v1870_v44  ;;  %v1938_v45 = vshrl.u32 %v2718_v38, 16 }
  0x69   : > { %3084 = vmatprep.subr.bf16.mxu0 %v3284_v58  ;;  %3078 = vmatprep.mubr.bf16.mxu0 %v3293_v8  ;;  %v1887_v0 = vrot.slane %v1885_v56, 5  ;;  %v1893_v8 = vrot.slane %v1891_v57, 5  ;;  %v2721_v44 = vld [vmem:[%s3386_s14 + $0x4c] sm:$0x1]  ;;  %v1949_v55 = vrot.slane %v1947_v47, 5  ;;  %v2193_v47 = vrot.slane %v2763_v39, 5 }
  0x6a   : > { %2982 = vmatprep.mubr.bf16.mxu1 %v2528_v16  ;;  %v1875_v62 = vrot.slane %v1874_v54, 4  ;;  %v2717_v16 = vld [vmem:[%s3386_s14 + $0x3c] sm:$0x1] }
  0x6b   : > { %2989 = vmatpush3.bf16.msra.mxu1 %v3283_v59  ;;  %v1896_v59 = vshrl.u32 %v2712_v51, 16  ;;  %v1888_v7 = vor.u32 %v1887_v0, %v1884_v63 }
  0x6c   : > { %3085 = vmatpush3.bf16.msra.mxu0 %v3284_v58  ;;  %2990 = vmatprep.subr.bf16.mxu1 %v3285_v60  ;;  %v1861_v58 = vrot.slane %v1860_v49, 4 }
  0x6d   : > { %3086 = vmatprep.subr.bf16.mxu0 %v3286_v61  ;;  %v1898_v4 = vrot.slane %v1896_v59, 4  ;;  %v1889_v15 = vrot.slane %v1888_v7, 4  ;;  %v2752_v7 = vld [vmem:[%s3386_s14 + $0x18] sm:$0xe] }
  0x6e   : > { %2983 = vmatmul.mubr.bf16.gmra.mrb[4].mxu1 %v2529_v24  ;;  %v1866_v3 = vsel %vm3410_vm2, %v1861_v58, %v1865_v43  ;;  %v1933_v24 = vshll.u32 %v2717_v16, 16 }
  0x6f   : > { %2991 = vmatpush3.bf16.msra.mxu1 %v3285_v60  ;;  %3079 = vmatmul.mubr.bf16.gmra.mrb[4].mxu0 %v3295_v23  ;;  %v1899_v60 = vshll.u32 %v2712_v51, 16  ;;  %v1927_v23 = vshll.u32 %v2716_v14, 16  ;;  %v1961_v51 = vshll.u32 %v2721_v44, 16  ;;  %v2758_v14 = vld [vmem:[%s3386_s14 + $0x30] sm:$0xe] }
  0x70   : > { %3087 = vmatpush3.bf16.msra.mxu0 %v3286_v61  ;;  %2992 = vmatprep.subr.bf16.mxu1 %v3287_v20  ;;  %v1905_v61 = vshll.u32 %v2713_v52, 16  ;;  %v1935_v35 = vrot.slane %v1933_v24, 5 }
  0x71   : > { %3088 = vmatprep.subr.bf16.mxu0 %v3288_v6  ;;  %3002 = vmatprep.mubr.bf16.mxu1 %v3299_v28  ;;  %v1901_v5 = vrot.slane %v1899_v60, 5  ;;  %v1915_v28 = vrot.slane %v1913_v19, 5  ;;  %v1929_v34 = vrot.slane %v1927_v23, 5  ;;  %v1963_v59 = vrot.slane %v1961_v51, 5  ;;  %v3305_v60 = vld [vmem:[%s3802_s1 + $0x210] sm:$0xff]  }
  0x72   : > { %v1907_v9 = vrot.slane %v1905_v61, 5  ;;  %v2760_v19 = vld [vmem:[%s3386_s14 + $0x38] sm:$0xe] }
  0x73   : > { %2993 = vmatpush3.bf16.msra.mxu1 %v3287_v20  ;;  %v1902_v11 = vor.u32 %v1901_v5, %v1898_v4  ;;  %v1919_v20 = vshll.u32 %v2715_v13, 16  ;;  %v1930_v43 = vor.u32 %v1929_v34, %v1926_v32  ;;  %v2750_v4 = vld [vmem:[%s3386_s14 + $0x10] sm:$0xe]  ;;  %v2767_v13 = vrot.slane %v2752_v7, 9  ;;  %v2754_v34 = vld [vmem:[%s3386_s14 + $0x20] sm:$0xe] }
  0x74   : > { %3089 = vmatpush3.bf16.msra.mxu0 %v3288_v6  ;;  %2994 = vmatprep.subr.bf16.mxu1 %v3289_v26  ;;  %v1880_v6 = vsel %vm3410_vm2, %v1875_v62, %v1879_v46  ;;  %v1941_v46 = vshll.u32 %v2718_v38, 16  ;;  %v2771_v23 = vrot.slane %v2760_v19, 9  ;;  %v3309_v32 = vld [vmem:[%s3802_s1 + $0x230] sm:$0xff]   ;;  %v2762_v38 = vld [vmem:[%s3386_s14 + $0x40] sm:$0xe] }
  0x75   : > { %3090 = vmatprep.subr.bf16.mxu0 %v3290_v25  ;;  %v2738_v10 = vcombine.low %v1866_v3, %v1880_v6  ;;  %v1903_v21 = vrot.slane %v1902_v11, 4  ;;  %v1921_v29 = vrot.slane %v1919_v20, 5  ;;  %v1931_v52 = vrot.slane %v1930_v43, 4  ;;  %v2751_v6 = vld [vmem:[%s3386_s14 + $0x14] sm:$0x1] }
  0x76   : > { %v1943_v54 = vrot.slane %v1941_v46, 5  ;;  %v2766_v11 = vrot.slane %v2750_v4, 9  ;;  %v2169_v12 = vrot.slane %v2751_v6, 5  ;;  %v2770_v20 = vrot.slane %v2758_v14, 9 }
  0x77   : > { %2995 = vmatpush3.bf16.msra.mxu1 %v3289_v26  ;;  %3098 = vmatprep.mubr.bf16.mxu0 %v2738_v10  ;;  %v3301_v26 = vld [vmem:[%s3802_s1 + $0x200] sm:$0xff]   ;;  %v1908_v31 = vsel %vm3410_vm2, %v1903_v21, %v1907_v9  ;;  %v1936_v61 = vsel %vm3410_vm2, %v1931_v52, %v1935_v35  ;;  %v3306_v10 = vld [vmem:[%s3802_s1 + $0x218] sm:$0xff]   ;;  %v2772_v46 = vrot.slane %v2762_v38, 9 }
  0x78   : > { %3091 = vmatpush3.bf16.msra.mxu0 %v3290_v25  ;;  %2996 = vmatprep.subr.bf16.mxu1 %v3291_v40  ;;  %v1894_v25 = vsel %vm3410_vm2, %v1889_v15, %v1893_v8  ;;  %v2753_v8 = vld [vmem:[%s3386_s14 + $0x1c] sm:$0x1]  ;;  %v2170_v21 = vsel %vm3497_vm5, %v2766_v11, %v2169_v12  ;;  %v2755_v35 = vld [vmem:[%s3386_s14 + $0x24] sm:$0x1] }
  0x79   : > { %3092 = vmatprep.subr.bf16.mxu0 %v3292_v27  ;;  %v2739_v36 = vcombine.low %v1894_v25, %v1908_v31  ;;  %v2173_v16 = vrot.slane %v2753_v8, 5  ;;  %v2189_v25 = vrot.slane %v2761_v33, 5  ;;  %v3308_v31 = vld [vmem:[%s3802_s1 + $0x228] sm:$0xff]   ;;  %v2177_v43 = vrot.slane %v2755_v35, 5 }
  0x7b   : > { %2997 = vmatpush3.bf16.msra.mxu1 %v3291_v40  ;;  %v2720_v40 = vld [vmem:[%s3386_s14 + $0x48] sm:$0xf]  ;;  %v2174_v24 = vsel %vm3497_vm5, %v2767_v13, %v2173_v16 }
  0x7c   : > { %3093 = vmatpush3.bf16.msra.mxu0 %v3292_v27  ;;  %2998 = vmatprep.subr.bf16.mxu1 %v3294_v48  ;;  %v1912_v27 = vrot.slane %v1910_v17, 4  ;;  %v1952_v49 = vshrl.u32 %v2720_v40, 16  ;;  %v1955_v50 = vshll.u32 %v2720_v40, 16  ;;  %v2759_v17 = vld [vmem:[%s3386_s14 + $0x34] sm:$0x1] }
  0x7d   : > { %3094 = vmatprep.subr.bf16.mxu0 %v3296_v53  ;;  %v2185_v22 = vrot.slane %v2759_v17, 5  ;;  %v2764_v40 = vld [vmem:[%s3386_s14 + $0x48] sm:$0xe] }
  0x7e   : > { %v1916_v37 = vor.u32 %v1915_v28, %v1912_v27  ;;  %v1954_v57 = vrot.slane %v1952_v49, 4  ;;  %v1957_v58 = vrot.slane %v1955_v50, 5  ;;  %v3307_v28 = vld [vmem:[%s3802_s1 + $0x220] sm:$0xff]   ;;  %v3310_v50 = vld [vmem:[%s3802_s1 + $0x238] sm:$0xff]  }
  0x7f   : > { %2999 = vmatpush3.bf16.msra.mxu1 %v3294_v48  ;;  %v2186_v27 = vsel %vm3497_vm5, %v2770_v20, %v2185_v22 }
  0x80   : > { %3095 = vmatpush3.bf16.msra.mxu0 %v3296_v53  ;;  %3000 = vmatprep.subr.bf16.mxu1 %v3297_v1  ;;  %v1917_v48 = vrot.slane %v1916_v37, 4  ;;  %v1940_v53 = vrot.slane %v1938_v45, 4  ;;  %v1958_v0 = vor.u32 %v1957_v58, %v1954_v57  ;;  %v2757_v37 = vld [vmem:[%s3386_s14 + $0x2c] sm:$0x1] }
  0x81   : > { %3096 = vmatprep.subr.bf16.mxu0 %v3298_v2  ;;  %v2181_v45 = vrot.slane %v2757_v37, 5 }
  0x82   : > { %v1922_v56 = vsel %vm3410_vm2, %v1917_v48, %v1921_v29  ;;  %v1944_v62 = vor.u32 %v1943_v54, %v1940_v53  ;;  %v1959_v3 = vrot.slane %v1958_v0, 4  ;;  %v2190_v29 = vsel %vm3497_vm5, %v2771_v23, %v2189_v25 }
  0x83   : > { %3001 = vmatpush3.bf16.msra.mxu1 %v3297_v1  ;;  %v2740_v63 = vcombine.low %v1922_v56, %v1936_v61  ;;  %v3304_v1 = vld [vmem:[%s3386_s14 + $0x38] ss:$8 sps:$4 sm:$0xff]   ;;  %v2773_v48 = vrot.slane %v2764_v40, 9  ;;  %v2194_v53 = vsel %vm3497_vm5, %v2772_v46, %v2193_v47 }
  0x84   : > { %3097 = vmatpush3.bf16.msra.mxu0 %v3298_v2  ;;  %3130 = vmatprep.subr.bf16.mxu1 %v3301_v26  ;;  %v1945_v2 = vrot.slane %v1944_v62, 4  ;;  %v1964_v9 = vsel %vm3410_vm2, %v1959_v3, %v1963_v59 }
  0x85   : > { %3106 = vmatprep.subr.bf16.mxu0 %v3301_v26 }
  0x86   : > { %3003 = vmatmul.mubr.bf16.vlgmr.msra.gmra.mrb[0].mxu1 %v3300_v30  ;;  %v1950_v5 = vsel %vm3410_vm2, %v1945_v2, %v1949_v55  ;;  %v2792_v30 = vcombine.low %v2186_v27, %v2190_v29 }
  0x87   : > { %3099 = vmatmul.mubr.bf16.vlgmr.msra.gmra.mrb[0].mxu0 %v2739_v36  ;;  %3138 = vmatpush3.bf16.msra.mxu1 %v3301_v26  ;;  %v2741_v15 = vcombine.low %v1950_v5, %v1964_v9  ;;  %v2756_v36 = vld [vmem:[%s3386_s14 + $0x28] sm:$0xe] }
  0x88   : > { %3107 = vmatpush3.bf16.msra.mxu0 %v3301_v26  ;;  %3131 = vmatprep.subr.bf16.mxu1 %v3302_v41  ;;  %v2790_v26 = vcombine.low %v2170_v21, %v2174_v24  ;;  %v2769_v44 = vrot.slane %v2756_v36, 9 }
  0x89   : > { %3108 = vmatprep.subr.bf16.mxu0 %v3302_v41  ;;  %3006 = vmatprep.mubr.bf16.mxu1 %v3303_v42  ;;  %v2768_v42 = vrot.slane %v2754_v34, 9 }
  0x8a   : > { %3102 = vmatprep.mubr.bf16.mxu0 %v2740_v63  ;;  %v2182_v52 = vsel %vm3497_vm5, %v2769_v44, %v2181_v45 }
  0x8b   : > { %3139 = vmatpush3.bf16.msra.mxu1 %v3302_v41  ;;  %v2178_v51 = vsel %vm3497_vm5, %v2768_v42, %v2177_v43 }
  0x8c   : > { %3109 = vmatpush3.bf16.msra.mxu0 %v3302_v41  ;;  %3132 = vmatprep.subr.bf16.mxu1 %v3305_v60  ;;  %v2765_v41 = vld [vmem:[%s3386_s14 + $0x4c] sm:$0x1]  ;;  %v2791_v55 = vcombine.low %v2178_v51, %v2182_v52  ;;  %s2804_s14 = sshll.u32 %s3810_s13, 6 }
  0x8d   : > { %3110 = vmatprep.subr.bf16.mxu0 %v3305_v60  ;;  %v2197_v49 = vrot.slane %v2765_v41, 5  ;;  %s185_s19 = scalar_lea.vmem %s3803_s2, %s2804_s14  ;;  %s190_s22 = scalar_lea.vmem %s3804_s3, %s2804_s14 }
  0x8e   : > { %3007 = vmatmul.mubr.bf16.gmra.mrb[4].mxu1 %v3304_v1  ;;  %v194_v57 = vld [vmem:[%s185_s19 + $0x10] sm:$0xff]  ;;  %v192_v58 = vld [vmem:[%s185_s19] sm:$0xff]  ;;  %v193_v62 = vld [vmem:[%s185_s19 + $0x8] sm:$0xff] }
  0x8f   : > { %3103 = vmatmul.mubr.bf16.gmra.mrb[4].mxu0 %v2741_v15  ;;  %3140 = vmatpush3.bf16.msra.mxu1 %v3305_v60  ;;  %v2198_v54 = vsel %vm3497_vm5, %v2773_v48, %v2197_v49  ;;  %v198_v4 = vld [vmem:[%s185_s19 + $0x30] sm:$0xff]  ;;  %v196_v5 = vld [vmem:[%s185_s19 + $0x20] sm:$0xff]  ;;  %v199_v8 = vld [vmem:[%s185_s19 + $0x38] sm:$0xff] }
  0x90   : > { %3111 = vmatpush3.bf16.msra.mxu0 %v3305_v60  ;;  %3133 = vmatprep.subr.bf16.mxu1 %v3306_v10  ;;  %v2793_v56 = vcombine.low %v2194_v53, %v2198_v54  ;;  %v195_v60 = vld [vmem:[%s185_s19 + $0x18] sm:$0xff]  ;;  %v197_v12 = vld [vmem:[%s185_s19 + $0x28] sm:$0xff] }
  0x91   : > { %3112 = vmatprep.subr.bf16.mxu0 %v3306_v10  ;;  %3122 = vmatprep.mubr.bf16.mxu0 %v2790_v26 }
  0x92   : > { %3126 = vmatprep.mubr.bf16.mxu1 %v2792_v30 }
  0x93   : > { %3141 = vmatpush3.bf16.msra.mxu1 %v3306_v10 }
  0x94   : > { %3113 = vmatpush3.bf16.msra.mxu0 %v3306_v10  ;;  %3134 = vmatprep.subr.bf16.mxu1 %v3307_v28 }
  0x95   : > { %3114 = vmatprep.subr.bf16.mxu0 %v3307_v28 }
  0x97   : > { %3142 = vmatpush3.bf16.msra.mxu1 %v3307_v28 }
  0x98   : > { %3115 = vmatpush3.bf16.msra.mxu0 %v3307_v28  ;;  %3135 = vmatprep.subr.bf16.mxu1 %v3308_v31 }
  0x99   : > { %3116 = vmatprep.subr.bf16.mxu0 %v3308_v31 }
  0x9b   : > { %3143 = vmatpush3.bf16.msra.mxu1 %v3308_v31 }
  0x9c   : > { %3117 = vmatpush3.bf16.msra.mxu0 %v3308_v31  ;;  %3136 = vmatprep.subr.bf16.mxu1 %v3309_v32 }
  0x9d   : > { %3118 = vmatprep.subr.bf16.mxu0 %v3309_v32 }
  0x9f   : > { %3144 = vmatpush3.bf16.msra.mxu1 %v3309_v32 }
  0xa0   : > { %3119 = vmatpush3.bf16.msra.mxu0 %v3309_v32  ;;  %3137 = vmatprep.subr.bf16.mxu1 %v3310_v50 }
  0xa1   : > { %3120 = vmatprep.subr.bf16.mxu0 %v3310_v50 }
  0xa3   : > { %3145 = vmatpush3.bf16.msra.mxu1 %v3310_v50 }
  0xa4   : > { %3121 = vmatpush3.bf16.msra.mxu0 %v3310_v50 }
  0xa6   : > { %3127 = vmatmul.mubr.bf16.vlgmr.msra.gmra.mrb[8].mxu1 %v2793_v56 }
  0xa7   : > { %3123 = vmatmul.mubr.bf16.vlgmr.msra.gmra.mrb[0].mxu0 %v2791_v55 }
 0x159   : > { %v3004_v59 = vpop.f32.mrb[0].mxu1 }
 0x15a   : > { %v3146_v18 = vadd.f32 %v3004_v59, %v194_v57  ;;  %v1071_v61 = vpop.f32.mrb[1].mxu1 }
 0x15b   : > { %v3148_v63 = vadd.f32 %v1071_v61, %v192_v58  ;;  %v3005_v0 = vpop.f32.mrb[2].mxu1 }
 0x15c   : > { %v3150_v1 = vadd.f32 %v3005_v0, %v195_v60  ;;  %v1074_v2 = vpop.f32.mrb[3].mxu1 }
 0x15d   : > { %v3152_v3 = vadd.f32 %v1074_v2, %v193_v62 }
 0x161   : > { %v3008_v6 = vpop.f32.mrb[4].mxu1 }
 0x162   : > { %v3104_v7 = vpop.f32.mrb[4].mxu0  ;;  %v3154_v9 = vadd.f32 %v3008_v6, %v198_v4  ;;  %v1087_v10 = vpop.f32.mrb[5].mxu1 }
 0x163   : > { %v2104_v11 = vpop.f32.mrb[5].mxu0  ;;  %v3157_v13 = vadd.f32 %v1087_v10, %v196_v5  ;;  %v3009_v14 = vpop.f32.mrb[6].mxu1 }
 0x164   : > { %v3105_v15 = vpop.f32.mrb[6].mxu0  ;;  %v3155_v16 = vadd.f32 %v3154_v9, %v3104_v7  ;;  %v3160_v17 = vadd.f32 %v3009_v14, %v199_v8  ;;  %v1090_v19 = vpop.f32.mrb[7].mxu1 }
 0x165   : > { %v2107_v20 = vpop.f32.mrb[7].mxu0  ;;  %v3158_v21 = vadd.f32 %v3157_v13, %v2104_v11  ;;  %v3163_v33 = vadd.f32 %v1090_v19, %v197_v12 }
 0x166   : > { %v3161_v22 = vadd.f32 %v3160_v17, %v3105_v15 }
 0x167   : > { %v3164_v23 = vadd.f32 %v3163_v33, %v2107_v20 }
 0x179   : > { %v3128_v25 = vpop.f32.mrb[8].mxu1 }
 0x17a   : > { %v3124_v24 = vpop.f32.mrb[0].mxu0  ;;  %v3156_v27 = vadd.f32 %v3155_v16, %v3128_v25  ;;  %v2338_v29 = vpop.f32.mrb[9].mxu1 }
 0x17b   : > { %v3147_v26 = vadd.f32 %v3146_v18, %v3124_v24  ;;  %v2322_v28 = vpop.f32.mrb[1].mxu0  ;;  %v3159_v31 = vadd.f32 %v3158_v21, %v2338_v29  ;;  %v3129_v34 = vpop.f32.mrb[10].mxu1 }
 0x17c   : > { %v3149_v30 = vadd.f32 %v3148_v63, %v2322_v28  ;;  %v3125_v32 = vpop.f32.mrb[2].mxu0  ;;  %2383 = vst [vmem:[%s190_s22 + $0x30] sm:$0xff] %v3156_v27  ;;  %v3162_v36 = vadd.f32 %v3161_v22, %v3129_v34  ;;  %v2341_v38 = vpop.f32.mrb[11].mxu1 }
 0x17d   : > { %2379 = vst [vmem:[%s190_s22 + $0x10] sm:$0xff] %v3147_v26  ;;  %v3151_v35 = vadd.f32 %v3150_v1, %v3125_v32  ;;  %v2325_v37 = vpop.f32.mrb[3].mxu0  ;;  %2381 = vst [vmem:[%s190_s22 + $0x20] sm:$0xff] %v3159_v31  ;;  %v3165_v40 = vadd.f32 %v3164_v23, %v2341_v38 }
 0x17e   : > { %2377 = vst [vmem:[%s190_s22] sm:$0xff] %v3149_v30  ;;  %v3153_v39 = vadd.f32 %v3152_v3, %v2325_v37  ;;  %2384 = vst [vmem:[%s190_s22 + $0x38] sm:$0xff] %v3162_v36 }
 0x17f   : > { %2380 = vst [vmem:[%s190_s22 + $0x18] sm:$0xff] %v3151_v35  ;;  %2382 = vst [vmem:[%s190_s22 + $0x28] sm:$0xff] %v3165_v40 }
 0x180   : > { %2378 = vst [vmem:[%s190_s22 + $0x8] sm:$0xff] %v3153_v39 }
 0x181 PF: > { %s13_s12 = sadd.s32 1, %s3317_s12  }
 0x182   : > { %p10_p4 = scmp.ge.s32.totalorder %s13_s12, 4  }
 0x184   :  { %12 = sbr.rel (!%p10_p4) target bundleno = 1 (0x1), region = 75 }

</bundles_post_ra>
